<compile_context>
chip_gen: v5e
topology: v5e:2x2
jax: 0.10.0
libtpu: 0.0.40
codegen_flags: <defaults>
</compile_context>

<pallas_src>
import math

import jax
import jax.numpy as jnp
from jax.experimental import pallas as pl
from jax.experimental.pallas import tpu as pltpu

# ---------------- model hyper-parameters (small, synthetic) ----------------
B, T, C = 2, 16, 32          # batch, time, embed dim
H = 4                        # attention heads
DH = C // H                  # head dim
FFN = 64                     # ffn embed dim
NUM_LAYERS = 2
CONV_POS = 8                 # positional conv kernel (even -> SamePad trims 1)
CONV_POS_GROUPS = 4
POOL_K, POOL_S, POOL_PAD = 3, 2, 1
T2 = (T + 2 * POOL_PAD - POOL_K) // POOL_S + 1   # pooled length (= 8)
LN_EPS = 1e-5
_SQRT2 = math.sqrt(2.0)
_NEG_INF = -1e30             # numerically equivalent to masked_fill(-inf)
VEC_W = 3 * C                # width of the packed vector slab (bqkv is widest)

# ---------------- packed-slab row offsets (w32 slab: all 32-col weights) ----
ROW_POS0 = 0                          # encoder-level pos conv  (CONV_POS*C rows)
ROW_POS1 = ROW_POS0 + CONV_POS * C    # extra pos conv (after pool)
ROW_POOL = ROW_POS1 + CONV_POS * C    # pool conv (POOL_K*C rows, no bias)
ROW_SEL = ROW_POOL + POOL_K * C       # stride-2 selection matrix (T2 rows)
ROW_LAYER0 = ROW_SEL + T2             # per-layer: wo (C rows) + w2 (FFN rows)
W32_PER_LAYER = C + FFN
# vec slab rows
VROW_POS0_B, VROW_LN_G, VROW_LN_B = 0, 1, 2
VROW_POOL_G, VROW_POOL_B, VROW_POS1_B = 3, 4, 5
VROW_LAYER0 = 6
VEC_PER_LAYER = 8   # bqkv, bo, ln1_g, ln1_b, b1, b2, ln2_g, ln2_b


# ---------------- in-kernel math helpers ----------------
def _gelu(x):
    # exact (erf) GELU, matching torch.nn.GELU / F.gelu defaults
    return x * 0.5 * (1.0 + jax.lax.erf(x / _SQRT2))


def _layer_norm(x, g, b):
    mu = jnp.mean(x, axis=-1, keepdims=True)
    xc = x - mu
    var = jnp.mean(xc * xc, axis=-1, keepdims=True)
    inv = jax.lax.rsqrt(var + LN_EPS)
    return xc * inv * g + b


# ---------------- the single fused kernel ----------------
def fused_forward_kernel(x_ref, keep0_ref, amask0_ref, amask1_ref,
                         w32_ref, w96_ref, w64_ref, vec_ref,
                         out0_ref, out1_ref):
    """Whole TransformerFastEncoder forward for one batch element (grid over B).
    x: (T, C); keep0: (T, 1) multiplicative; amask0/amask1: (1, T)/(1, T2) additive."""
    Tn = x_ref.shape[0]
    T2n = out1_ref.shape[0]

    def vrow(r, n=C):
        return vec_ref[r:r + 1, :n]                      # (1, n) bias / LN vector

    def conv_taps(xin, base, k_taps, pad_l, pad_r):
        """1-D conv over time as k_taps accumulated MXU matmuls on shifted windows
        (in-kernel window build; no host im2col, no 8x-expanded input)."""
        tl = xin.shape[0]
        xp = jnp.concatenate([jnp.zeros((pad_l, C), jnp.float32), xin,
                              jnp.zeros((pad_r, C), jnp.float32)], axis=0)
        acc = jnp.zeros((tl, C), jnp.float32)
        for k in range(k_taps):                          # static unroll
            acc = acc + jnp.dot(xp[k:k + tl, :],
                                w32_ref[base + k * C:base + (k + 1) * C, :],
                                preferred_element_type=jnp.float32)
        return acc

    def encoder_layer(xin, amask, li):
        """Post-norm TransformerSentenceEncoderLayer (eval mode)."""
        tl = xin.shape[0]
        vbase = VROW_LAYER0 + li * VEC_PER_LAYER
        wbase = ROW_LAYER0 + li * W32_PER_LAYER
        # fused QKV projection; 1/sqrt(DH) is folded into the Q weights/bias at init
        qkv = jnp.dot(xin, w96_ref[li * C:(li + 1) * C, :],
                      preferred_element_type=jnp.float32) + vrow(vbase + 0, 3 * C)
        amask2 = jnp.broadcast_to(amask, (tl, tl))       # hoisted out of head loop
        attn = jnp.zeros((tl, C), jnp.float32)
        for h in range(H):                               # heads = static lane slices
            lo = h * DH
            q = qkv[:, lo:lo + DH]
            k = qkv[:, C + lo:C + lo + DH]
            v = qkv[:, 2 * C + lo:2 * C + lo + DH]
            s = jax.lax.dot_general(q, k, (((1,), (1,)), ((), ())),
                                    preferred_element_type=jnp.float32)
            s = s + amask2                               # key-padding mask
            p = jnp.exp(s - jnp.max(s, axis=-1, keepdims=True))
            p = p * pl.reciprocal(jnp.sum(p, axis=-1, keepdims=True), approx=True)
            ctx_h = jnp.dot(p, v, preferred_element_type=jnp.float32)
            # head-concat folded into the out-projection (register-resident, no scratch)
            attn = attn + jnp.dot(ctx_h,
                                  w32_ref[wbase + lo:wbase + lo + DH, :],
                                  preferred_element_type=jnp.float32)
        attn = attn + vrow(vbase + 1)
        x1 = _layer_norm(attn + xin, vrow(vbase + 2), vrow(vbase + 3))
        hid = _gelu(jnp.dot(x1, w64_ref[li * C:(li + 1) * C, :],
                            preferred_element_type=jnp.float32) + vrow(vbase + 4, FFN))
        out = jnp.dot(hid, w32_ref[wbase + C:wbase + C + FFN, :],
                      preferred_element_type=jnp.float32) + vrow(vbase + 5)
        return _layer_norm(out + x1, vrow(vbase + 6), vrow(vbase + 7))

    # ---- index_put(x, padding_mask, 0) ----
    x = x_ref[...] * keep0_ref[...]

    # ---- encoder-level pos_conv + SamePad + GELU + residual + LayerNorm ----
    pos = conv_taps(x, ROW_POS0, CONV_POS, CONV_POS // 2, CONV_POS // 2 - 1)
    x = x + _gelu(pos + vrow(VROW_POS0_B))
    x = _layer_norm(x, vrow(VROW_LN_G), vrow(VROW_LN_B))

    # ---- transformer layer 0 ----
    x = encoder_layer(x, amask0_ref[...], 0)
    out0_ref[...] = x                                     # layer_results[0]

    # ---- PoolLayer: stride-2 conv (stride-1 conv + selection matmul) + Fp32LN + GELU
    full = conv_taps(x, ROW_POOL, POOL_K, POOL_PAD, POOL_PAD)     # (T, C), no bias
    sel = w32_ref[ROW_SEL:ROW_SEL + T2n, :Tn]                     # (T2, T) 0/1 decimator
    x = jnp.dot(sel, full, preferred_element_type=jnp.float32)    # (T2, C)
    x = _gelu(_layer_norm(x, vrow(VROW_POOL_G), vrow(VROW_POOL_B)))

    # ---- extra pos_conv applied after pooling (pos_gelu=True, pos_norm=False) ----
    pos = conv_taps(x, ROW_POS1, CONV_POS, CONV_POS // 2, CONV_POS // 2 - 1)
    x = x + _gelu(pos + vrow(VROW_POS1_B))

    # ---- transformer layer 1 ----
    x = encoder_layer(x, amask1_ref[...], 1)
    out1_ref[...] = x                                     # final x / layer_results[1]


# ---------------- pallas_call wrapper ----------------
def _fused_forward_call(params, x, keep0, amask0, amask1):
    Bc, Tc, Cc = x.shape
    T2c = amask1.shape[-1]
    in_specs = [
        pl.BlockSpec((pl.Squeezed(), Tc, Cc), lambda b: (b, 0, 0)),   # x
        pl.BlockSpec((pl.Squeezed(), Tc, 1), lambda b: (b, 0, 0)),    # keep mask
        pl.BlockSpec((pl.Squeezed(), 1, Tc), lambda b: (b, 0, 0)),    # attn mask (pre-pool)
        pl.BlockSpec((pl.Squeezed(), 1, T2c), lambda b: (b, 0, 0)),   # attn mask (post-pool)
        pl.BlockSpec(params['w32'].shape, lambda b: (0, 0)),          # packed weight slabs
        pl.BlockSpec(params['w96'].shape, lambda b: (0, 0)),
        pl.BlockSpec(params['w64'].shape, lambda b: (0, 0)),
        pl.BlockSpec(params['vec'].shape, lambda b: (0, 0)),
    ]
    out_specs = (
        pl.BlockSpec((pl.Squeezed(), Tc, Cc), lambda b: (b, 0, 0)),
        pl.BlockSpec((pl.Squeezed(), T2c, Cc), lambda b: (b, 0, 0)),
    )
    out_shape = (jax.ShapeDtypeStruct((Bc, Tc, Cc), jnp.float32),
                 jax.ShapeDtypeStruct((Bc, T2c, Cc), jnp.float32))
    return pl.pallas_call(
        fused_forward_kernel,
        out_shape=out_shape,
        grid=(Bc,),
        in_specs=in_specs,
        out_specs=out_specs,
        compiler_params=pltpu.CompilerParams(dimension_semantics=("parallel",)),
    )(x, keep0, amask0, amask1,
      params['w32'], params['w96'], params['w64'], params['vec'])


# ---------------- parameter setup (deterministic, synthetic) ----------------
def _grouped_to_dense(w, groups):
    """Conv1d weight (Cout, Cin/groups, K) -> dense per-tap (K*Cin, Cout) matrix."""
    Cout, Cin_g, K = w.shape
    Cg = Cout // groups
    wd = jnp.zeros((K, Cg * groups, Cout), jnp.float32)
    for g in range(groups):
        blk = jnp.transpose(w[g * Cg:(g + 1) * Cg], (2, 1, 0))  # (K, Cin_g, Cg)
        wd = wd.at[:, g * Cg:(g + 1) * Cg, g * Cg:(g + 1) * Cg].set(blk)
    return wd.reshape(K * Cg * groups, Cout)


def _padvec(v, width=VEC_W):
    v = v.astype(jnp.float32)
    return jnp.pad(v, ((0, 0), (0, width - v.shape[1])))


def init_params(key):
    keys = iter(jax.random.split(key, 64))

    def nrm(shape, scale=0.02):
        return scale * jax.random.normal(next(keys), shape, jnp.float32)

    # positional convs (weight_norm reparam folded into the effective weight, bias=0)
    std = math.sqrt(4.0 / (CONV_POS * C))
    pos0_w = _grouped_to_dense(nrm((C, C // CONV_POS_GROUPS, CONV_POS), scale=std),
                               CONV_POS_GROUPS)
    pos1_w = _grouped_to_dense(nrm((C, C // CONV_POS_GROUPS, CONV_POS), scale=std),
                               CONV_POS_GROUPS)
    # pool conv: Conv1d(C, C, 3, stride=2, pad=1, bias=False), kaiming init
    kaiming = math.sqrt(2.0 / (C * POOL_K))
    pool_w = jnp.transpose(nrm((C, C, POOL_K), scale=kaiming),
                           (2, 1, 0)).reshape(POOL_K * C, C)
    # stride-2 decimation as a 0/1 selection matrix (padded to 32 cols for the slab)
    sel = jnp.zeros((T2, C), jnp.float32)
    sel = sel.at[jnp.arange(T2), POOL_S * jnp.arange(T2)].set(1.0)

    scale = 1.0 / math.sqrt(DH)
    vec_rows = [
        _padvec(jnp.zeros((1, C), jnp.float32)),   # pos0_b
        _padvec(jnp.ones((1, C), jnp.float32)),    # encoder ln_g
        _padvec(jnp.zeros((1, C), jnp.float32)),   # encoder ln_b
        _padvec(jnp.ones((1, C), jnp.float32)),    # pool Fp32LayerNorm gamma
        _padvec(jnp.zeros((1, C), jnp.float32)),   # pool Fp32LayerNorm beta
        _padvec(jnp.zeros((1, C), jnp.float32)),   # pos1_b
    ]
    w32_blocks = [pos0_w, pos1_w, pool_w, sel]
    w96_blocks, w64_blocks = [], []
    for _ in range(NUM_LAYERS):
        wq, wk, wv = nrm((C, C)), nrm((C, C)), nrm((C, C))
        bq, bk, bv = nrm((1, C)), nrm((1, C)), nrm((1, C))
        wqkv = jnp.concatenate([wq * scale, wk, wv], axis=1)        # scale folded into Q
        bqkv = jnp.concatenate([bq * scale, bk, bv], axis=1)
        wo, w1, w2 = nrm((C, C)), nrm((C, FFN)), nrm((FFN, C))
        w96_blocks.append(wqkv)
        w64_blocks.append(w1)
        w32_blocks += [wo, w2]
        vec_rows += [
            bqkv,                                                   # (1, 3C)
            _padvec(jnp.zeros((1, C), jnp.float32)),                # bo
            _padvec(jnp.ones((1, C), jnp.float32)),                 # ln1_g
            _padvec(jnp.zeros((1, C), jnp.float32)),                # ln1_b
            _padvec(jnp.zeros((1, FFN), jnp.float32)),              # b1
            _padvec(jnp.zeros((1, C), jnp.float32)),                # b2
            _padvec(jnp.ones((1, C), jnp.float32)),                 # ln2_g
            _padvec(jnp.zeros((1, C), jnp.float32)),                # ln2_b
        ]
    return {
        'w32': jnp.concatenate(w32_blocks, axis=0),   # (808, 32)
        'w96': jnp.concatenate(w96_blocks, axis=0),   # (64, 96)  fused QKV
        'w64': jnp.concatenate(w64_blocks, axis=0),   # (64, 64)  fc1
        'vec': jnp.concatenate(vec_rows, axis=0),     # (22, 96)  all bias/LN vectors
    }


# ---------------- forward (matches TransformerFastEncoder.forward, eval mode) ---
def transformer_fast_encoder(params, x, padding_mask):
    """Returns (x, layer_results, padding_mask) matching the PyTorch forward."""
    keep0 = jnp.logical_not(padding_mask).astype(jnp.float32)[..., None]       # (B, T, 1)
    amask0 = jnp.where(padding_mask, jnp.float32(_NEG_INF),
                       jnp.float32(0.0))[:, None, :]                            # (B, 1, T)
    # padding mask after the stride-2 pool (conv output-length formula)
    input_lengths = jnp.sum(1 - padding_mask.astype(jnp.int32), axis=-1)
    out_lengths = (input_lengths + 2 * POOL_PAD - POOL_K) // POOL_S + 1
    new_mask = jnp.arange(T2)[None, :] >= out_lengths[:, None]                  # (B, T2)
    amask1 = jnp.where(new_mask, jnp.float32(_NEG_INF),
                       jnp.float32(0.0))[:, None, :]                            # (B, 1, T2)

    out0, out1 = _fused_forward_call(params, x, keep0, amask0, amask1)
    layer_results = [jnp.transpose(out0, (1, 0, 2)),   # (T, B, C) as in PyTorch
                     jnp.transpose(out1, (1, 0, 2))]   # (T2, B, C)
    # layer_norm_first=False -> no final layer_norm in forward()
    return out1, layer_results, new_mask


# ---------------- run ----------------
if __name__ == "__main__":
    key = jax.random.PRNGKey(0)
    kx, kp = jax.random.split(key)
    params = init_params(kp)

    x = jax.random.normal(kx, (B, T, C), jnp.float32)
    lengths = jnp.array([T, T - 4], jnp.int32)                 # sample lengths
    padding_mask = jnp.arange(T)[None, :] >= lengths[:, None]  # True = padded

    fwd = jax.jit(transformer_fast_encoder)
    out, layer_results, new_mask = fwd(params, x, padding_mask)
    jax.block_until_ready(out)
    for lr in layer_results:
        jax.block_until_ready(lr)
    jax.block_until_ready(new_mask)

    assert out.shape == (B, T2, C)
    assert new_mask.shape == (B, T2)
    assert layer_results[0].shape == (T, B, C)
    assert layer_results[1].shape == (T2, B, C)
    print("KERNEL_OK")
</pallas_src>

<mosaic_0001>
module attributes {stable_mosaic.version = 11 : i64} {
  func.func @fused_forward_kernel(%arg0: i32, %arg1: memref<1x16x32xf32, #tpu.memory_space<vmem>>, %arg2: memref<1x16x1xf32, #tpu.memory_space<vmem>>, %arg3: memref<1x1x16xf32, #tpu.memory_space<vmem>>, %arg4: memref<1x1x8xf32, #tpu.memory_space<vmem>>, %arg5: memref<808x32xf32, #tpu.memory_space<vmem>>, %arg6: memref<64x96xf32, #tpu.memory_space<vmem>>, %arg7: memref<64x64xf32, #tpu.memory_space<vmem>>, %arg8: memref<22x96xf32, #tpu.memory_space<vmem>>, %arg9: memref<1x16x32xf32, #tpu.memory_space<vmem>>, %arg10: memref<1x8x32xf32, #tpu.memory_space<vmem>>) attributes {dimension_semantics = [#tpu.dimension_semantics<parallel>], iteration_bounds = array<i64: 2>, scalar_prefetch = 0 : i64, scratch_operands = 0 : i64, tpu.core_type = #tpu.core_type<tc>, window_params = [{transform_indices = @transform_0, window_bounds = array<i64: 1, 16, 32>}, {transform_indices = @transform_1, window_bounds = array<i64: 1, 16, 1>}, {transform_indices = @transform_2, window_bounds = array<i64: 1, 1, 16>}, {transform_indices = @transform_3, window_bounds = array<i64: 1, 1, 8>}, {pipeline_mode = #tpu.pipeline_mode<synchronous>, transform_indices = @transform_4, window_bounds = array<i64: 808, 32>}, {pipeline_mode = #tpu.pipeline_mode<synchronous>, transform_indices = @transform_5, window_bounds = array<i64: 64, 96>}, {pipeline_mode = #tpu.pipeline_mode<synchronous>, transform_indices = @transform_6, window_bounds = array<i64: 64, 64>}, {pipeline_mode = #tpu.pipeline_mode<synchronous>, transform_indices = @transform_7, window_bounds = array<i64: 22, 96>}, {transform_indices = @transform_8, window_bounds = array<i64: 1, 16, 32>}, {transform_indices = @transform_9, window_bounds = array<i64: 1, 8, 32>}]} {
    %c0 = arith.constant 0 : index
    %c0_0 = arith.constant 0 : index
    %c0_1 = arith.constant 0 : index
    %0 = vector.load %arg1[%c0, %c0_0, %c0_1] : memref<1x16x32xf32, #tpu.memory_space<vmem>>, vector<1x16x32xf32>
    %1 = vector.shape_cast %0 : vector<1x16x32xf32> to vector<16x32xf32>
    %c0_2 = arith.constant 0 : index
    %c0_3 = arith.constant 0 : index
    %c0_4 = arith.constant 0 : index
    %2 = vector.load %arg2[%c0_2, %c0_3, %c0_4] : memref<1x16x1xf32, #tpu.memory_space<vmem>>, vector<1x16x1xf32>
    %3 = vector.shape_cast %2 : vector<1x16x1xf32> to vector<16x1xf32>
    %4 = vector.broadcast %3 : vector<16x1xf32> to vector<16x32xf32>
    %5 = arith.mulf %1, %4 : vector<16x32xf32>
    %cst = arith.constant 0.000000e+00 : f32
    %6 = vector.broadcast %cst : f32 to vector<4x32xf32>
    %cst_5 = arith.constant 0.000000e+00 : f32
    %7 = vector.broadcast %cst_5 : f32 to vector<3x32xf32>
    %8 = tpu.concatenate %6, %5, %7 in 0 : vector<4x32xf32>, vector<16x32xf32>, vector<3x32xf32> -> vector<23x32xf32>
    %cst_6 = arith.constant 0.000000e+00 : f32
    %9 = vector.broadcast %cst_6 : f32 to vector<16x32xf32>
    %10 = vector.extract_strided_slice %8 {offsets = [0, 0], sizes = [16, 32], strides = [1, 1]} : vector<23x32xf32> to vector<16x32xf32>
    %c0_7 = arith.constant 0 : index
    %c0_8 = arith.constant 0 : index
    %11 = vector.load %arg5[%c0_7, %c0_8] : memref<808x32xf32, #tpu.memory_space<vmem>>, vector<32x32xf32>
    %cst_9 = arith.constant dense<0.000000e+00> : vector<16x32xf32>
    %12 = tpu.matmul %10, %11, %cst_9 {dimension_numbers = #tpu.dot_dimension_numbers<[1], [0], [0], [1], [0, 0, 1, 1], [], []>} : vector<16x32xf32>, vector<32x32xf32>, vector<16x32xf32> -> vector<16x32xf32>
    %13 = arith.addf %9, %12 : vector<16x32xf32>
    %14 = vector.extract_strided_slice %8 {offsets = [1, 0], sizes = [16, 32], strides = [1, 1]} : vector<23x32xf32> to vector<16x32xf32>
    %c32 = arith.constant 32 : index
    %c0_10 = arith.constant 0 : index
    %15 = vector.load %arg5[%c32, %c0_10] : memref<808x32xf32, #tpu.memory_space<vmem>>, vector<32x32xf32>
    %cst_11 = arith.constant dense<0.000000e+00> : vector<16x32xf32>
    %16 = tpu.matmul %14, %15, %cst_11 {dimension_numbers = #tpu.dot_dimension_numbers<[1], [0], [0], [1], [0, 0, 1, 1], [], []>} : vector<16x32xf32>, vector<32x32xf32>, vector<16x32xf32> -> vector<16x32xf32>
    %17 = arith.addf %13, %16 : vector<16x32xf32>
    %18 = vector.extract_strided_slice %8 {offsets = [2, 0], sizes = [16, 32], strides = [1, 1]} : vector<23x32xf32> to vector<16x32xf32>
    %c64 = arith.constant 64 : index
    %c0_12 = arith.constant 0 : index
    %19 = vector.load %arg5[%c64, %c0_12] : memref<808x32xf32, #tpu.memory_space<vmem>>, vector<32x32xf32>
    %cst_13 = arith.constant dense<0.000000e+00> : vector<16x32xf32>
    %20 = tpu.matmul %18, %19, %cst_13 {dimension_numbers = #tpu.dot_dimension_numbers<[1], [0], [0], [1], [0, 0, 1, 1], [], []>} : vector<16x32xf32>, vector<32x32xf32>, vector<16x32xf32> -> vector<16x32xf32>
    %21 = arith.addf %17, %20 : vector<16x32xf32>
    %22 = vector.extract_strided_slice %8 {offsets = [3, 0], sizes = [16, 32], strides = [1, 1]} : vector<23x32xf32> to vector<16x32xf32>
    %c96 = arith.constant 96 : index
    %c0_14 = arith.constant 0 : index
    %23 = vector.load %arg5[%c96, %c0_14] : memref<808x32xf32, #tpu.memory_space<vmem>>, vector<32x32xf32>
    %cst_15 = arith.constant dense<0.000000e+00> : vector<16x32xf32>
    %24 = tpu.matmul %22, %23, %cst_15 {dimension_numbers = #tpu.dot_dimension_numbers<[1], [0], [0], [1], [0, 0, 1, 1], [], []>} : vector<16x32xf32>, vector<32x32xf32>, vector<16x32xf32> -> vector<16x32xf32>
    %25 = arith.addf %21, %24 : vector<16x32xf32>
    %26 = vector.extract_strided_slice %8 {offsets = [4, 0], sizes = [16, 32], strides = [1, 1]} : vector<23x32xf32> to vector<16x32xf32>
    %c128 = arith.constant 128 : index
    %c0_16 = arith.constant 0 : index
    %27 = vector.load %arg5[%c128, %c0_16] : memref<808x32xf32, #tpu.memory_space<vmem>>, vector<32x32xf32>
    %cst_17 = arith.constant dense<0.000000e+00> : vector<16x32xf32>
    %28 = tpu.matmul %26, %27, %cst_17 {dimension_numbers = #tpu.dot_dimension_numbers<[1], [0], [0], [1], [0, 0, 1, 1], [], []>} : vector<16x32xf32>, vector<32x32xf32>, vector<16x32xf32> -> vector<16x32xf32>
    %29 = arith.addf %25, %28 : vector<16x32xf32>
    %30 = vector.extract_strided_slice %8 {offsets = [5, 0], sizes = [16, 32], strides = [1, 1]} : vector<23x32xf32> to vector<16x32xf32>
    %c160 = arith.constant 160 : index
    %c0_18 = arith.constant 0 : index
    %31 = vector.load %arg5[%c160, %c0_18] : memref<808x32xf32, #tpu.memory_space<vmem>>, vector<32x32xf32>
    %cst_19 = arith.constant dense<0.000000e+00> : vector<16x32xf32>
    %32 = tpu.matmul %30, %31, %cst_19 {dimension_numbers = #tpu.dot_dimension_numbers<[1], [0], [0], [1], [0, 0, 1, 1], [], []>} : vector<16x32xf32>, vector<32x32xf32>, vector<16x32xf32> -> vector<16x32xf32>
    %33 = arith.addf %29, %32 : vector<16x32xf32>
    %34 = vector.extract_strided_slice %8 {offsets = [6, 0], sizes = [16, 32], strides = [1, 1]} : vector<23x32xf32> to vector<16x32xf32>
    %c192 = arith.constant 192 : index
    %c0_20 = arith.constant 0 : index
    %35 = vector.load %arg5[%c192, %c0_20] : memref<808x32xf32, #tpu.memory_space<vmem>>, vector<32x32xf32>
    %cst_21 = arith.constant dense<0.000000e+00> : vector<16x32xf32>
    %36 = tpu.matmul %34, %35, %cst_21 {dimension_numbers = #tpu.dot_dimension_numbers<[1], [0], [0], [1], [0, 0, 1, 1], [], []>} : vector<16x32xf32>, vector<32x32xf32>, vector<16x32xf32> -> vector<16x32xf32>
    %37 = arith.addf %33, %36 : vector<16x32xf32>
    %38 = vector.extract_strided_slice %8 {offsets = [7, 0], sizes = [16, 32], strides = [1, 1]} : vector<23x32xf32> to vector<16x32xf32>
    %c224 = arith.constant 224 : index
    %c0_22 = arith.constant 0 : index
    %39 = vector.load %arg5[%c224, %c0_22] : memref<808x32xf32, #tpu.memory_space<vmem>>, vector<32x32xf32>
    %cst_23 = arith.constant dense<0.000000e+00> : vector<16x32xf32>
    %40 = tpu.matmul %38, %39, %cst_23 {dimension_numbers = #tpu.dot_dimension_numbers<[1], [0], [0], [1], [0, 0, 1, 1], [], []>} : vector<16x32xf32>, vector<32x32xf32>, vector<16x32xf32> -> vector<16x32xf32>
    %41 = arith.addf %37, %40 : vector<16x32xf32>
    %c0_24 = arith.constant 0 : index
    %c0_25 = arith.constant 0 : index
    %42 = vector.load %arg8[%c0_24, %c0_25] : memref<22x96xf32, #tpu.memory_space<vmem>>, vector<1x32xf32>
    %43 = vector.broadcast %42 : vector<1x32xf32> to vector<16x32xf32>
    %44 = arith.addf %41, %43 : vector<16x32xf32>
    %cst_26 = arith.constant 5.000000e-01 : f32
    %45 = vector.broadcast %cst_26 : f32 to vector<16x32xf32>
    %46 = arith.mulf %44, %45 : vector<16x32xf32>
    %cst_27 = arith.constant 1.41421354 : f32
    %47 = vector.broadcast %cst_27 : f32 to vector<16x32xf32>
    %48 = arith.divf %44, %47 : vector<16x32xf32>
    %49 = math.erf %48 : vector<16x32xf32>
    %cst_28 = arith.constant 1.000000e+00 : f32
    %50 = vector.broadcast %cst_28 : f32 to vector<16x32xf32>
    %51 = arith.addf %50, %49 : vector<16x32xf32>
    %52 = arith.mulf %46, %51 : vector<16x32xf32>
    %53 = arith.addf %5, %52 : vector<16x32xf32>
    %c1 = arith.constant 1 : index
    %c0_29 = arith.constant 0 : index
    %54 = vector.load %arg8[%c1, %c0_29] : memref<22x96xf32, #tpu.memory_space<vmem>>, vector<1x32xf32>
    %c2 = arith.constant 2 : index
    %c0_30 = arith.constant 0 : index
    %55 = vector.load %arg8[%c2, %c0_30] : memref<22x96xf32, #tpu.memory_space<vmem>>, vector<1x32xf32>
    %cst_31 = arith.constant dense<0.000000e+00> : vector<16xf32>
    %56 = vector.multi_reduction <add>, %53, %cst_31 [1] : vector<16x32xf32> to vector<16xf32>
    %57 = vector.shape_cast %56 : vector<16xf32> to vector<16x1xf32>
    %cst_32 = arith.constant 3.200000e+01 : f32
    %58 = vector.broadcast %cst_32 : f32 to vector<16x1xf32>
    %59 = arith.divf %57, %58 : vector<16x1xf32>
    %60 = vector.broadcast %59 : vector<16x1xf32> to vector<16x32xf32>
    %61 = arith.subf %53, %60 : vector<16x32xf32>
    %62 = arith.mulf %61, %61 : vector<16x32xf32>
    %cst_33 = arith.constant dense<0.000000e+00> : vector<16xf32>
    %63 = vector.multi_reduction <add>, %62, %cst_33 [1] : vector<16x32xf32> to vector<16xf32>
    %64 = vector.shape_cast %63 : vector<16xf32> to vector<16x1xf32>
    %cst_34 = arith.constant 3.200000e+01 : f32
    %65 = vector.broadcast %cst_34 : f32 to vector<16x1xf32>
    %66 = arith.divf %64, %65 : vector<16x1xf32>
    %cst_35 = arith.constant 9.99999974E-6 : f32
    %67 = vector.broadcast %cst_35 : f32 to vector<16x1xf32>
    %68 = arith.addf %66, %67 : vector<16x1xf32>
    %69 = math.rsqrt %68 : vector<16x1xf32>
    %70 = vector.broadcast %69 : vector<16x1xf32> to vector<16x32xf32>
    %71 = arith.mulf %61, %70 : vector<16x32xf32>
    %72 = vector.broadcast %54 : vector<1x32xf32> to vector<16x32xf32>
    %73 = arith.mulf %71, %72 : vector<16x32xf32>
    %74 = vector.broadcast %55 : vector<1x32xf32> to vector<16x32xf32>
    %75 = arith.addf %73, %74 : vector<16x32xf32>
    %c0_36 = arith.constant 0 : index
    %c0_37 = arith.constant 0 : index
    %c0_38 = arith.constant 0 : index
    %76 = vector.load %arg3[%c0_36, %c0_37, %c0_38] : memref<1x1x16xf32, #tpu.memory_space<vmem>>, vector<1x1x16xf32>
    %77 = vector.shape_cast %76 : vector<1x1x16xf32> to vector<1x16xf32>
    %c0_39 = arith.constant 0 : index
    %c0_40 = arith.constant 0 : index
    %78 = vector.load %arg6[%c0_39, %c0_40] : memref<64x96xf32, #tpu.memory_space<vmem>>, vector<32x96xf32>
    %cst_41 = arith.constant dense<0.000000e+00> : vector<16x96xf32>
    %79 = tpu.matmul %75, %78, %cst_41 {dimension_numbers = #tpu.dot_dimension_numbers<[1], [0], [0], [1], [0, 0, 1, 1], [], []>} : vector<16x32xf32>, vector<32x96xf32>, vector<16x96xf32> -> vector<16x96xf32>
    %c6 = arith.constant 6 : index
    %c0_42 = arith.constant 0 : index
    %80 = vector.load %arg8[%c6, %c0_42] : memref<22x96xf32, #tpu.memory_space<vmem>>, vector<1x96xf32>
    %81 = vector.broadcast %80 : vector<1x96xf32> to vector<16x96xf32>
    %82 = arith.addf %79, %81 : vector<16x96xf32>
    %83 = vector.shape_cast %77 : vector<1x16xf32> to vector<1x16xf32>
    %84 = vector.broadcast %83 : vector<1x16xf32> to vector<16x16xf32>
    %cst_43 = arith.constant 0.000000e+00 : f32
    %85 = vector.broadcast %cst_43 : f32 to vector<16x32xf32>
    %86 = vector.extract_strided_slice %82 {offsets = [0, 0], sizes = [16, 8], strides = [1, 1]} : vector<16x96xf32> to vector<16x8xf32>
    %87 = vector.extract_strided_slice %82 {offsets = [0, 32], sizes = [16, 8], strides = [1, 1]} : vector<16x96xf32> to vector<16x8xf32>
    %88 = vector.extract_strided_slice %82 {offsets = [0, 64], sizes = [16, 8], strides = [1, 1]} : vector<16x96xf32> to vector<16x8xf32>
    %cst_44 = arith.constant dense<0.000000e+00> : vector<16x16xf32>
    %89 = tpu.matmul %86, %87, %cst_44 {dimension_numbers = #tpu.dot_dimension_numbers<[1], [1], [0], [0], [0, 0, 1, 0], [], []>} : vector<16x8xf32>, vector<16x8xf32>, vector<16x16xf32> -> vector<16x16xf32>
    %90 = arith.addf %89, %84 : vector<16x16xf32>
    %cst_45 = arith.constant dense<0xFF800000> : vector<16xf32>
    %91 = vector.multi_reduction <maximumf>, %90, %cst_45 [1] : vector<16x16xf32> to vector<16xf32>
    %92 = vector.shape_cast %91 : vector<16xf32> to vector<16x1xf32>
    %93 = vector.broadcast %92 : vector<16x1xf32> to vector<16x16xf32>
    %94 = arith.subf %90, %93 : vector<16x16xf32>
    %95 = math.exp %94 : vector<16x16xf32>
    %cst_46 = arith.constant dense<0.000000e+00> : vector<16xf32>
    %96 = vector.multi_reduction <add>, %95, %cst_46 [1] : vector<16x16xf32> to vector<16xf32>
    %97 = vector.shape_cast %96 : vector<16xf32> to vector<16x1xf32>
    %98 = tpu.reciprocal %97 {approx = true} : vector<16x1xf32> -> vector<16x1xf32>
    %99 = vector.broadcast %98 : vector<16x1xf32> to vector<16x16xf32>
    %100 = arith.mulf %95, %99 : vector<16x16xf32>
    %cst_47 = arith.constant dense<0.000000e+00> : vector<16x8xf32>
    %101 = tpu.matmul %100, %88, %cst_47 {dimension_numbers = #tpu.dot_dimension_numbers<[1], [0], [0], [1], [0, 0, 1, 1], [], []>} : vector<16x16xf32>, vector<16x8xf32>, vector<16x8xf32> -> vector<16x8xf32>
    %c616 = arith.constant 616 : index
    %c0_48 = arith.constant 0 : index
    %102 = vector.load %arg5[%c616, %c0_48] : memref<808x32xf32, #tpu.memory_space<vmem>>, vector<8x32xf32>
    %cst_49 = arith.constant dense<0.000000e+00> : vector<16x32xf32>
    %103 = tpu.matmul %101, %102, %cst_49 {dimension_numbers = #tpu.dot_dimension_numbers<[1], [0], [0], [1], [0, 0, 1, 1], [], []>} : vector<16x8xf32>, vector<8x32xf32>, vector<16x32xf32> -> vector<16x32xf32>
    %104 = arith.addf %85, %103 : vector<16x32xf32>
    %105 = vector.extract_strided_slice %82 {offsets = [0, 8], sizes = [16, 8], strides = [1, 1]} : vector<16x96xf32> to vector<16x8xf32>
    %106 = vector.extract_strided_slice %82 {offsets = [0, 40], sizes = [16, 8], strides = [1, 1]} : vector<16x96xf32> to vector<16x8xf32>
    %107 = vector.extract_strided_slice %82 {offsets = [0, 72], sizes = [16, 8], strides = [1, 1]} : vector<16x96xf32> to vector<16x8xf32>
    %cst_50 = arith.constant dense<0.000000e+00> : vector<16x16xf32>
    %108 = tpu.matmul %105, %106, %cst_50 {dimension_numbers = #tpu.dot_dimension_numbers<[1], [1], [0], [0], [0, 0, 1, 0], [], []>} : vector<16x8xf32>, vector<16x8xf32>, vector<16x16xf32> -> vector<16x16xf32>
    %109 = arith.addf %108, %84 : vector<16x16xf32>
    %cst_51 = arith.constant dense<0xFF800000> : vector<16xf32>
    %110 = vector.multi_reduction <maximumf>, %109, %cst_51 [1] : vector<16x16xf32> to vector<16xf32>
    %111 = vector.shape_cast %110 : vector<16xf32> to vector<16x1xf32>
    %112 = vector.broadcast %111 : vector<16x1xf32> to vector<16x16xf32>
    %113 = arith.subf %109, %112 : vector<16x16xf32>
    %114 = math.exp %113 : vector<16x16xf32>
    %cst_52 = arith.constant dense<0.000000e+00> : vector<16xf32>
    %115 = vector.multi_reduction <add>, %114, %cst_52 [1] : vector<16x16xf32> to vector<16xf32>
    %116 = vector.shape_cast %115 : vector<16xf32> to vector<16x1xf32>
    %117 = tpu.reciprocal %116 {approx = true} : vector<16x1xf32> -> vector<16x1xf32>
    %118 = vector.broadcast %117 : vector<16x1xf32> to vector<16x16xf32>
    %119 = arith.mulf %114, %118 : vector<16x16xf32>
    %cst_53 = arith.constant dense<0.000000e+00> : vector<16x8xf32>
    %120 = tpu.matmul %119, %107, %cst_53 {dimension_numbers = #tpu.dot_dimension_numbers<[1], [0], [0], [1], [0, 0, 1, 1], [], []>} : vector<16x16xf32>, vector<16x8xf32>, vector<16x8xf32> -> vector<16x8xf32>
    %c624 = arith.constant 624 : index
    %c0_54 = arith.constant 0 : index
    %121 = vector.load %arg5[%c624, %c0_54] : memref<808x32xf32, #tpu.memory_space<vmem>>, vector<8x32xf32>
    %cst_55 = arith.constant dense<0.000000e+00> : vector<16x32xf32>
    %122 = tpu.matmul %120, %121, %cst_55 {dimension_numbers = #tpu.dot_dimension_numbers<[1], [0], [0], [1], [0, 0, 1, 1], [], []>} : vector<16x8xf32>, vector<8x32xf32>, vector<16x32xf32> -> vector<16x32xf32>
    %123 = arith.addf %104, %122 : vector<16x32xf32>
    %124 = vector.extract_strided_slice %82 {offsets = [0, 16], sizes = [16, 8], strides = [1, 1]} : vector<16x96xf32> to vector<16x8xf32>
    %125 = vector.extract_strided_slice %82 {offsets = [0, 48], sizes = [16, 8], strides = [1, 1]} : vector<16x96xf32> to vector<16x8xf32>
    %126 = vector.extract_strided_slice %82 {offsets = [0, 80], sizes = [16, 8], strides = [1, 1]} : vector<16x96xf32> to vector<16x8xf32>
    %cst_56 = arith.constant dense<0.000000e+00> : vector<16x16xf32>
    %127 = tpu.matmul %124, %125, %cst_56 {dimension_numbers = #tpu.dot_dimension_numbers<[1], [1], [0], [0], [0, 0, 1, 0], [], []>} : vector<16x8xf32>, vector<16x8xf32>, vector<16x16xf32> -> vector<16x16xf32>
    %128 = arith.addf %127, %84 : vector<16x16xf32>
    %cst_57 = arith.constant dense<0xFF800000> : vector<16xf32>
    %129 = vector.multi_reduction <maximumf>, %128, %cst_57 [1] : vector<16x16xf32> to vector<16xf32>
    %130 = vector.shape_cast %129 : vector<16xf32> to vector<16x1xf32>
    %131 = vector.broadcast %130 : vector<16x1xf32> to vector<16x16xf32>
    %132 = arith.subf %128, %131 : vector<16x16xf32>
    %133 = math.exp %132 : vector<16x16xf32>
    %cst_58 = arith.constant dense<0.000000e+00> : vector<16xf32>
    %134 = vector.multi_reduction <add>, %133, %cst_58 [1] : vector<16x16xf32> to vector<16xf32>
    %135 = vector.shape_cast %134 : vector<16xf32> to vector<16x1xf32>
    %136 = tpu.reciprocal %135 {approx = true} : vector<16x1xf32> -> vector<16x1xf32>
    %137 = vector.broadcast %136 : vector<16x1xf32> to vector<16x16xf32>
    %138 = arith.mulf %133, %137 : vector<16x16xf32>
    %cst_59 = arith.constant dense<0.000000e+00> : vector<16x8xf32>
    %139 = tpu.matmul %138, %126, %cst_59 {dimension_numbers = #tpu.dot_dimension_numbers<[1], [0], [0], [1], [0, 0, 1, 1], [], []>} : vector<16x16xf32>, vector<16x8xf32>, vector<16x8xf32> -> vector<16x8xf32>
    %c632 = arith.constant 632 : index
    %c0_60 = arith.constant 0 : index
    %140 = vector.load %arg5[%c632, %c0_60] : memref<808x32xf32, #tpu.memory_space<vmem>>, vector<8x32xf32>
    %cst_61 = arith.constant dense<0.000000e+00> : vector<16x32xf32>
    %141 = tpu.matmul %139, %140, %cst_61 {dimension_numbers = #tpu.dot_dimension_numbers<[1], [0], [0], [1], [0, 0, 1, 1], [], []>} : vector<16x8xf32>, vector<8x32xf32>, vector<16x32xf32> -> vector<16x32xf32>
    %142 = arith.addf %123, %141 : vector<16x32xf32>
    %143 = vector.extract_strided_slice %82 {offsets = [0, 24], sizes = [16, 8], strides = [1, 1]} : vector<16x96xf32> to vector<16x8xf32>
    %144 = vector.extract_strided_slice %82 {offsets = [0, 56], sizes = [16, 8], strides = [1, 1]} : vector<16x96xf32> to vector<16x8xf32>
    %145 = vector.extract_strided_slice %82 {offsets = [0, 88], sizes = [16, 8], strides = [1, 1]} : vector<16x96xf32> to vector<16x8xf32>
    %cst_62 = arith.constant dense<0.000000e+00> : vector<16x16xf32>
    %146 = tpu.matmul %143, %144, %cst_62 {dimension_numbers = #tpu.dot_dimension_numbers<[1], [1], [0], [0], [0, 0, 1, 0], [], []>} : vector<16x8xf32>, vector<16x8xf32>, vector<16x16xf32> -> vector<16x16xf32>
    %147 = arith.addf %146, %84 : vector<16x16xf32>
    %cst_63 = arith.constant dense<0xFF800000> : vector<16xf32>
    %148 = vector.multi_reduction <maximumf>, %147, %cst_63 [1] : vector<16x16xf32> to vector<16xf32>
    %149 = vector.shape_cast %148 : vector<16xf32> to vector<16x1xf32>
    %150 = vector.broadcast %149 : vector<16x1xf32> to vector<16x16xf32>
    %151 = arith.subf %147, %150 : vector<16x16xf32>
    %152 = math.exp %151 : vector<16x16xf32>
    %cst_64 = arith.constant dense<0.000000e+00> : vector<16xf32>
    %153 = vector.multi_reduction <add>, %152, %cst_64 [1] : vector<16x16xf32> to vector<16xf32>
    %154 = vector.shape_cast %153 : vector<16xf32> to vector<16x1xf32>
    %155 = tpu.reciprocal %154 {approx = true} : vector<16x1xf32> -> vector<16x1xf32>
    %156 = vector.broadcast %155 : vector<16x1xf32> to vector<16x16xf32>
    %157 = arith.mulf %152, %156 : vector<16x16xf32>
    %cst_65 = arith.constant dense<0.000000e+00> : vector<16x8xf32>
    %158 = tpu.matmul %157, %145, %cst_65 {dimension_numbers = #tpu.dot_dimension_numbers<[1], [0], [0], [1], [0, 0, 1, 1], [], []>} : vector<16x16xf32>, vector<16x8xf32>, vector<16x8xf32> -> vector<16x8xf32>
    %c640 = arith.constant 640 : index
    %c0_66 = arith.constant 0 : index
    %159 = vector.load %arg5[%c640, %c0_66] : memref<808x32xf32, #tpu.memory_space<vmem>>, vector<8x32xf32>
    %cst_67 = arith.constant dense<0.000000e+00> : vector<16x32xf32>
    %160 = tpu.matmul %158, %159, %cst_67 {dimension_numbers = #tpu.dot_dimension_numbers<[1], [0], [0], [1], [0, 0, 1, 1], [], []>} : vector<16x8xf32>, vector<8x32xf32>, vector<16x32xf32> -> vector<16x32xf32>
    %161 = arith.addf %142, %160 : vector<16x32xf32>
    %c7 = arith.constant 7 : index
    %c0_68 = arith.constant 0 : index
    %162 = vector.load %arg8[%c7, %c0_68] : memref<22x96xf32, #tpu.memory_space<vmem>>, vector<1x32xf32>
    %163 = vector.broadcast %162 : vector<1x32xf32> to vector<16x32xf32>
    %164 = arith.addf %161, %163 : vector<16x32xf32>
    %165 = arith.addf %164, %75 : vector<16x32xf32>
    %c8 = arith.constant 8 : index
    %c0_69 = arith.constant 0 : index
    %166 = vector.load %arg8[%c8, %c0_69] : memref<22x96xf32, #tpu.memory_space<vmem>>, vector<1x32xf32>
    %c9 = arith.constant 9 : index
    %c0_70 = arith.constant 0 : index
    %167 = vector.load %arg8[%c9, %c0_70] : memref<22x96xf32, #tpu.memory_space<vmem>>, vector<1x32xf32>
    %cst_71 = arith.constant dense<0.000000e+00> : vector<16xf32>
    %168 = vector.multi_reduction <add>, %165, %cst_71 [1] : vector<16x32xf32> to vector<16xf32>
    %169 = vector.shape_cast %168 : vector<16xf32> to vector<16x1xf32>
    %cst_72 = arith.constant 3.200000e+01 : f32
    %170 = vector.broadcast %cst_72 : f32 to vector<16x1xf32>
    %171 = arith.divf %169, %170 : vector<16x1xf32>
    %172 = vector.broadcast %171 : vector<16x1xf32> to vector<16x32xf32>
    %173 = arith.subf %165, %172 : vector<16x32xf32>
    %174 = arith.mulf %173, %173 : vector<16x32xf32>
    %cst_73 = arith.constant dense<0.000000e+00> : vector<16xf32>
    %175 = vector.multi_reduction <add>, %174, %cst_73 [1] : vector<16x32xf32> to vector<16xf32>
    %176 = vector.shape_cast %175 : vector<16xf32> to vector<16x1xf32>
    %cst_74 = arith.constant 3.200000e+01 : f32
    %177 = vector.broadcast %cst_74 : f32 to vector<16x1xf32>
    %178 = arith.divf %176, %177 : vector<16x1xf32>
    %cst_75 = arith.constant 9.99999974E-6 : f32
    %179 = vector.broadcast %cst_75 : f32 to vector<16x1xf32>
    %180 = arith.addf %178, %179 : vector<16x1xf32>
    %181 = math.rsqrt %180 : vector<16x1xf32>
    %182 = vector.broadcast %181 : vector<16x1xf32> to vector<16x32xf32>
    %183 = arith.mulf %173, %182 : vector<16x32xf32>
    %184 = vector.broadcast %166 : vector<1x32xf32> to vector<16x32xf32>
    %185 = arith.mulf %183, %184 : vector<16x32xf32>
    %186 = vector.broadcast %167 : vector<1x32xf32> to vector<16x32xf32>
    %187 = arith.addf %185, %186 : vector<16x32xf32>
    %c0_76 = arith.constant 0 : index
    %c0_77 = arith.constant 0 : index
    %188 = vector.load %arg7[%c0_76, %c0_77] : memref<64x64xf32, #tpu.memory_space<vmem>>, vector<32x64xf32>
    %cst_78 = arith.constant dense<0.000000e+00> : vector<16x64xf32>
    %189 = tpu.matmul %187, %188, %cst_78 {dimension_numbers = #tpu.dot_dimension_numbers<[1], [0], [0], [1], [0, 0, 1, 1], [], []>} : vector<16x32xf32>, vector<32x64xf32>, vector<16x64xf32> -> vector<16x64xf32>
    %c10 = arith.constant 10 : index
    %c0_79 = arith.constant 0 : index
    %190 = vector.load %arg8[%c10, %c0_79] : memref<22x96xf32, #tpu.memory_space<vmem>>, vector<1x64xf32>
    %191 = vector.broadcast %190 : vector<1x64xf32> to vector<16x64xf32>
    %192 = arith.addf %189, %191 : vector<16x64xf32>
    %cst_80 = arith.constant 5.000000e-01 : f32
    %193 = vector.broadcast %cst_80 : f32 to vector<16x64xf32>
    %194 = arith.mulf %192, %193 : vector<16x64xf32>
    %cst_81 = arith.constant 1.41421354 : f32
    %195 = vector.broadcast %cst_81 : f32 to vector<16x64xf32>
    %196 = arith.divf %192, %195 : vector<16x64xf32>
    %197 = math.erf %196 : vector<16x64xf32>
    %cst_82 = arith.constant 1.000000e+00 : f32
    %198 = vector.broadcast %cst_82 : f32 to vector<16x64xf32>
    %199 = arith.addf %198, %197 : vector<16x64xf32>
    %200 = arith.mulf %194, %199 : vector<16x64xf32>
    %c648 = arith.constant 648 : index
    %c0_83 = arith.constant 0 : index
    %201 = vector.load %arg5[%c648, %c0_83] : memref<808x32xf32, #tpu.memory_space<vmem>>, vector<64x32xf32>
    %cst_84 = arith.constant dense<0.000000e+00> : vector<16x32xf32>
    %202 = tpu.matmul %200, %201, %cst_84 {dimension_numbers = #tpu.dot_dimension_numbers<[1], [0], [0], [1], [0, 0, 1, 1], [], []>} : vector<16x64xf32>, vector<64x32xf32>, vector<16x32xf32> -> vector<16x32xf32>
    %c11 = arith.constant 11 : index
    %c0_85 = arith.constant 0 : index
    %203 = vector.load %arg8[%c11, %c0_85] : memref<22x96xf32, #tpu.memory_space<vmem>>, vector<1x32xf32>
    %204 = vector.broadcast %203 : vector<1x32xf32> to vector<16x32xf32>
    %205 = arith.addf %202, %204 : vector<16x32xf32>
    %206 = arith.addf %205, %187 : vector<16x32xf32>
    %c12 = arith.constant 12 : index
    %c0_86 = arith.constant 0 : index
    %207 = vector.load %arg8[%c12, %c0_86] : memref<22x96xf32, #tpu.memory_space<vmem>>, vector<1x32xf32>
    %c13 = arith.constant 13 : index
    %c0_87 = arith.constant 0 : index
    %208 = vector.load %arg8[%c13, %c0_87] : memref<22x96xf32, #tpu.memory_space<vmem>>, vector<1x32xf32>
    %cst_88 = arith.constant dense<0.000000e+00> : vector<16xf32>
    %209 = vector.multi_reduction <add>, %206, %cst_88 [1] : vector<16x32xf32> to vector<16xf32>
    %210 = vector.shape_cast %209 : vector<16xf32> to vector<16x1xf32>
    %cst_89 = arith.constant 3.200000e+01 : f32
    %211 = vector.broadcast %cst_89 : f32 to vector<16x1xf32>
    %212 = arith.divf %210, %211 : vector<16x1xf32>
    %213 = vector.broadcast %212 : vector<16x1xf32> to vector<16x32xf32>
    %214 = arith.subf %206, %213 : vector<16x32xf32>
    %215 = arith.mulf %214, %214 : vector<16x32xf32>
    %cst_90 = arith.constant dense<0.000000e+00> : vector<16xf32>
    %216 = vector.multi_reduction <add>, %215, %cst_90 [1] : vector<16x32xf32> to vector<16xf32>
    %217 = vector.shape_cast %216 : vector<16xf32> to vector<16x1xf32>
    %cst_91 = arith.constant 3.200000e+01 : f32
    %218 = vector.broadcast %cst_91 : f32 to vector<16x1xf32>
    %219 = arith.divf %217, %218 : vector<16x1xf32>
    %cst_92 = arith.constant 9.99999974E-6 : f32
    %220 = vector.broadcast %cst_92 : f32 to vector<16x1xf32>
    %221 = arith.addf %219, %220 : vector<16x1xf32>
    %222 = math.rsqrt %221 : vector<16x1xf32>
    %223 = vector.broadcast %222 : vector<16x1xf32> to vector<16x32xf32>
    %224 = arith.mulf %214, %223 : vector<16x32xf32>
    %225 = vector.broadcast %207 : vector<1x32xf32> to vector<16x32xf32>
    %226 = arith.mulf %224, %225 : vector<16x32xf32>
    %227 = vector.broadcast %208 : vector<1x32xf32> to vector<16x32xf32>
    %228 = arith.addf %226, %227 : vector<16x32xf32>
    %c0_93 = arith.constant 0 : index
    %c0_94 = arith.constant 0 : index
    %c0_95 = arith.constant 0 : index
    %229 = vector.load %arg9[%c0_93, %c0_94, %c0_95] : memref<1x16x32xf32, #tpu.memory_space<vmem>>, vector<1x16x32xf32>
    %230 = vector.shape_cast %229 : vector<1x16x32xf32> to vector<16x32xf32>
    %231 = vector.shape_cast %228 : vector<16x32xf32> to vector<1x16x32xf32>
    tpu.vector_store %arg9[%c0_93, %c0_94, %c0_95], %231 {strides = array<i32>} : memref<1x16x32xf32, #tpu.memory_space<vmem>>, vector<1x16x32xf32>,
    %cst_96 = arith.constant 0.000000e+00 : f32
    %232 = vector.broadcast %cst_96 : f32 to vector<1x32xf32>
    %cst_97 = arith.constant 0.000000e+00 : f32
    %233 = vector.broadcast %cst_97 : f32 to vector<1x32xf32>
    %234 = tpu.concatenate %232, %228, %233 in 0 : vector<1x32xf32>, vector<16x32xf32>, vector<1x32xf32> -> vector<18x32xf32>
    %cst_98 = arith.constant 0.000000e+00 : f32
    %235 = vector.broadcast %cst_98 : f32 to vector<16x32xf32>
    %236 = vector.extract_strided_slice %234 {offsets = [0, 0], sizes = [16, 32], strides = [1, 1]} : vector<18x32xf32> to vector<16x32xf32>
    %c512 = arith.constant 512 : index
    %c0_99 = arith.constant 0 : index
    %237 = vector.load %arg5[%c512, %c0_99] : memref<808x32xf32, #tpu.memory_space<vmem>>, vector<32x32xf32>
    %cst_100 = arith.constant dense<0.000000e+00> : vector<16x32xf32>
    %238 = tpu.matmul %236, %237, %cst_100 {dimension_numbers = #tpu.dot_dimension_numbers<[1], [0], [0], [1], [0, 0, 1, 1], [], []>} : vector<16x32xf32>, vector<32x32xf32>, vector<16x32xf32> -> vector<16x32xf32>
    %239 = arith.addf %235, %238 : vector<16x32xf32>
    %240 = vector.extract_strided_slice %234 {offsets = [1, 0], sizes = [16, 32], strides = [1, 1]} : vector<18x32xf32> to vector<16x32xf32>
    %c544 = arith.constant 544 : index
    %c0_101 = arith.constant 0 : index
    %241 = vector.load %arg5[%c544, %c0_101] : memref<808x32xf32, #tpu.memory_space<vmem>>, vector<32x32xf32>
    %cst_102 = arith.constant dense<0.000000e+00> : vector<16x32xf32>
    %242 = tpu.matmul %240, %241, %cst_102 {dimension_numbers = #tpu.dot_dimension_numbers<[1], [0], [0], [1], [0, 0, 1, 1], [], []>} : vector<16x32xf32>, vector<32x32xf32>, vector<16x32xf32> -> vector<16x32xf32>
    %243 = arith.addf %239, %242 : vector<16x32xf32>
    %244 = vector.extract_strided_slice %234 {offsets = [2, 0], sizes = [16, 32], strides = [1, 1]} : vector<18x32xf32> to vector<16x32xf32>
    %c576 = arith.constant 576 : index
    %c0_103 = arith.constant 0 : index
    %245 = vector.load %arg5[%c576, %c0_103] : memref<808x32xf32, #tpu.memory_space<vmem>>, vector<32x32xf32>
    %cst_104 = arith.constant dense<0.000000e+00> : vector<16x32xf32>
    %246 = tpu.matmul %244, %245, %cst_104 {dimension_numbers = #tpu.dot_dimension_numbers<[1], [0], [0], [1], [0, 0, 1, 1], [], []>} : vector<16x32xf32>, vector<32x32xf32>, vector<16x32xf32> -> vector<16x32xf32>
    %247 = arith.addf %243, %246 : vector<16x32xf32>
    %c608 = arith.constant 608 : index
    %c0_105 = arith.constant 0 : index
    %248 = vector.load %arg5[%c608, %c0_105] : memref<808x32xf32, #tpu.memory_space<vmem>>, vector<8x16xf32>
    %cst_106 = arith.constant dense<0.000000e+00> : vector<8x32xf32>
    %249 = tpu.matmul %248, %247, %cst_106 {dimension_numbers = #tpu.dot_dimension_numbers<[1], [0], [0], [1], [0, 0, 1, 1], [], []>} : vector<8x16xf32>, vector<16x32xf32>, vector<8x32xf32> -> vector<8x32xf32>
    %c3 = arith.constant 3 : index
    %c0_107 = arith.constant 0 : index
    %250 = vector.load %arg8[%c3, %c0_107] : memref<22x96xf32, #tpu.memory_space<vmem>>, vector<1x32xf32>
    %c4 = arith.constant 4 : index
    %c0_108 = arith.constant 0 : index
    %251 = vector.load %arg8[%c4, %c0_108] : memref<22x96xf32, #tpu.memory_space<vmem>>, vector<1x32xf32>
    %cst_109 = arith.constant dense<0.000000e+00> : vector<8xf32>
    %252 = vector.multi_reduction <add>, %249, %cst_109 [1] : vector<8x32xf32> to vector<8xf32>
    %253 = vector.shape_cast %252 : vector<8xf32> to vector<8x1xf32>
    %cst_110 = arith.constant 3.200000e+01 : f32
    %254 = vector.broadcast %cst_110 : f32 to vector<8x1xf32>
    %255 = arith.divf %253, %254 : vector<8x1xf32>
    %256 = vector.broadcast %255 : vector<8x1xf32> to vector<8x32xf32>
    %257 = arith.subf %249, %256 : vector<8x32xf32>
    %258 = arith.mulf %257, %257 : vector<8x32xf32>
    %cst_111 = arith.constant dense<0.000000e+00> : vector<8xf32>
    %259 = vector.multi_reduction <add>, %258, %cst_111 [1] : vector<8x32xf32> to vector<8xf32>
    %260 = vector.shape_cast %259 : vector<8xf32> to vector<8x1xf32>
    %cst_112 = arith.constant 3.200000e+01 : f32
    %261 = vector.broadcast %cst_112 : f32 to vector<8x1xf32>
    %262 = arith.divf %260, %261 : vector<8x1xf32>
    %cst_113 = arith.constant 9.99999974E-6 : f32
    %263 = vector.broadcast %cst_113 : f32 to vector<8x1xf32>
    %264 = arith.addf %262, %263 : vector<8x1xf32>
    %265 = math.rsqrt %264 : vector<8x1xf32>
    %266 = vector.broadcast %265 : vector<8x1xf32> to vector<8x32xf32>
    %267 = arith.mulf %257, %266 : vector<8x32xf32>
    %268 = vector.broadcast %250 : vector<1x32xf32> to vector<8x32xf32>
    %269 = arith.mulf %267, %268 : vector<8x32xf32>
    %270 = vector.broadcast %251 : vector<1x32xf32> to vector<8x32xf32>
    %271 = arith.addf %269, %270 : vector<8x32xf32>
    %cst_114 = arith.constant 5.000000e-01 : f32
    %272 = vector.broadcast %cst_114 : f32 to vector<8x32xf32>
    %273 = arith.mulf %271, %272 : vector<8x32xf32>
    %cst_115 = arith.constant 1.41421354 : f32
    %274 = vector.broadcast %cst_115 : f32 to vector<8x32xf32>
    %275 = arith.divf %271, %274 : vector<8x32xf32>
    %276 = math.erf %275 : vector<8x32xf32>
    %cst_116 = arith.constant 1.000000e+00 : f32
    %277 = vector.broadcast %cst_116 : f32 to vector<8x32xf32>
    %278 = arith.addf %277, %276 : vector<8x32xf32>
    %279 = arith.mulf %273, %278 : vector<8x32xf32>
    %cst_117 = arith.constant 0.000000e+00 : f32
    %280 = vector.broadcast %cst_117 : f32 to vector<4x32xf32>
    %cst_118 = arith.constant 0.000000e+00 : f32
    %281 = vector.broadcast %cst_118 : f32 to vector<3x32xf32>
    %282 = tpu.concatenate %280, %279, %281 in 0 : vector<4x32xf32>, vector<8x32xf32>, vector<3x32xf32> -> vector<15x32xf32>
    %cst_119 = arith.constant 0.000000e+00 : f32
    %283 = vector.broadcast %cst_119 : f32 to vector<8x32xf32>
    %284 = vector.extract_strided_slice %282 {offsets = [0, 0], sizes = [8, 32], strides = [1, 1]} : vector<15x32xf32> to vector<8x32xf32>
    %c256 = arith.constant 256 : index
    %c0_120 = arith.constant 0 : index
    %285 = vector.load %arg5[%c256, %c0_120] : memref<808x32xf32, #tpu.memory_space<vmem>>, vector<32x32xf32>
    %cst_121 = arith.constant dense<0.000000e+00> : vector<8x32xf32>
    %286 = tpu.matmul %284, %285, %cst_121 {dimension_numbers = #tpu.dot_dimension_numbers<[1], [0], [0], [1], [0, 0, 1, 1], [], []>} : vector<8x32xf32>, vector<32x32xf32>, vector<8x32xf32> -> vector<8x32xf32>
    %287 = arith.addf %283, %286 : vector<8x32xf32>
    %288 = vector.extract_strided_slice %282 {offsets = [1, 0], sizes = [8, 32], strides = [1, 1]} : vector<15x32xf32> to vector<8x32xf32>
    %c288 = arith.constant 288 : index
    %c0_122 = arith.constant 0 : index
    %289 = vector.load %arg5[%c288, %c0_122] : memref<808x32xf32, #tpu.memory_space<vmem>>, vector<32x32xf32>
    %cst_123 = arith.constant dense<0.000000e+00> : vector<8x32xf32>
    %290 = tpu.matmul %288, %289, %cst_123 {dimension_numbers = #tpu.dot_dimension_numbers<[1], [0], [0], [1], [0, 0, 1, 1], [], []>} : vector<8x32xf32>, vector<32x32xf32>, vector<8x32xf32> -> vector<8x32xf32>
    %291 = arith.addf %287, %290 : vector<8x32xf32>
    %292 = vector.extract_strided_slice %282 {offsets = [2, 0], sizes = [8, 32], strides = [1, 1]} : vector<15x32xf32> to vector<8x32xf32>
    %c320 = arith.constant 320 : index
    %c0_124 = arith.constant 0 : index
    %293 = vector.load %arg5[%c320, %c0_124] : memref<808x32xf32, #tpu.memory_space<vmem>>, vector<32x32xf32>
    %cst_125 = arith.constant dense<0.000000e+00> : vector<8x32xf32>
    %294 = tpu.matmul %292, %293, %cst_125 {dimension_numbers = #tpu.dot_dimension_numbers<[1], [0], [0], [1], [0, 0, 1, 1], [], []>} : vector<8x32xf32>, vector<32x32xf32>, vector<8x32xf32> -> vector<8x32xf32>
    %295 = arith.addf %291, %294 : vector<8x32xf32>
    %296 = vector.extract_strided_slice %282 {offsets = [3, 0], sizes = [8, 32], strides = [1, 1]} : vector<15x32xf32> to vector<8x32xf32>
    %c352 = arith.constant 352 : index
    %c0_126 = arith.constant 0 : index
    %297 = vector.load %arg5[%c352, %c0_126] : memref<808x32xf32, #tpu.memory_space<vmem>>, vector<32x32xf32>
    %cst_127 = arith.constant dense<0.000000e+00> : vector<8x32xf32>
    %298 = tpu.matmul %296, %297, %cst_127 {dimension_numbers = #tpu.dot_dimension_numbers<[1], [0], [0], [1], [0, 0, 1, 1], [], []>} : vector<8x32xf32>, vector<32x32xf32>, vector<8x32xf32> -> vector<8x32xf32>
    %299 = arith.addf %295, %298 : vector<8x32xf32>
    %300 = vector.extract_strided_slice %282 {offsets = [4, 0], sizes = [8, 32], strides = [1, 1]} : vector<15x32xf32> to vector<8x32xf32>
    %c384 = arith.constant 384 : index
    %c0_128 = arith.constant 0 : index
    %301 = vector.load %arg5[%c384, %c0_128] : memref<808x32xf32, #tpu.memory_space<vmem>>, vector<32x32xf32>
    %cst_129 = arith.constant dense<0.000000e+00> : vector<8x32xf32>
    %302 = tpu.matmul %300, %301, %cst_129 {dimension_numbers = #tpu.dot_dimension_numbers<[1], [0], [0], [1], [0, 0, 1, 1], [], []>} : vector<8x32xf32>, vector<32x32xf32>, vector<8x32xf32> -> vector<8x32xf32>
    %303 = arith.addf %299, %302 : vector<8x32xf32>
    %304 = vector.extract_strided_slice %282 {offsets = [5, 0], sizes = [8, 32], strides = [1, 1]} : vector<15x32xf32> to vector<8x32xf32>
    %c416 = arith.constant 416 : index
    %c0_130 = arith.constant 0 : index
    %305 = vector.load %arg5[%c416, %c0_130] : memref<808x32xf32, #tpu.memory_space<vmem>>, vector<32x32xf32>
    %cst_131 = arith.constant dense<0.000000e+00> : vector<8x32xf32>
    %306 = tpu.matmul %304, %305, %cst_131 {dimension_numbers = #tpu.dot_dimension_numbers<[1], [0], [0], [1], [0, 0, 1, 1], [], []>} : vector<8x32xf32>, vector<32x32xf32>, vector<8x32xf32> -> vector<8x32xf32>
    %307 = arith.addf %303, %306 : vector<8x32xf32>
    %308 = vector.extract_strided_slice %282 {offsets = [6, 0], sizes = [8, 32], strides = [1, 1]} : vector<15x32xf32> to vector<8x32xf32>
    %c448 = arith.constant 448 : index
    %c0_132 = arith.constant 0 : index
    %309 = vector.load %arg5[%c448, %c0_132] : memref<808x32xf32, #tpu.memory_space<vmem>>, vector<32x32xf32>
    %cst_133 = arith.constant dense<0.000000e+00> : vector<8x32xf32>
    %310 = tpu.matmul %308, %309, %cst_133 {dimension_numbers = #tpu.dot_dimension_numbers<[1], [0], [0], [1], [0, 0, 1, 1], [], []>} : vector<8x32xf32>, vector<32x32xf32>, vector<8x32xf32> -> vector<8x32xf32>
    %311 = arith.addf %307, %310 : vector<8x32xf32>
    %312 = vector.extract_strided_slice %282 {offsets = [7, 0], sizes = [8, 32], strides = [1, 1]} : vector<15x32xf32> to vector<8x32xf32>
    %c480 = arith.constant 480 : index
    %c0_134 = arith.constant 0 : index
    %313 = vector.load %arg5[%c480, %c0_134] : memref<808x32xf32, #tpu.memory_space<vmem>>, vector<32x32xf32>
    %cst_135 = arith.constant dense<0.000000e+00> : vector<8x32xf32>
    %314 = tpu.matmul %312, %313, %cst_135 {dimension_numbers = #tpu.dot_dimension_numbers<[1], [0], [0], [1], [0, 0, 1, 1], [], []>} : vector<8x32xf32>, vector<32x32xf32>, vector<8x32xf32> -> vector<8x32xf32>
    %315 = arith.addf %311, %314 : vector<8x32xf32>
    %c5 = arith.constant 5 : index
    %c0_136 = arith.constant 0 : index
    %316 = vector.load %arg8[%c5, %c0_136] : memref<22x96xf32, #tpu.memory_space<vmem>>, vector<1x32xf32>
    %317 = vector.broadcast %316 : vector<1x32xf32> to vector<8x32xf32>
    %318 = arith.addf %315, %317 : vector<8x32xf32>
    %cst_137 = arith.constant 5.000000e-01 : f32
    %319 = vector.broadcast %cst_137 : f32 to vector<8x32xf32>
    %320 = arith.mulf %318, %319 : vector<8x32xf32>
    %cst_138 = arith.constant 1.41421354 : f32
    %321 = vector.broadcast %cst_138 : f32 to vector<8x32xf32>
    %322 = arith.divf %318, %321 : vector<8x32xf32>
    %323 = math.erf %322 : vector<8x32xf32>
    %cst_139 = arith.constant 1.000000e+00 : f32
    %324 = vector.broadcast %cst_139 : f32 to vector<8x32xf32>
    %325 = arith.addf %324, %323 : vector<8x32xf32>
    %326 = arith.mulf %320, %325 : vector<8x32xf32>
    %327 = arith.addf %279, %326 : vector<8x32xf32>
    %c0_140 = arith.constant 0 : index
    %c0_141 = arith.constant 0 : index
    %c0_142 = arith.constant 0 : index
    %328 = vector.load %arg4[%c0_140, %c0_141, %c0_142] : memref<1x1x8xf32, #tpu.memory_space<vmem>>, vector<1x1x8xf32>
    %329 = vector.shape_cast %328 : vector<1x1x8xf32> to vector<1x8xf32>
    %c32_143 = arith.constant 32 : index
    %c0_144 = arith.constant 0 : index
    %330 = vector.load %arg6[%c32_143, %c0_144] : memref<64x96xf32, #tpu.memory_space<vmem>>, vector<32x96xf32>
    %cst_145 = arith.constant dense<0.000000e+00> : vector<8x96xf32>
    %331 = tpu.matmul %327, %330, %cst_145 {dimension_numbers = #tpu.dot_dimension_numbers<[1], [0], [0], [1], [0, 0, 1, 1], [], []>} : vector<8x32xf32>, vector<32x96xf32>, vector<8x96xf32> -> vector<8x96xf32>
    %c14 = arith.constant 14 : index
    %c0_146 = arith.constant 0 : index
    %332 = vector.load %arg8[%c14, %c0_146] : memref<22x96xf32, #tpu.memory_space<vmem>>, vector<1x96xf32>
    %333 = vector.broadcast %332 : vector<1x96xf32> to vector<8x96xf32>
    %334 = arith.addf %331, %333 : vector<8x96xf32>
    %335 = vector.shape_cast %329 : vector<1x8xf32> to vector<1x8xf32>
    %336 = vector.broadcast %335 : vector<1x8xf32> to vector<8x8xf32>
    %cst_147 = arith.constant 0.000000e+00 : f32
    %337 = vector.broadcast %cst_147 : f32 to vector<8x32xf32>
    %338 = vector.extract_strided_slice %334 {offsets = [0, 0], sizes = [8, 8], strides = [1, 1]} : vector<8x96xf32> to vector<8x8xf32>
    %339 = vector.extract_strided_slice %334 {offsets = [0, 32], sizes = [8, 8], strides = [1, 1]} : vector<8x96xf32> to vector<8x8xf32>
    %340 = vector.extract_strided_slice %334 {offsets = [0, 64], sizes = [8, 8], strides = [1, 1]} : vector<8x96xf32> to vector<8x8xf32>
    %cst_148 = arith.constant dense<0.000000e+00> : vector<8x8xf32>
    %341 = tpu.matmul %338, %339, %cst_148 {dimension_numbers = #tpu.dot_dimension_numbers<[1], [1], [0], [0], [0, 0, 1, 0], [], []>} : vector<8x8xf32>, vector<8x8xf32>, vector<8x8xf32> -> vector<8x8xf32>
    %342 = arith.addf %341, %336 : vector<8x8xf32>
    %cst_149 = arith.constant dense<0xFF800000> : vector<8xf32>
    %343 = vector.multi_reduction <maximumf>, %342, %cst_149 [1] : vector<8x8xf32> to vector<8xf32>
    %344 = vector.shape_cast %343 : vector<8xf32> to vector<8x1xf32>
    %345 = vector.broadcast %344 : vector<8x1xf32> to vector<8x8xf32>
    %346 = arith.subf %342, %345 : vector<8x8xf32>
    %347 = math.exp %346 : vector<8x8xf32>
    %cst_150 = arith.constant dense<0.000000e+00> : vector<8xf32>
    %348 = vector.multi_reduction <add>, %347, %cst_150 [1] : vector<8x8xf32> to vector<8xf32>
    %349 = vector.shape_cast %348 : vector<8xf32> to vector<8x1xf32>
    %350 = tpu.reciprocal %349 {approx = true} : vector<8x1xf32> -> vector<8x1xf32>
    %351 = vector.broadcast %350 : vector<8x1xf32> to vector<8x8xf32>
    %352 = arith.mulf %347, %351 : vector<8x8xf32>
    %cst_151 = arith.constant dense<0.000000e+00> : vector<8x8xf32>
    %353 = tpu.matmul %352, %340, %cst_151 {dimension_numbers = #tpu.dot_dimension_numbers<[1], [0], [0], [1], [0, 0, 1, 1], [], []>} : vector<8x8xf32>, vector<8x8xf32>, vector<8x8xf32> -> vector<8x8xf32>
    %c712 = arith.constant 712 : index
    %c0_152 = arith.constant 0 : index
    %354 = vector.load %arg5[%c712, %c0_152] : memref<808x32xf32, #tpu.memory_space<vmem>>, vector<8x32xf32>
    %cst_153 = arith.constant dense<0.000000e+00> : vector<8x32xf32>
    %355 = tpu.matmul %353, %354, %cst_153 {dimension_numbers = #tpu.dot_dimension_numbers<[1], [0], [0], [1], [0, 0, 1, 1], [], []>} : vector<8x8xf32>, vector<8x32xf32>, vector<8x32xf32> -> vector<8x32xf32>
    %356 = arith.addf %337, %355 : vector<8x32xf32>
    %357 = vector.extract_strided_slice %334 {offsets = [0, 8], sizes = [8, 8], strides = [1, 1]} : vector<8x96xf32> to vector<8x8xf32>
    %358 = vector.extract_strided_slice %334 {offsets = [0, 40], sizes = [8, 8], strides = [1, 1]} : vector<8x96xf32> to vector<8x8xf32>
    %359 = vector.extract_strided_slice %334 {offsets = [0, 72], sizes = [8, 8], strides = [1, 1]} : vector<8x96xf32> to vector<8x8xf32>
    %cst_154 = arith.constant dense<0.000000e+00> : vector<8x8xf32>
    %360 = tpu.matmul %357, %358, %cst_154 {dimension_numbers = #tpu.dot_dimension_numbers<[1], [1], [0], [0], [0, 0, 1, 0], [], []>} : vector<8x8xf32>, vector<8x8xf32>, vector<8x8xf32> -> vector<8x8xf32>
    %361 = arith.addf %360, %336 : vector<8x8xf32>
    %cst_155 = arith.constant dense<0xFF800000> : vector<8xf32>
    %362 = vector.multi_reduction <maximumf>, %361, %cst_155 [1] : vector<8x8xf32> to vector<8xf32>
    %363 = vector.shape_cast %362 : vector<8xf32> to vector<8x1xf32>
    %364 = vector.broadcast %363 : vector<8x1xf32> to vector<8x8xf32>
    %365 = arith.subf %361, %364 : vector<8x8xf32>
    %366 = math.exp %365 : vector<8x8xf32>
    %cst_156 = arith.constant dense<0.000000e+00> : vector<8xf32>
    %367 = vector.multi_reduction <add>, %366, %cst_156 [1] : vector<8x8xf32> to vector<8xf32>
    %368 = vector.shape_cast %367 : vector<8xf32> to vector<8x1xf32>
    %369 = tpu.reciprocal %368 {approx = true} : vector<8x1xf32> -> vector<8x1xf32>
    %370 = vector.broadcast %369 : vector<8x1xf32> to vector<8x8xf32>
    %371 = arith.mulf %366, %370 : vector<8x8xf32>
    %cst_157 = arith.constant dense<0.000000e+00> : vector<8x8xf32>
    %372 = tpu.matmul %371, %359, %cst_157 {dimension_numbers = #tpu.dot_dimension_numbers<[1], [0], [0], [1], [0, 0, 1, 1], [], []>} : vector<8x8xf32>, vector<8x8xf32>, vector<8x8xf32> -> vector<8x8xf32>
    %c720 = arith.constant 720 : index
    %c0_158 = arith.constant 0 : index
    %373 = vector.load %arg5[%c720, %c0_158] : memref<808x32xf32, #tpu.memory_space<vmem>>, vector<8x32xf32>
    %cst_159 = arith.constant dense<0.000000e+00> : vector<8x32xf32>
    %374 = tpu.matmul %372, %373, %cst_159 {dimension_numbers = #tpu.dot_dimension_numbers<[1], [0], [0], [1], [0, 0, 1, 1], [], []>} : vector<8x8xf32>, vector<8x32xf32>, vector<8x32xf32> -> vector<8x32xf32>
    %375 = arith.addf %356, %374 : vector<8x32xf32>
    %376 = vector.extract_strided_slice %334 {offsets = [0, 16], sizes = [8, 8], strides = [1, 1]} : vector<8x96xf32> to vector<8x8xf32>
    %377 = vector.extract_strided_slice %334 {offsets = [0, 48], sizes = [8, 8], strides = [1, 1]} : vector<8x96xf32> to vector<8x8xf32>
    %378 = vector.extract_strided_slice %334 {offsets = [0, 80], sizes = [8, 8], strides = [1, 1]} : vector<8x96xf32> to vector<8x8xf32>
    %cst_160 = arith.constant dense<0.000000e+00> : vector<8x8xf32>
    %379 = tpu.matmul %376, %377, %cst_160 {dimension_numbers = #tpu.dot_dimension_numbers<[1], [1], [0], [0], [0, 0, 1, 0], [], []>} : vector<8x8xf32>, vector<8x8xf32>, vector<8x8xf32> -> vector<8x8xf32>
    %380 = arith.addf %379, %336 : vector<8x8xf32>
    %cst_161 = arith.constant dense<0xFF800000> : vector<8xf32>
    %381 = vector.multi_reduction <maximumf>, %380, %cst_161 [1] : vector<8x8xf32> to vector<8xf32>
    %382 = vector.shape_cast %381 : vector<8xf32> to vector<8x1xf32>
    %383 = vector.broadcast %382 : vector<8x1xf32> to vector<8x8xf32>
    %384 = arith.subf %380, %383 : vector<8x8xf32>
    %385 = math.exp %384 : vector<8x8xf32>
    %cst_162 = arith.constant dense<0.000000e+00> : vector<8xf32>
    %386 = vector.multi_reduction <add>, %385, %cst_162 [1] : vector<8x8xf32> to vector<8xf32>
    %387 = vector.shape_cast %386 : vector<8xf32> to vector<8x1xf32>
    %388 = tpu.reciprocal %387 {approx = true} : vector<8x1xf32> -> vector<8x1xf32>
    %389 = vector.broadcast %388 : vector<8x1xf32> to vector<8x8xf32>
    %390 = arith.mulf %385, %389 : vector<8x8xf32>
    %cst_163 = arith.constant dense<0.000000e+00> : vector<8x8xf32>
    %391 = tpu.matmul %390, %378, %cst_163 {dimension_numbers = #tpu.dot_dimension_numbers<[1], [0], [0], [1], [0, 0, 1, 1], [], []>} : vector<8x8xf32>, vector<8x8xf32>, vector<8x8xf32> -> vector<8x8xf32>
    %c728 = arith.constant 728 : index
    %c0_164 = arith.constant 0 : index
    %392 = vector.load %arg5[%c728, %c0_164] : memref<808x32xf32, #tpu.memory_space<vmem>>, vector<8x32xf32>
    %cst_165 = arith.constant dense<0.000000e+00> : vector<8x32xf32>
    %393 = tpu.matmul %391, %392, %cst_165 {dimension_numbers = #tpu.dot_dimension_numbers<[1], [0], [0], [1], [0, 0, 1, 1], [], []>} : vector<8x8xf32>, vector<8x32xf32>, vector<8x32xf32> -> vector<8x32xf32>
    %394 = arith.addf %375, %393 : vector<8x32xf32>
    %395 = vector.extract_strided_slice %334 {offsets = [0, 24], sizes = [8, 8], strides = [1, 1]} : vector<8x96xf32> to vector<8x8xf32>
    %396 = vector.extract_strided_slice %334 {offsets = [0, 56], sizes = [8, 8], strides = [1, 1]} : vector<8x96xf32> to vector<8x8xf32>
    %397 = vector.extract_strided_slice %334 {offsets = [0, 88], sizes = [8, 8], strides = [1, 1]} : vector<8x96xf32> to vector<8x8xf32>
    %cst_166 = arith.constant dense<0.000000e+00> : vector<8x8xf32>
    %398 = tpu.matmul %395, %396, %cst_166 {dimension_numbers = #tpu.dot_dimension_numbers<[1], [1], [0], [0], [0, 0, 1, 0], [], []>} : vector<8x8xf32>, vector<8x8xf32>, vector<8x8xf32> -> vector<8x8xf32>
    %399 = arith.addf %398, %336 : vector<8x8xf32>
    %cst_167 = arith.constant dense<0xFF800000> : vector<8xf32>
    %400 = vector.multi_reduction <maximumf>, %399, %cst_167 [1] : vector<8x8xf32> to vector<8xf32>
    %401 = vector.shape_cast %400 : vector<8xf32> to vector<8x1xf32>
    %402 = vector.broadcast %401 : vector<8x1xf32> to vector<8x8xf32>
    %403 = arith.subf %399, %402 : vector<8x8xf32>
    %404 = math.exp %403 : vector<8x8xf32>
    %cst_168 = arith.constant dense<0.000000e+00> : vector<8xf32>
    %405 = vector.multi_reduction <add>, %404, %cst_168 [1] : vector<8x8xf32> to vector<8xf32>
    %406 = vector.shape_cast %405 : vector<8xf32> to vector<8x1xf32>
    %407 = tpu.reciprocal %406 {approx = true} : vector<8x1xf32> -> vector<8x1xf32>
    %408 = vector.broadcast %407 : vector<8x1xf32> to vector<8x8xf32>
    %409 = arith.mulf %404, %408 : vector<8x8xf32>
    %cst_169 = arith.constant dense<0.000000e+00> : vector<8x8xf32>
    %410 = tpu.matmul %409, %397, %cst_169 {dimension_numbers = #tpu.dot_dimension_numbers<[1], [0], [0], [1], [0, 0, 1, 1], [], []>} : vector<8x8xf32>, vector<8x8xf32>, vector<8x8xf32> -> vector<8x8xf32>
    %c736 = arith.constant 736 : index
    %c0_170 = arith.constant 0 : index
    %411 = vector.load %arg5[%c736, %c0_170] : memref<808x32xf32, #tpu.memory_space<vmem>>, vector<8x32xf32>
    %cst_171 = arith.constant dense<0.000000e+00> : vector<8x32xf32>
    %412 = tpu.matmul %410, %411, %cst_171 {dimension_numbers = #tpu.dot_dimension_numbers<[1], [0], [0], [1], [0, 0, 1, 1], [], []>} : vector<8x8xf32>, vector<8x32xf32>, vector<8x32xf32> -> vector<8x32xf32>
    %413 = arith.addf %394, %412 : vector<8x32xf32>
    %c15 = arith.constant 15 : index
    %c0_172 = arith.constant 0 : index
    %414 = vector.load %arg8[%c15, %c0_172] : memref<22x96xf32, #tpu.memory_space<vmem>>, vector<1x32xf32>
    %415 = vector.broadcast %414 : vector<1x32xf32> to vector<8x32xf32>
    %416 = arith.addf %413, %415 : vector<8x32xf32>
    %417 = arith.addf %416, %327 : vector<8x32xf32>
    %c16 = arith.constant 16 : index
    %c0_173 = arith.constant 0 : index
    %418 = vector.load %arg8[%c16, %c0_173] : memref<22x96xf32, #tpu.memory_space<vmem>>, vector<1x32xf32>
    %c17 = arith.constant 17 : index
    %c0_174 = arith.constant 0 : index
    %419 = vector.load %arg8[%c17, %c0_174] : memref<22x96xf32, #tpu.memory_space<vmem>>, vector<1x32xf32>
    %cst_175 = arith.constant dense<0.000000e+00> : vector<8xf32>
    %420 = vector.multi_reduction <add>, %417, %cst_175 [1] : vector<8x32xf32> to vector<8xf32>
    %421 = vector.shape_cast %420 : vector<8xf32> to vector<8x1xf32>
    %cst_176 = arith.constant 3.200000e+01 : f32
    %422 = vector.broadcast %cst_176 : f32 to vector<8x1xf32>
    %423 = arith.divf %421, %422 : vector<8x1xf32>
    %424 = vector.broadcast %423 : vector<8x1xf32> to vector<8x32xf32>
    %425 = arith.subf %417, %424 : vector<8x32xf32>
    %426 = arith.mulf %425, %425 : vector<8x32xf32>
    %cst_177 = arith.constant dense<0.000000e+00> : vector<8xf32>
    %427 = vector.multi_reduction <add>, %426, %cst_177 [1] : vector<8x32xf32> to vector<8xf32>
    %428 = vector.shape_cast %427 : vector<8xf32> to vector<8x1xf32>
    %cst_178 = arith.constant 3.200000e+01 : f32
    %429 = vector.broadcast %cst_178 : f32 to vector<8x1xf32>
    %430 = arith.divf %428, %429 : vector<8x1xf32>
    %cst_179 = arith.constant 9.99999974E-6 : f32
    %431 = vector.broadcast %cst_179 : f32 to vector<8x1xf32>
    %432 = arith.addf %430, %431 : vector<8x1xf32>
    %433 = math.rsqrt %432 : vector<8x1xf32>
    %434 = vector.broadcast %433 : vector<8x1xf32> to vector<8x32xf32>
    %435 = arith.mulf %425, %434 : vector<8x32xf32>
    %436 = vector.broadcast %418 : vector<1x32xf32> to vector<8x32xf32>
    %437 = arith.mulf %435, %436 : vector<8x32xf32>
    %438 = vector.broadcast %419 : vector<1x32xf32> to vector<8x32xf32>
    %439 = arith.addf %437, %438 : vector<8x32xf32>
    %c32_180 = arith.constant 32 : index
    %c0_181 = arith.constant 0 : index
    %440 = vector.load %arg7[%c32_180, %c0_181] : memref<64x64xf32, #tpu.memory_space<vmem>>, vector<32x64xf32>
    %cst_182 = arith.constant dense<0.000000e+00> : vector<8x64xf32>
    %441 = tpu.matmul %439, %440, %cst_182 {dimension_numbers = #tpu.dot_dimension_numbers<[1], [0], [0], [1], [0, 0, 1, 1], [], []>} : vector<8x32xf32>, vector<32x64xf32>, vector<8x64xf32> -> vector<8x64xf32>
    %c18 = arith.constant 18 : index
    %c0_183 = arith.constant 0 : index
    %442 = vector.load %arg8[%c18, %c0_183] : memref<22x96xf32, #tpu.memory_space<vmem>>, vector<1x64xf32>
    %443 = vector.broadcast %442 : vector<1x64xf32> to vector<8x64xf32>
    %444 = arith.addf %441, %443 : vector<8x64xf32>
    %cst_184 = arith.constant 5.000000e-01 : f32
    %445 = vector.broadcast %cst_184 : f32 to vector<8x64xf32>
    %446 = arith.mulf %444, %445 : vector<8x64xf32>
    %cst_185 = arith.constant 1.41421354 : f32
    %447 = vector.broadcast %cst_185 : f32 to vector<8x64xf32>
    %448 = arith.divf %444, %447 : vector<8x64xf32>
    %449 = math.erf %448 : vector<8x64xf32>
    %cst_186 = arith.constant 1.000000e+00 : f32
    %450 = vector.broadcast %cst_186 : f32 to vector<8x64xf32>
    %451 = arith.addf %450, %449 : vector<8x64xf32>
    %452 = arith.mulf %446, %451 : vector<8x64xf32>
    %c744 = arith.constant 744 : index
    %c0_187 = arith.constant 0 : index
    %453 = vector.load %arg5[%c744, %c0_187] : memref<808x32xf32, #tpu.memory_space<vmem>>, vector<64x32xf32>
    %cst_188 = arith.constant dense<0.000000e+00> : vector<8x32xf32>
    %454 = tpu.matmul %452, %453, %cst_188 {dimension_numbers = #tpu.dot_dimension_numbers<[1], [0], [0], [1], [0, 0, 1, 1], [], []>} : vector<8x64xf32>, vector<64x32xf32>, vector<8x32xf32> -> vector<8x32xf32>
    %c19 = arith.constant 19 : index
    %c0_189 = arith.constant 0 : index
    %455 = vector.load %arg8[%c19, %c0_189] : memref<22x96xf32, #tpu.memory_space<vmem>>, vector<1x32xf32>
    %456 = vector.broadcast %455 : vector<1x32xf32> to vector<8x32xf32>
    %457 = arith.addf %454, %456 : vector<8x32xf32>
    %458 = arith.addf %457, %439 : vector<8x32xf32>
    %c20 = arith.constant 20 : index
    %c0_190 = arith.constant 0 : index
    %459 = vector.load %arg8[%c20, %c0_190] : memref<22x96xf32, #tpu.memory_space<vmem>>, vector<1x32xf32>
    %c21 = arith.constant 21 : index
    %c0_191 = arith.constant 0 : index
    %460 = vector.load %arg8[%c21, %c0_191] : memref<22x96xf32, #tpu.memory_space<vmem>>, vector<1x32xf32>
    %cst_192 = arith.constant dense<0.000000e+00> : vector<8xf32>
    %461 = vector.multi_reduction <add>, %458, %cst_192 [1] : vector<8x32xf32> to vector<8xf32>
    %462 = vector.shape_cast %461 : vector<8xf32> to vector<8x1xf32>
    %cst_193 = arith.constant 3.200000e+01 : f32
    %463 = vector.broadcast %cst_193 : f32 to vector<8x1xf32>
    %464 = arith.divf %462, %463 : vector<8x1xf32>
    %465 = vector.broadcast %464 : vector<8x1xf32> to vector<8x32xf32>
    %466 = arith.subf %458, %465 : vector<8x32xf32>
    %467 = arith.mulf %466, %466 : vector<8x32xf32>
    %cst_194 = arith.constant dense<0.000000e+00> : vector<8xf32>
    %468 = vector.multi_reduction <add>, %467, %cst_194 [1] : vector<8x32xf32> to vector<8xf32>
    %469 = vector.shape_cast %468 : vector<8xf32> to vector<8x1xf32>
    %cst_195 = arith.constant 3.200000e+01 : f32
    %470 = vector.broadcast %cst_195 : f32 to vector<8x1xf32>
    %471 = arith.divf %469, %470 : vector<8x1xf32>
    %cst_196 = arith.constant 9.99999974E-6 : f32
    %472 = vector.broadcast %cst_196 : f32 to vector<8x1xf32>
    %473 = arith.addf %471, %472 : vector<8x1xf32>
    %474 = math.rsqrt %473 : vector<8x1xf32>
    %475 = vector.broadcast %474 : vector<8x1xf32> to vector<8x32xf32>
    %476 = arith.mulf %466, %475 : vector<8x32xf32>
    %477 = vector.broadcast %459 : vector<1x32xf32> to vector<8x32xf32>
    %478 = arith.mulf %476, %477 : vector<8x32xf32>
    %479 = vector.broadcast %460 : vector<1x32xf32> to vector<8x32xf32>
    %480 = arith.addf %478, %479 : vector<8x32xf32>
    %c0_197 = arith.constant 0 : index
    %c0_198 = arith.constant 0 : index
    %c0_199 = arith.constant 0 : index
    %481 = vector.load %arg10[%c0_197, %c0_198, %c0_199] : memref<1x8x32xf32, #tpu.memory_space<vmem>>, vector<1x8x32xf32>
    %482 = vector.shape_cast %481 : vector<1x8x32xf32> to vector<8x32xf32>
    %483 = vector.shape_cast %480 : vector<8x32xf32> to vector<1x8x32xf32>
    tpu.vector_store %arg10[%c0_197, %c0_198, %c0_199], %483 {strides = array<i32>} : memref<1x8x32xf32, #tpu.memory_space<vmem>>, vector<1x8x32xf32>,
    return
  }
  func.func @transform_0(%arg0: i32) -> (i32, i32, i32) {
    %c0_i32 = arith.constant 0 : i32
    %c0_i32_0 = arith.constant 0 : i32
    %c0_i32_1 = arith.constant 0 : i32
    return %arg0, %c0_i32, %c0_i32_0 : i32, i32, i32
  }
  func.func @transform_1(%arg0: i32) -> (i32, i32, i32) {
    %c0_i32 = arith.constant 0 : i32
    %c0_i32_0 = arith.constant 0 : i32
    %c0_i32_1 = arith.constant 0 : i32
    return %arg0, %c0_i32, %c0_i32_0 : i32, i32, i32
  }
  func.func @transform_2(%arg0: i32) -> (i32, i32, i32) {
    %c0_i32 = arith.constant 0 : i32
    %c0_i32_0 = arith.constant 0 : i32
    %c0_i32_1 = arith.constant 0 : i32
    return %arg0, %c0_i32, %c0_i32_0 : i32, i32, i32
  }
  func.func @transform_3(%arg0: i32) -> (i32, i32, i32) {
    %c0_i32 = arith.constant 0 : i32
    %c0_i32_0 = arith.constant 0 : i32
    %c0_i32_1 = arith.constant 0 : i32
    return %arg0, %c0_i32, %c0_i32_0 : i32, i32, i32
  }
  func.func @transform_4(%arg0: i32) -> (i32, i32) {
    %c0_i32 = arith.constant 0 : i32
    %c0_i32_0 = arith.constant 0 : i32
    %c0_i32_1 = arith.constant 0 : i32
    return %c0_i32, %c0_i32_0 : i32, i32
  }
  func.func @transform_5(%arg0: i32) -> (i32, i32) {
    %c0_i32 = arith.constant 0 : i32
    %c0_i32_0 = arith.constant 0 : i32
    %c0_i32_1 = arith.constant 0 : i32
    return %c0_i32, %c0_i32_0 : i32, i32
  }
  func.func @transform_6(%arg0: i32) -> (i32, i32) {
    %c0_i32 = arith.constant 0 : i32
    %c0_i32_0 = arith.constant 0 : i32
    %c0_i32_1 = arith.constant 0 : i32
    return %c0_i32, %c0_i32_0 : i32, i32
  }
  func.func @transform_7(%arg0: i32) -> (i32, i32) {
    %c0_i32 = arith.constant 0 : i32
    %c0_i32_0 = arith.constant 0 : i32
    %c0_i32_1 = arith.constant 0 : i32
    return %c0_i32, %c0_i32_0 : i32, i32
  }
  func.func @transform_8(%arg0: i32) -> (i32, i32, i32) {
    %c0_i32 = arith.constant 0 : i32
    %c0_i32_0 = arith.constant 0 : i32
    %c0_i32_1 = arith.constant 0 : i32
    return %arg0, %c0_i32, %c0_i32_0 : i32, i32, i32
  }
  func.func @transform_9(%arg0: i32) -> (i32, i32, i32) {
    %c0_i32 = arith.constant 0 : i32
    %c0_i32_0 = arith.constant 0 : i32
    %c0_i32_1 = arith.constant 0 : i32
    return %arg0, %c0_i32, %c0_i32_0 : i32, i32, i32
  }
}

</mosaic_0001>

<bundles_post_ra>
// kernel: transformer_fast_encoder.1
= control target key start
LH: loop header
LB: loop body
LE: loop exit
PB: predicated region body
PF: predicated region fallthrough
CT: control target
= control target key end

     0   :  { %s3217_s30 = smov 0   ;;  %s4045_s0 = inlined_call_operand.vmem [shape: f32[2,16,32], index: 0, kind: input, shape index: {}]   ;;  %s4046_s1 = inlined_call_operand.vmem [shape: f32[2,16,1], index: 1, kind: input, shape index: {}]   ;;  %s4047_s2 = inlined_call_operand.vmem [shape: f32[2,1,16], index: 2, kind: input, shape index: {}]   ;;  %s4048_s3 = inlined_call_operand.vmem [shape: f32[2,1,8], index: 3, kind: input, shape index: {}]   ;;  %s4049_s4 = inlined_call_operand.vmem [shape: f32[808,32], index: 4, kind: input, shape index: {}]   ;;  %s4050_s5 = inlined_call_operand.vmem [shape: f32[64,96], index: 5, kind: input, shape index: {}]   ;;  %s4051_s6 = inlined_call_operand.vmem [shape: f32[64,64], index: 6, kind: input, shape index: {}]   ;;  %s4052_s7 = inlined_call_operand.vmem [shape: f32[22,96], index: 7, kind: input, shape index: {}]   ;;  %s4053_s8 = inlined_call_operand.vmem [shape: f32[2,16,32], index: 8, kind: output, shape index: {0}]   ;;  %s4054_s9 = inlined_call_operand.vmem [shape: f32[2,8,32], index: 9, kind: output, shape index: {1}]  }
   0x1 LB: > { %s2882_s10 = sadd.s32 4294967295, %s3151_s30   ;;  %p2886_p0 = scmp.ge.s32.totalorder %s3151_s30, 1  ;;  %s3151_s30 = sphi %s3217_s30, %s20_s30  }
   0x2   : > { %p316_p1 = scmp.lt.s32.totalorder %s3151_s30, 3 }
   0x4   : > { %p317_p2 = pnand %p2886_p0, %p316_p1 }
   0x5   : > { %p367_p3 = scmp.lt.s32.totalorder (!%p317_p2), %s2882_s10, 1  ;;  %s3156_s17 = smov (!%p317_p2), 96  }
   0x6   : > { %320 = sbr.rel (%p317_p2) target bundleno = 6050 (0x17a2), region = 52  ;;  %s3158_s20 = smov (!%p317_p2), 72  }
   0x7   : > { %s3160_s21 = smov (!%p317_p2), 104   ;;  %s3161_s22 = smov (!%p317_p2), 64  }
   0x8   : > { %s3162_s23 = smov (!%p317_p2), 88   ;;  %s3163_s24 = smov (!%p317_p2), 112  }
   0x9   : > { %s4057_s28 = smov (!%p317_p2), 56   ;;  %s4056_s29 = smov (!%p317_p2), 48  }
   0xa   : > { %s4055_s11 = smov (!%p317_p2), 40  }
   0xb   : > { %v421_v0 = vld [vmem:[%s4049_s4 + $0x18] sm:$0xff]  ;;  %v3153_v1 = vmov 0   ;;  %s4062_s10 = smov (!%p367_p3, %s2882_s10), 1  ;;  %v420_v4 = vld [vmem:[%s4049_s4 + $0x10] sm:$0xff]  ;;  %v419_v5 = vld [vmem:[%s4049_s4 + $0x8] sm:$0xff]  ;;  %vm410_vm0 = vcmask 1043456  }
   0xc   : > { %3016 = vset.pattern.permute.xlu0 %v3153_v1  ;;  %478 = vmatpush.msra.mxu1 %v421_v0  ;;  %s3231_s13 = sshll.u32 %s4062_s10, 4  ;;  %s379_s16 = scalar_lea.vmem %s4047_s2, %s4062_s10  ;;  %v418_v6 = vld [vmem:[%s4049_s4] sm:$0xff]  ;;  %v425_v7 = vld [vmem:[%s4049_s4 + $0x38] sm:$0xff]  ;;  %v424_v10 = vld [vmem:[%s4049_s4 + $0x30] sm:$0xff]  ;;  %vm434_vm1 = vcmask 261120   ;;  %vm428_vm2 = vcmask 1046528  }
   0xd   : > { %s376_s19 = scalar_lea.vmem %s4046_s1, %s3231_s13  ;;  %v492_v8 = vld [vmem:[%s4049_s4 + $0x58] sm:$0xff]  ;;  %451 = vmatpush.msra.mxu0 %v425_v7  ;;  %v491_v11 = vld [vmem:[%s4049_s4 + $0x50] sm:$0xff]  ;;  %v423_v13 = vld [vmem:[%s4049_s4 + $0x28] sm:$0xff]  ;;  %s3302_s26 = scalar_lea.vmem %s4045_s0, %s3231_s13  ;;  %vm493_vm3 = vcmask 1045504   ;;  %vm532_vm4 = vcmask 1044480   ;;  %vm609_vm5 = vcmask 1042432  }
   0xe   : > { %v394_v2 = vld [vmem:[%s376_s19] sm:$0xff]  ;;  %v395_v3 = vld [vmem:[%s376_s19 + $0x8] sm:$0xff]  ;;  %479 = vmatpush.msra.mxu1 %v420_v4  ;;  %v531_v9 = vld [vmem:[%s4049_s4 + $0x78] sm:$0xff]  ;;  %515 = vmatpush.msra.mxu2 %v492_v8  ;;  %vm648_vm6 = vcmask 1041408   ;;  %vm687_vm7 = vcmask 1040384   ;;  %s3157_s19 = smov 120  }
   0xf   : > { %398 = vperm.xlu0 %3016, %v394_v2   ;;  %554 = vmatpush.msra.mxu3 %v531_v9  ;;  %v530_v12 = vld [vmem:[%s4049_s4 + $0x70] sm:$0xff]  ;;  %v490_v14 = vld [vmem:[%s4049_s4 + $0x48] sm:$0xff]  ;;  %v608_v16 = vld [vmem:[%s4049_s4 + $0xb8] sm:$0xff]  ;;  %s2893_s12 = sshll.u32 %s4062_s10, 3 }
  0x10   : > { %480 = vmatpush.msra.mxu1 %v419_v5  ;;  %452 = vmatpush.msra.mxu0 %v424_v10  ;;  %v529_v15 = vld [vmem:[%s4049_s4 + $0x68] sm:$0xff]  ;;  %v422_v17 = vld [vmem:[%s4049_s4 + $0x20] sm:$0xff]  ;;  %v607_v20 = vld [vmem:[%s4049_s4 + $0xb0] sm:$0xff] }
  0x11   : > { %516 = vmatpush.msra.mxu2 %v491_v11  ;;  %555 = vmatpush.msra.mxu3 %v530_v12  ;;  %v489_v18 = vld [vmem:[%s4049_s4 + $0x40] sm:$0xff]  ;;  %v606_v21 = vld [vmem:[%s4049_s4 + $0xa8] sm:$0xff]  ;;  %v570_v23 = vld [vmem:[%s4049_s4 + $0x98] sm:$0xff] }
  0x12   : > { %481 = vmatpush.msra.mxu1 %v418_v6  ;;  %453 = vmatpush.msra.mxu0 %v423_v13  ;;  %v528_v19 = vld [vmem:[%s4049_s4 + $0x60] sm:$0xff]  ;;  %v647_v24 = vld [vmem:[%s4049_s4 + $0xd8] sm:$0xff]  ;;  %v569_v26 = vld [vmem:[%s4049_s4 + $0x90] sm:$0xff] }
  0x13   : > { %517 = vmatpush.msra.mxu2 %v490_v14  ;;  %556 = vmatpush.msra.mxu3 %v529_v15  ;;  %v605_v22 = vld [vmem:[%s4049_s4 + $0xa0] sm:$0xff]  ;;  %v686_v25 = vld [vmem:[%s4049_s4 + $0xf8] sm:$0xff]  ;;  %v646_v27 = vld [vmem:[%s4049_s4 + $0xd0] sm:$0xff] }
  0x14   : > { %631 = vmatpush.msrb.mxu1 %v608_v16  ;;  %454 = vmatpush.msra.mxu0 %v422_v17  ;;  %v685_v28 = vld [vmem:[%s4049_s4 + $0xf0] sm:$0xff]  ;;  %v568_v29 = vld [vmem:[%s4049_s4 + $0x88] sm:$0xff]  ;;  %v392_v30 = vld [vmem:[%s3302_s26] sm:$0xff] }
  0x15   : > { %518 = vmatpush.msra.mxu2 %v489_v18  ;;  %557 = vmatpush.msra.mxu3 %v528_v19  ;;  %v645_v31 = vld [vmem:[%s4049_s4 + $0xc8] sm:$0xff]  ;;  %v567_v33 = vld [vmem:[%s4049_s4 + $0x80] sm:$0xff]  ;;  %v3154_v19 = vmov 1.4142135  }
  0x16   : > { %632 = vmatpush.msrb.mxu1 %v607_v20  ;;  %592 = vmatpush.msrb.mxu0 %v570_v23  ;;  %v684_v32 = vld [vmem:[%s4049_s4 + $0xe8] sm:$0xff]  ;;  %v644_v34 = vld [vmem:[%s4049_s4 + $0xc0] sm:$0xff]  ;;  %3061 = vrcp.f32 %v3154_v19 }
  0x17   : > { %403 = vperm.xlu0 %3016, %v395_v3   ;;  %670 = vmatpush.msrb.mxu2 %v647_v24  ;;  %v683_v35 = vld [vmem:[%s4049_s4 + $0xe0] sm:$0xff]  ;;  %v393_v40 = vld [vmem:[%s3302_s26 + $0x8] sm:$0xff]  ;;  %s391_s26 = scalar_lea.vmem %s4054_s9, %s2893_s12 }
  0x18   : > { %633 = vmatpush.msrb.mxu1 %v606_v21  ;;  %709 = vmatpush.msrb.mxu3 %v686_v25 }
  0x19   : > { %593 = vmatpush.msrb.mxu0 %v569_v26  ;;  %671 = vmatpush.msrb.mxu2 %v646_v27 }
  0x1a   : > { %634 = vmatpush.msrb.mxu1 %v605_v22  ;;  %710 = vmatpush.msrb.mxu3 %v685_v28 }
  0x1b   : > { %594 = vmatpush.msrb.mxu0 %v568_v29  ;;  %672 = vmatpush.msrb.mxu2 %v645_v31 }
  0x1c   : > { %711 = vmatpush.msrb.mxu3 %v684_v32  ;;  %v3062_v21 = vpop.eup %3061 }
  0x1d   : > { %595 = vmatpush.msrb.mxu0 %v567_v33  ;;  %673 = vmatpush.msrb.mxu2 %v644_v34  ;;  %v729_v26 = vmul.f32 1.4142135, %v3062_v21  ;;  %vm733_vm8 = vweird.f32 %v3062_v21 }
  0x1e   : > { %712 = vmatpush.msrb.mxu3 %v683_v35 }
  0x1f   : > { %v730_v29 = vsub.f32 1.0, %v729_v26 }
  0x81   : > { %v399_v36 = vpop.permute.xlu0 %398 }
  0x82   : > { %v3341_v37 = vmul.f32 %v399_v36, %v392_v30  ;;  %v731_v36 = vmul.f32 %v3062_v21, %v730_v29 }
  0x84   : > { %v411_v38 = vrot.slane %v3341_v37, 4 }
  0x86   : > { %v416_v39 = vsel %vm410_vm0, 0.0, %v411_v38 }
  0x87   : > { %2896 = vmatmul.msk.f32.vlgmr.msra.gmra.mxu1 %vm434_vm1, %v416_v39  ;;  %v429_v45 = vrot.slane %v416_v39, 1  ;;  %v494_v46 = vrot.slane %v416_v39, 2  ;;  %v533_v49 = vrot.slane %v416_v39, 3  ;;  %v610_v56 = vrot.slane %v416_v39, 5 }
  0x88   : > { %v571_v5 = vrot.slane %v416_v39, 4  ;;  %v649_v6 = vrot.slane %v416_v39, 6  ;;  %v688_v7 = vrot.slane %v416_v39, 7 }
  0x89   : > { %v404_v41 = vpop.permute.xlu0 %403 }
  0x8a   : > { %v3347_v42 = vmul.f32 %v404_v41, %v393_v40  ;;  %v732_v41 = vadd.f32 %v3062_v21, %v731_v36 }
  0x8c   : > { %v412_v43 = vrot.slane %v3347_v42, 4 }
  0x8e   : > { %v413_v44 = vsel %vm410_vm0, %v411_v38, %v412_v43  ;;  %v417_v54 = vsel %vm410_vm0, %v412_v43, 0.0 }
  0x8f   : > { %2897 = vmatmul.msk.f32.gmra.mxu1 %vm434_vm1, %v413_v44  ;;  %v430_v47 = vrot.slane %v413_v44, 1  ;;  %v495_v48 = vrot.slane %v413_v44, 2  ;;  %v534_v50 = vrot.slane %v413_v44, 3  ;;  %v611_v55 = vrot.slane %v413_v44, 5 }
  0x90   : > { %v432_v57 = vrot.slane %v417_v54, 1  ;;  %v497_v58 = vrot.slane %v417_v54, 2  ;;  %v536_v60 = vrot.slane %v417_v54, 3  ;;  %v613_v0 = vrot.slane %v417_v54, 5 }
  0x91   : > { %v431_v51 = vsel %vm428_vm2, %v429_v45, %v430_v47  ;;  %v496_v52 = vsel %vm493_vm3, %v494_v46, %v495_v48  ;;  %v535_v53 = vsel %vm532_vm4, %v533_v49, %v534_v50  ;;  %v612_v59 = vsel %vm609_vm5, %v610_v56, %v611_v55  ;;  %v3038_v46 = vld [vmem:[%s4052_s7] ss:$0 sm:$0xff] }
  0x92   : > { %2894 = vmatmul.msk.f32.vlgmr.msra.gmra.mxu0 %vm434_vm1, %v431_v51  ;;  %2898 = vmatmul.msk.f32.vlgmr.msra.gmra.mxu2 %vm434_vm1, %v496_v52  ;;  %v433_v61 = vsel %vm428_vm2, %v430_v47, %v432_v57  ;;  %v498_v62 = vsel %vm493_vm3, %v495_v48, %v497_v58  ;;  %v537_v63 = vsel %vm532_vm4, %v534_v50, %v536_v60  ;;  %v572_v1 = vrot.slane %v413_v44, 4 }
  0x93   : > { %2900 = vmatmul.msk.f32.vlgmr.msra.gmra.mxu3 %vm434_vm1, %v535_v53  ;;  %v650_v2 = vrot.slane %v413_v44, 6  ;;  %v614_v3 = vsel %vm609_vm5, %v611_v55, %v613_v0  ;;  %v689_v4 = vrot.slane %v413_v44, 7  ;;  %v574_v11 = vrot.slane %v417_v54, 4 }
  0x94   : > { %v573_v8 = vsel %vm410_vm0, %v571_v5, %v572_v1  ;;  %v652_v12 = vrot.slane %v417_v54, 6  ;;  %v691_v13 = vrot.slane %v417_v54, 7  ;;  %v3384_v50 = vsel %vm733_vm8, %v3062_v21, %v732_v41 }
  0x95   : > { %v651_v9 = vsel %vm648_vm6, %v649_v6, %v650_v2  ;;  %v690_v10 = vsel %vm687_vm7, %v688_v7, %v689_v4  ;;  %v575_v14 = vsel %vm410_vm0, %v572_v1, %v574_v11 }
  0x96   : > { %v653_v15 = vsel %vm648_vm6, %v650_v2, %v652_v12  ;;  %v692_v16 = vsel %vm687_vm7, %v689_v4, %v691_v13 }
  0x97   : > { %2904 = vmatmul.msk.f32.vlgmr.msrb.gmra.mxu1 %vm434_vm1, %v612_v59 }
  0x9a   : > { %2895 = vmatmul.msk.f32.gmra.mxu0 %vm434_vm1, %v433_v61  ;;  %2899 = vmatmul.msk.f32.gmra.mxu2 %vm434_vm1, %v498_v62 }
  0x9b   : > { %2901 = vmatmul.msk.f32.gmra.mxu3 %vm434_vm1, %v537_v63 }
  0x9f   : > { %2905 = vmatmul.msk.f32.gmra.mxu1 %vm434_vm1, %v614_v3 }
  0xa2   : > { %2902 = vmatmul.msk.f32.vlgmr.msrb.gmra.mxu0 %vm434_vm1, %v573_v8  ;;  %2906 = vmatmul.msk.f32.vlgmr.msrb.gmra.mxu2 %vm434_vm1, %v651_v9 }
  0xa3   : > { %2908 = vmatmul.msk.f32.vlgmr.msrb.gmra.mxu3 %vm434_vm1, %v690_v10 }
  0xaa   : > { %2903 = vmatmul.msk.f32.gmra.mxu0 %vm434_vm1, %v575_v14  ;;  %2907 = vmatmul.msk.f32.gmra.mxu2 %vm434_vm1, %v653_v15 }
  0xab   : > { %2909 = vmatmul.msk.f32.gmra.mxu3 %vm434_vm1, %v692_v16 }
 0x104   : > { %v483_v17 = vpop.f32.mrf.mxu1 }
 0x10c   : > { %v486_v23 = vpop.f32.mrf.mxu1 }
 0x10f   : > { %v456_v18 = vpop.f32.mrf.mxu0 }
 0x110   : > { %v484_v25 = vadd.f32 %v483_v17, %v456_v18 }
 0x114   : > { %v636_v35 = vpop.f32.mrf.mxu1 }
 0x115   : > { %v520_v20 = vpop.f32.mrf.mxu2 }
 0x116   : > { %v559_v22 = vpop.f32.mrf.mxu3  ;;  %v526_v27 = vadd.f32 %v520_v20, %v484_v25 }
 0x117   : > { %v459_v24 = vpop.f32.mrf.mxu0 }
 0x118   : > { %v565_v30 = vadd.f32 %v559_v22, %v526_v27  ;;  %v487_v33 = vadd.f32 %v486_v23, %v459_v24 }
 0x11c   : > { %v639_v52 = vpop.f32.mrf.mxu1 }
 0x11d   : > { %v523_v28 = vpop.f32.mrf.mxu2 }
 0x11e   : > { %v562_v31 = vpop.f32.mrf.mxu3  ;;  %v527_v38 = vadd.f32 %v523_v28, %v487_v33 }
 0x11f   : > { %v597_v32 = vpop.f32.mrf.mxu0 }
 0x120   : > { %v603_v34 = vadd.f32 %v597_v32, %v565_v30  ;;  %v566_v43 = vadd.f32 %v562_v31, %v527_v38 }
 0x122   : > { %v642_v39 = vadd.f32 %v636_v35, %v603_v34 }
 0x125   : > { %v675_v40 = vpop.f32.mrf.mxu2 }
 0x126   : > { %v681_v44 = vadd.f32 %v675_v40, %v642_v39  ;;  %v714_v45 = vpop.f32.mrf.mxu3 }
 0x127   : > { %v600_v47 = vpop.f32.mrf.mxu0 }
 0x128   : > { %v720_v48 = vadd.f32 %v714_v45, %v681_v44  ;;  %v604_v49 = vadd.f32 %v600_v47, %v566_v43 }
 0x12a   : > { %v3386_v51 = vadd.f32 %v3038_v46, %v720_v48  ;;  %v643_v54 = vadd.f32 %v639_v52, %v604_v49 }
 0x12c   : > { %v3390_v53 = vmul.f32 %v3384_v50, %v3386_v51 }
 0x12d   : > { %v678_v55 = vpop.f32.mrf.mxu2 }
 0x12e   : > { %v737_v56 = vmul.f32 %v3390_v53, %v3390_v53  ;;  %v682_v57 = vadd.f32 %v678_v55, %v643_v54  ;;  %v717_v58 = vpop.f32.mrf.mxu3 }
 0x130   : > { %v738_v59 = vmin.f32 %v737_v56, 16.0  ;;  %v721_v60 = vadd.f32 %v717_v58, %v682_v57 }
 0x132   : > { %v739_v61 = vmul.f32 2.1237322e-06, %v738_v59  ;;  %v3394_v62 = vadd.f32 %v3038_v46, %v721_v60  ;;  %v750_v63 = vmul.f32 3.8918573e-05, %v738_v59 }
 0x134   : > { %v740_v0 = vadd.f32 0.00028619796, %v739_v61  ;;  %v3398_v1 = vmul.f32 %v3384_v50, %v3394_v62  ;;  %v751_v2 = vadd.f32 0.001143296, %v750_v63 }
 0x136   : > { %v741_v3 = vmul.f32 %v740_v0, %v738_v59  ;;  %v777_v4 = vmul.f32 %v3398_v1, %v3398_v1  ;;  %v752_v5 = vmul.f32 %v751_v2, %v738_v59 }
 0x138   : > { %v778_v6 = vmin.f32 %v777_v4, 16.0  ;;  %v753_v7 = vadd.f32 0.014752088, %v752_v5  ;;  %v742_v8 = vadd.f32 0.0036580483, %v741_v3  ;;  %v726_v3 = vmul.f32 0.5, %v3386_v51 }
 0x139   : > { %v727_v51 = vmul.f32 0.5, %v3394_v62 }
 0x13a   : > { %v779_v9 = vmul.f32 2.1237322e-06, %v778_v6  ;;  %v754_v10 = vmul.f32 %v753_v7, %v738_v59  ;;  %v790_v11 = vmul.f32 3.8918573e-05, %v778_v6  ;;  %v743_v14 = vmul.f32 %v742_v8, %v738_v59 }
 0x13c   : > { %v780_v12 = vadd.f32 0.00028619796, %v779_v9  ;;  %v755_v13 = vadd.f32 0.112945676, %v754_v10  ;;  %v791_v15 = vadd.f32 0.001143296, %v790_v11 }
 0x13d   : > { %v744_v20 = vadd.f32 0.05243302, %v743_v14 }
 0x13e   : > { %v781_v16 = vmul.f32 %v780_v12, %v778_v6  ;;  %v756_v17 = vmul.f32 %v755_v13, %v738_v59  ;;  %v792_v18 = vmul.f32 %v791_v15, %v778_v6 }
 0x13f   : > { %v745_v26 = vmul.f32 %v744_v20, %v738_v59 }
 0x140   : > { %v757_v19 = vadd.f32 0.4994258, %v756_v17  ;;  %v793_v21 = vadd.f32 0.014752088, %v792_v18  ;;  %v782_v22 = vadd.f32 0.0036580483, %v781_v16 }
 0x141   : > { %v746_v30 = vadd.f32 0.18741608, %v745_v26 }
 0x142   : > { %v758_v23 = vmul.f32 %v757_v19, %v738_v59  ;;  %v794_v24 = vmul.f32 %v793_v21, %v778_v6  ;;  %v783_v28 = vmul.f32 %v782_v22, %v778_v6 }
 0x143   : > { %v747_v35 = vmul.f32 %v746_v30, %v738_v59 }
 0x144   : > { %v759_v25 = vadd.f32 1.0, %v758_v23  ;;  %v795_v27 = vadd.f32 0.112945676, %v794_v24  ;;  %v784_v32 = vadd.f32 0.05243302, %v783_v28 }
 0x145   : > { %v748_v43 = vadd.f32 1.1283791, %v747_v35 }
 0x146   : > { %3063 = vrcp.f32 %v759_v25  ;;  %v796_v29 = vmul.f32 %v795_v27, %v778_v6  ;;  %v785_v39 = vmul.f32 %v784_v32, %v778_v6  ;;  %v771_v41 = vand.u32 2147483648, %v759_v25  ;;  %v885_v32 = vld [vmem:[%s4050_s5 + $0x10] sm:$0xff] }
 0x147   : > { %v769_v45 = vand.u32 2147483647, %v759_v25  ;;  %vm765_vm10 = vweird.f32 %v759_v25  ;;  %v749_v52 = vmul.f32 %v748_v43, %v3390_v53 }
 0x148   : > { %v797_v31 = vadd.f32 0.4994258, %v796_v29  ;;  %v786_v46 = vadd.f32 0.18741608, %v785_v39  ;;  %v772_v48 = vor.u32 1.1754944e-38, %v771_v41 }
 0x149   : > { %vm770_vm12 = vcmp.eq.f32.partialorder %v769_v45, 8.507059e+37 }
 0x14a   : > { %v798_v33 = vmul.f32 %v797_v31, %v778_v6  ;;  %v787_v55 = vmul.f32 %v786_v46, %v778_v6  ;;  %v886_v31 = vld [vmem:[%s4050_s5 + $0x18] sm:$0xff] }
 0x14b   : > { %907 = vmatpush.msra.mxu0 %v886_v31 }
 0x14c   : > { %v3064_v34 = vpop.eup %3063  ;;  %v799_v38 = vadd.f32 1.0, %v798_v33  ;;  %v788_v63 = vadd.f32 1.1283791, %v787_v55  ;;  %v884_v33 = vld [vmem:[%s4050_s5 + $0x8] sm:$0xff] }
 0x14d   : > { %v761_v36 = vmul.f32 %v3064_v34, %v759_v25  ;;  %vm766_vm9 = vweird.f32 %v3064_v34  ;;  %908 = vmatpush.msra.mxu0 %v885_v32 }
 0x14e   : > { %3065 = vrcp.f32 %v799_v38  ;;  %vm767_vm11 = vmor %vm765_vm10, %vm766_vm9  ;;  %v811_v61 = vand.u32 2147483648, %v799_v38  ;;  %v809_v2 = vand.u32 2147483647, %v799_v38  ;;  %vm805_vm14 = vweird.f32 %v799_v38 }
 0x14f   : > { %v762_v40 = vsub.f32 1.0, %v761_v36  ;;  %v789_v6 = vmul.f32 %v788_v63, %v3398_v1  ;;  %v3155_v1 = vmov 32.0   ;;  %909 = vmatpush.msra.mxu0 %v884_v33  ;;  %v1017_v33 = vld [vmem:[%s4049_s4 + $0x268] sm:$0xff] }
 0x150   : > { %v812_v53 = vor.u32 1.1754944e-38, %v811_v61  ;;  %vm810_vm8 = vcmp.eq.f32.partialorder %v809_v2, 8.507059e+37  ;;  %3067 = vrcp.f32 %v3155_v1 }
 0x151   : > { %v763_v44 = vmul.f32 %v3064_v34, %v762_v40 }
 0x153   : > { %v764_v47 = vadd.f32 %v3064_v34, %v763_v44 }
 0x154   : > { %v3066_v49 = vpop.eup %3065 }
 0x155   : > { %v768_v54 = vsel %vm767_vm11, %v3064_v34, %v764_v47  ;;  %v801_v57 = vmul.f32 %v3066_v49, %v799_v38  ;;  %vm806_vm13 = vweird.f32 %v3066_v49  ;;  %v883_v34 = vld [vmem:[%s4050_s5] sm:$0xff] }
 0x156   : > { %v773_v56 = vsel %vm770_vm12, %v772_v48, %v768_v54  ;;  %vm807_vm15 = vmor %vm805_vm14, %vm806_vm13  ;;  %v3068_v18 = vpop.eup %3067  ;;  %910 = vmatpush.msra.mxu0 %v883_v34 }
 0x157   : > { %v774_v58 = vmul.f32 %v773_v56, %v749_v52  ;;  %v802_v59 = vsub.f32 1.0, %v801_v57  ;;  %v832_v19 = vmul.f32 32.0, %v3068_v18  ;;  %vm836_vm9 = vweird.f32 %v3068_v18  ;;  %v3039_v52 = vld [vmem:[%s4052_s7 + $0x1] ss:$0 sm:$0xff] }
 0x159   : > { %v2910_v60 = vclamps-f32 %v774_v58, 1.0  ;;  %v803_v0 = vmul.f32 %v3066_v49, %v802_v59  ;;  %v3040_v58 = vld [vmem:[%s4052_s7 + $0x2] ss:$0 sm:$0xff] }
 0x15b   : > { %v817_v4 = vadd.f32 1.0, %v2910_v60  ;;  %v804_v5 = vadd.f32 %v3066_v49, %v803_v0 }
 0x15d   : > { %v819_v7 = vmul.f32 %v817_v4, %v726_v3  ;;  %v808_v8 = vsel %vm807_vm15, %v3066_v49, %v804_v5 }
 0x15e   : > { %v813_v10 = vsel %vm810_vm8, %v812_v53, %v808_v8  ;;  %vm927_vm8 = vcmask 64512  }
 0x15f   : > { %v821_v9 = vadd.f32 %v819_v7, %v3341_v37  ;;  %v814_v11 = vmul.f32 %v813_v10, %v789_v6  ;;  %v833_v37 = vsub.f32 1.0, %v832_v19  ;;  %v3041_v7 = vld [vmem:[%s4052_s7 + $0x6] ss:$0 sm:$0xff] }
 0x161   : > { %v825_v12 = vsel %vm434_vm1, %v821_v9, 0.0  ;;  %v2911_v13 = vclamps-f32 %v814_v11, 1.0  ;;  %v834_v20 = vmul.f32 %v3068_v18, %v833_v37 }
 0x162   : > { %826 = vadd.xlane.f32.xlu1 %v825_v12  ;;  %v3458_v12 = vld [vmem:[%s379_s16] ss:$0 sm:$0xff]  ;;  %s3159_s16 = smov 80  }
 0x163   : > { %v818_v14 = vadd.f32 1.0, %v2911_v13  ;;  %v835_v21 = vadd.f32 %v3068_v18, %v834_v20 }
 0x165   : > { %v820_v15 = vmul.f32 %v818_v14, %v727_v51  ;;  %v3410_v22 = vsel %vm836_vm9, %v3068_v18, %v835_v21  ;;  %vm959_vm9 = vcmask 130048  }
 0x167   : > { %v822_v16 = vadd.f32 %v820_v15, %v3347_v42 }
 0x169   : > { %v828_v17 = vsel %vm434_vm1, %v822_v16, 0.0 }
 0x16a   : > { %829 = vadd.xlane.f32.xlu1 %v828_v17 }
 0x1d5   : > { %v827_v23 = vpop.xlane.xlu1 %826 }
 0x1d6   : > { %v838_v62 = vmul.f32 %v3410_v22, %v827_v23 }
 0x1d8   : > { %v840_v24 = vsub.f32 %v821_v9, %v838_v62 }
 0x1da   : > { %v842_v25 = vmul.f32 %v840_v24, %v840_v24 }
 0x1dc   : > { %v844_v42 = vsel %vm434_vm1, %v842_v25, 0.0 }
 0x1dd   : > { %845 = vadd.xlane.f32.xlu2 %v844_v42  ;;  %v830_v26 = vpop.xlane.xlu1 %829 }
 0x1de   : > { %v839_v27 = vmul.f32 %v3410_v22, %v830_v26 }
 0x1e0   : > { %v841_v28 = vsub.f32 %v822_v16, %v839_v27 }
 0x1e2   : > { %v843_v29 = vmul.f32 %v841_v28, %v841_v28 }
 0x1e4   : > { %v847_v30 = vsel %vm434_vm1, %v843_v29, 0.0 }
 0x1e5   : > { %848 = vadd.xlane.f32.xlu2 %v847_v30 }
 0x250   : > { %v846_v35 = vpop.xlane.xlu2 %845 }
 0x251   : > { %v850_v36 = vmul.f32 %v846_v35, %v3410_v22 }
 0x253   : > { %v852_v38 = vadd.f32 1e-05, %v850_v36 }
 0x255   : > { %3069 = vrsqrt.f32 %v852_v38  ;;  %vm860_vm11 = vweird.f32 %v852_v38 }
 0x258   : > { %v849_v39 = vpop.xlane.xlu2 %848 }
 0x259   : > { %v851_v40 = vmul.f32 %v849_v39, %v3410_v22 }
 0x25b   : > { %v3070_v41 = vpop.eup %3069  ;;  %v853_v44 = vadd.f32 1e-05, %v851_v40 }
 0x25c   : > { %v855_v43 = vmul.f32 %v3070_v41, %v852_v38  ;;  %vm861_vm10 = vweird.f32 %v3070_v41 }
 0x25d   : > { %3071 = vrsqrt.f32 %v853_v44  ;;  %vm862_vm12 = vmor %vm860_vm11, %vm861_vm10  ;;  %vm870_vm14 = vweird.f32 %v853_v44 }
 0x25e   : > { %v856_v45 = vmul.f32 %v3070_v41, %v855_v43 }
 0x260   : > { %v857_v46 = vmul.f32 0.5, %v856_v45 }
 0x262   : > { %v858_v47 = vsub.f32 1.5, %v857_v46 }
 0x263   : > { %v3072_v48 = vpop.eup %3071 }
 0x264   : > { %v859_v49 = vmul.f32 %v3070_v41, %v858_v47  ;;  %v865_v54 = vmul.f32 %v3072_v48, %v853_v44  ;;  %vm871_vm13 = vweird.f32 %v3072_v48 }
 0x265   : > { %vm872_vm15 = vmor %vm870_vm14, %vm871_vm13 }
 0x266   : > { %v863_v55 = vsel %vm862_vm12, %v3070_v41, %v859_v49  ;;  %v866_v57 = vmul.f32 %v3072_v48, %v865_v54 }
 0x267   : > { %v874_v56 = vmul.f32 %v863_v55, %v840_v24 }
 0x268   : > { %v867_v60 = vmul.f32 0.5, %v866_v57 }
 0x269   : > { %v877_v59 = vmul.f32 %v3039_v52, %v874_v56 }
 0x26a   : > { %v868_v61 = vsub.f32 1.5, %v867_v60 }
 0x26b   : > { %v3436_v63 = vadd.f32 %v3040_v58, %v877_v59 }
 0x26c   : > { %v869_v0 = vmul.f32 %v3072_v48, %v868_v61 }
 0x26d   : > { %2912 = vmatmul.msk.f32.vlgmr.msra.gmra.mxu0 %vm434_vm1, %v3436_v63 }
 0x26e   : > { %v873_v2 = vsel %vm872_vm15, %v3072_v48, %v869_v0 }
 0x26f   : > { %v875_v3 = vmul.f32 %v873_v2, %v841_v28 }
 0x271   : > { %v878_v4 = vmul.f32 %v3039_v52, %v875_v3 }
 0x273   : > { %v3440_v5 = vadd.f32 %v3040_v58, %v878_v4 }
 0x275   : > { %2913 = vmatmul.msk.f32.gmra.mxu0 %vm434_vm1, %v3440_v5 }
 0x2ea   : > { %v912_v53 = vpop.f32.mrf.mxu0 }
 0x2eb   : > { %v913_v6 = vadd.f32 %v3041_v7, %v912_v53 }
 0x2ed   : > { %923 = vrot.lane.b32.xlu1 %v913_v6, %s3156_s17 }
 0x2f2   : > { %v915_v8 = vpop.f32.mrf.mxu0 }
 0x2f3   : > { %v916_v9 = vadd.f32 %v3041_v7, %v915_v8 }
 0x2f5   : > { %925 = vrot.lane.b32.xlu0 %v916_v9, %s3156_s17  ;;  %v3470_v42 = vpack.i.bf16 %v913_v6, %v916_v9 }
 0x35f   : > { %v924_v11 = vpop.permute.xlu1 %923 }
 0x367   : > { %v926_v10 = vpop.permute.xlu0 %925 }
 0x368   : > { %2914 = vmatpush.xpose.msk.msra.mxu1 %vm927_vm8, %v926_v10 }
 0x36c   : > { %2915 = vmatpush.xpose.msk.msra.mxu1 %vm927_vm8, %v924_v11 }
 0x36f   : > { %2916 = vmatmul.msk.f32.vlgmr.msra.gmra.mxu1 %vm927_vm8, %v913_v6 }
 0x377   : > { %2917 = vmatmul.msk.f32.gmra.mxu1 %vm927_vm8, %v916_v9 }
 0x3ec   : > { %v953_v13 = vpop.f32.mrf.mxu1 }
 0x3ed   : > { %v954_v51 = vadd.f32 %v3458_v12, %v953_v13 }
 0x3ef   : > { %v960_v14 = vsel %vm959_vm9, %v954_v51, -inf }
 0x3f0   : > { %961 = vmax.xlane.f32.xlu2 %v960_v14 }
 0x3f4   : > { %v956_v15 = vpop.f32.mrf.mxu1 }
 0x3f5   : > { %v957_v16 = vadd.f32 %v3458_v12, %v956_v15 }
 0x3f7   : > { %v963_v17 = vsel %vm959_vm9, %v957_v16, -inf }
 0x3f8   : > { %964 = vmax.xlane.f32.xlu0 %v963_v17 }
 0x40c   : > { %1018 = vrot.lane.b32.xlu0 %v913_v6, %s3157_s19 }
 0x414   : > { %1305 = vrot.lane.b32.xlu0 %v913_v6, %s3158_s20 }
 0x41c   : > { %1177 = vrot.lane.b32.xlu0 %v913_v6, %s3159_s16 }
 0x424   : > { %1303 = vrot.lane.b32.xlu0 %v916_v9, %s3160_s21 }
 0x463   : > { %v962_v1 = vpop.xlane.xlu2 %961 }
 0x464   : > { %v966_v18 = vsub.f32 %v954_v51, %v962_v1 }
 0x466   : > { %v968_v19 = vmul.f32 1.442695, %v966_v18 }
 0x468   : > { %3073 = vpow2.f32 %v968_v19 }
 0x46b   : > { %v965_v37 = vpop.xlane.xlu0 %964 }
 0x46c   : > { %v967_v20 = vsub.f32 %v957_v16, %v965_v37 }
 0x46e   : > { %v3074_v21 = vpop.eup %3073  ;;  %v970_v23 = vmul.f32 1.442695, %v967_v20 }
 0x46f   : > { %v972_v62 = vsel %vm959_vm9, %v3074_v21, 0.0 }
 0x470   : > { %3075 = vpow2.f32 %v970_v23  ;;  %973 = vadd.xlane.f32.xlu2 %v972_v62 }
 0x476   : > { %v3076_v24 = vpop.eup %3075 }
 0x477   : > { %v975_v25 = vsel %vm959_vm9, %v3076_v24, 0.0 }
 0x478   : > { %976 = vadd.xlane.f32.xlu1 %v975_v25 }
 0x47e   : > { %v1019_v34 = vpop.permute.xlu0 %1018 }
 0x486   : > { %v1306_v40 = vpop.permute.xlu0 %1305 }
 0x488   : > { %3018 = vrot.lane.b32.xlu2 %v3470_v42, %s3161_s22 }
 0x48e   : > { %v1178_v44 = vpop.permute.xlu0 %1177 }
 0x490   : > { %1024 = vrot.lane.b32.xlu2 %v916_v9, %s3162_s23 }
 0x491   : > { %1179 = vrot.lane.b32.xlu1 %v916_v9, %s3159_s16 }
 0x496   : > { %v1304_v57 = vpop.permute.xlu0 %1303 }
 0x498   : > { %1022 = vrot.lane.b32.xlu2 %v913_v6, %s3162_s23 }
 0x4a0   : > { %1307 = vrot.lane.b32.xlu2 %v916_v9, %s3158_s20 }
 0x4a8   : > { %1020 = vrot.lane.b32.xlu2 %v916_v9, %s3157_s19 }
 0x4b0   : > { %1301 = vrot.lane.b32.xlu2 %v913_v6, %s3160_s21 }
 0x4b8   : > { %1173 = vrot.lane.b32.xlu2 %v913_v6, %s3163_s24 }
 0x4c0   : > { %1175 = vrot.lane.b32.xlu2 %v916_v9, %s3163_s24 }
 0x4e3   : > { %v974_v26 = vpop.xlane.xlu2 %973 }
 0x4e4   : > { %3077 = vrcp.f32 %v974_v26 }
 0x4ea   : > { %v3078_v29 = vpop.eup %3077 }
 0x4eb   : > { %v977_v27 = vpop.xlane.xlu1 %976  ;;  %v3019_v28 = vpop.permute.xlu2 %3018  ;;  %v980_v32 = vmul.f32 %v3078_v29, %v3074_v21 }
 0x4ec   : > { %v3020_v30 = vunpack.i.l.bf16 %v3019_v28  ;;  %3079 = vrcp.f32 %v977_v27  ;;  %v3021_v31 = vunpack.i.h.bf16 %v3019_v28 }
 0x4ee   : > { %1008 = vmatpush.msra.mxu2 %v3020_v30 }
 0x4f0   : > { %1009 = vmatpush.msra.mxu2 %v3021_v31 }
 0x4f1   : > { %2918 = vmatmul.msk.f32.vlgmr.msra.gmra.mxu2 %vm959_vm9, %v980_v32 }
 0x4f2   : > { %1165 = vmatpush.msrb.mxu2 %v1017_v33  ;;  %v3080_v36 = vpop.eup %3079 }
 0x4f3   : > { %v1025_v35 = vpop.permute.xlu2 %1024  ;;  %v981_v38 = vmul.f32 %v3080_v36, %v3076_v24 }
 0x4f4   : > { %2920 = vmatpush.xpose.msk.msra.mxu3 %vm927_vm8, %v1025_v35 }
 0x4f9   : > { %2919 = vmatmul.msk.f32.gmra.mxu2 %vm959_vm9, %v981_v38 }
 0x4fb   : > { %v1023_v39 = vpop.permute.xlu2 %1022 }
 0x4fc   : > { %2921 = vmatpush.xpose.msk.msra.mxu3 %vm927_vm8, %v1023_v39 }
 0x4ff   : > { %2922 = vmatmul.msk.f32.vlgmr.msra.gmra.mxu3 %vm927_vm8, %v1019_v34 }
 0x503   : > { %v1180_v41 = vpop.permute.xlu1 %1179  ;;  %v1308_v43 = vpop.permute.xlu2 %1307 }
 0x504   : > { %2930 = vmatpush.xpose.msk.msrb.mxu3 %vm927_vm8, %v1180_v41  ;;  %2938 = vmatpush.xpose.msk.msra.mxu2 %vm927_vm8, %v1308_v43 }
 0x508   : > { %2931 = vmatpush.xpose.msk.msrb.mxu3 %vm927_vm8, %v1178_v44  ;;  %2939 = vmatpush.xpose.msk.msra.mxu2 %vm927_vm8, %v1306_v40 }
 0x50b   : > { %v1021_v45 = vpop.permute.xlu2 %1020 }
 0x50c   : > { %2923 = vmatmul.msk.f32.gmra.mxu3 %vm927_vm8, %v1021_v45 }
 0x513   : > { %v1302_v46 = vpop.permute.xlu2 %1301 }
 0x51b   : > { %v1174_v47 = vpop.permute.xlu2 %1173 }
 0x51c   : > { %2932 = vmatmul.msk.f32.vlgmr.msrb.gmra.mxu3 %vm927_vm8, %v1174_v47 }
 0x523   : > { %v1176_v48 = vpop.permute.xlu2 %1175 }
 0x524   : > { %2933 = vmatmul.msk.f32.gmra.mxu3 %vm927_vm8, %v1176_v48 }
 0x574   : > { %v1011_v49 = vpop.f32.mrf.mxu2 }
 0x575   : > { %2928 = vmatmul.msk.f32.vlgmr.msrb.gmra.mxu2 %vm927_vm8, %v1011_v49 }
 0x57c   : > { %v1014_v52 = vpop.f32.mrf.mxu2 }
 0x57d   : > { %2929 = vmatmul.msk.f32.gmra.mxu2 %vm927_vm8, %v1014_v52 }
 0x582   : > { %v1051_v54 = vpop.f32.mrf.mxu3 }
 0x583   : > { %v1052_v55 = vadd.f32 %v3458_v12, %v1051_v54 }
 0x585   : > { %2940 = vmatmul.msk.f32.vlgmr.msra.gmra.mxu2 %vm927_vm8, %v1302_v46  ;;  %v1057_v56 = vsel %vm959_vm9, %v1052_v55, -inf }
 0x586   : > { %1058 = vmax.xlane.f32.xlu1 %v1057_v56 }
 0x58d   : > { %2941 = vmatmul.msk.f32.gmra.mxu2 %vm927_vm8, %v1304_v57 }
 0x58f   : > { %v1054_v58 = vpop.f32.mrf.mxu3 }
 0x590   : > { %v1055_v59 = vadd.f32 %v3458_v12, %v1054_v58 }
 0x592   : > { %v1060_v60 = vsel %vm959_vm9, %v1055_v59, -inf }
 0x593   : > { %1061 = vmax.xlane.f32.xlu0 %v1060_v60 }
 0x59f   : > { %v1206_v61 = vpop.f32.mrf.mxu3 }
 0x5a0   : > { %v1207_v0 = vadd.f32 %v3458_v12, %v1206_v61  ;;  %v1114_v61 = vld [vmem:[%s4049_s4 + $0x270] sm:$0xff] }
 0x5a1   : > { %1136 = vmatpush.msrb.mxu1 %v1114_v61 }
 0x5a2   : > { %v1212_v2 = vsel %vm959_vm9, %v1207_v0, -inf }
 0x5a3   : > { %1213 = vmax.xlane.f32.xlu1 %v1212_v2  ;;  %v1269_v2 = vld [vmem:[%s4049_s4 + $0x278] sm:$0xff] }
 0x5a4   : > { %1291 = vmatpush.msra.mxu1 %v1269_v2 }
 0x5a7   : > { %v1209_v15 = vpop.f32.mrf.mxu3 }
 0x5a8   : > { %v1210_v17 = vadd.f32 %v3458_v12, %v1209_v15 }
 0x5aa   : > { %v1215_v37 = vsel %vm959_vm9, %v1210_v17, -inf }
 0x5f8   : > { %v3507_v3 = vpop.f32.mrf.mxu2 }
 0x5f9   : > { %v1059_v4 = vpop.xlane.xlu1 %1058 }
 0x5fa   : > { %v1063_v7 = vsub.f32 %v1052_v55, %v1059_v4 }
 0x5fc   : > { %v1065_v53 = vmul.f32 1.442695, %v1063_v7 }
 0x5fe   : > { %3081 = vpow2.f32 %v1065_v53 }
 0x600   : > { %v3509_v6 = vpop.f32.mrf.mxu2 }
 0x604   : > { %v3511_v8 = vpop.eup %3081 }
 0x605   : > { %v1069_v9 = vsel %vm959_vm9, %v3511_v8, 0.0 }
 0x606   : > { %1070 = vadd.xlane.f32.xlu1 %v1069_v9  ;;  %v1062_v10 = vpop.xlane.xlu0 %1061 }
 0x607   : > { %v1064_v51 = vsub.f32 %v1055_v59, %v1062_v10 }
 0x608   : > { %v1334_v11 = vpop.f32.mrf.mxu2 }
 0x609   : > { %v1335_v13 = vadd.f32 %v3458_v12, %v1334_v11  ;;  %v1067_v16 = vmul.f32 1.442695, %v1064_v51 }
 0x60b   : > { %v1340_v14 = vsel %vm959_vm9, %v1335_v13, -inf  ;;  %3083 = vpow2.f32 %v1067_v16 }
 0x60c   : > { %1341 = vmax.xlane.f32.xlu2 %v1340_v14 }
 0x610   : > { %v1337_v1 = vpop.f32.mrf.mxu2 }
 0x611   : > { %v1338_v18 = vadd.f32 %v3458_v12, %v1337_v1  ;;  %v3084_v23 = vpop.eup %3083  ;;  %v1397_v1 = vld [vmem:[%s4049_s4 + $0x280] sm:$0xff] }
 0x612   : > { %v1072_v24 = vsel %vm959_vm9, %v3084_v23, 0.0 }
 0x613   : > { %v1343_v19 = vsel %vm959_vm9, %v1338_v18, -inf }
 0x614   : > { %1344 = vmax.xlane.f32.xlu0 %v1343_v19  ;;  %1216 = vmax.xlane.f32.xlu2 %v1215_v37 }
 0x616   : > { %v1214_v20 = vpop.xlane.xlu1 %1213 }
 0x617   : > { %v1218_v21 = vsub.f32 %v1207_v0, %v1214_v20 }
 0x619   : > { %v1220_v62 = vmul.f32 1.442695, %v1218_v21 }
 0x61b   : > { %3085 = vpow2.f32 %v1220_v62 }
 0x61c   : > { %1073 = vadd.xlane.f32.xlu2 %v1072_v24 }
 0x621   : > { %v3086_v25 = vpop.eup %3085 }
 0x622   : > { %v1224_v26 = vsel %vm959_vm9, %v3086_v25, 0.0 }
 0x624   : > { %1225 = vadd.xlane.f32.xlu2 %v1224_v26 }
 0x628   : > { %3023 = vrot.lane.b32.xlu0 %v3470_v42, %s4057_s28  ;;  %s382_s28 = scalar_lea.vmem %s4048_s3, %s4062_s10 }
 0x630   : > { %3033 = vrot.lane.b32.xlu0 %v3470_v42, %s4056_s29 }
 0x679   : > { %v1071_v39 = vpop.xlane.xlu1 %1070 }
 0x67f   : > { %v1342_v12 = vpop.xlane.xlu2 %1341 }
 0x680   : > { %v1346_v27 = vsub.f32 %v1335_v13, %v1342_v12 }
 0x682   : > { %v1348_v28 = vmul.f32 1.442695, %v1346_v27 }
 0x684   : > { %3087 = vpow2.f32 %v1348_v28 }
 0x687   : > { %v1345_v29 = vpop.xlane.xlu0 %1344  ;;  %v1217_v30 = vpop.xlane.xlu2 %1216 }
 0x688   : > { %v1347_v31 = vsub.f32 %v1338_v18, %v1345_v29  ;;  %v1219_v34 = vsub.f32 %v1210_v17, %v1217_v30 }
 0x68a   : > { %v3088_v32 = vpop.eup %3087  ;;  %v1350_v33 = vmul.f32 1.442695, %v1347_v31  ;;  %v1222_v36 = vmul.f32 1.442695, %v1219_v34 }
 0x68b   : > { %v1352_v35 = vsel %vm959_vm9, %v3088_v32, 0.0 }
 0x68c   : > { %3089 = vpow2.f32 %v1350_v33  ;;  %1353 = vadd.xlane.f32.xlu1 %v1352_v35 }
 0x68d   : > { %3091 = vpow2.f32 %v1222_v36 }
 0x68e   : > { %3093 = vrcp.f32 %v1071_v39 }
 0x68f   : > { %v1074_v43 = vpop.xlane.xlu2 %1073 }
 0x690   : > { %3095 = vrcp.f32 %v1074_v43 }
 0x692   : > { %v3090_v38 = vpop.eup %3089 }
 0x693   : > { %v1355_v40 = vsel %vm959_vm9, %v3090_v38, 0.0  ;;  %v3092_v41 = vpop.eup %3091 }
 0x694   : > { %1356 = vadd.xlane.f32.xlu2 %v1355_v40  ;;  %v3094_v45 = vpop.eup %3093  ;;  %v1227_v47 = vsel %vm959_vm9, %v3092_v41, 0.0 }
 0x695   : > { %v1077_v49 = vmul.f32 %v3094_v45, %v3511_v8 }
 0x696   : > { %v3096_v55 = vpop.eup %3095 }
 0x697   : > { %v1226_v52 = vpop.xlane.xlu2 %1225  ;;  %v1078_v58 = vmul.f32 %v3096_v55, %v3084_v23 }
 0x698   : > { %3097 = vrcp.f32 %v1226_v52 }
 0x69a   : > { %v3024_v44 = vpop.permute.xlu0 %3023 }
 0x69b   : > { %v3025_v46 = vunpack.i.l.bf16 %v3024_v44  ;;  %v3026_v48 = vunpack.i.h.bf16 %v3024_v44 }
 0x69c   : > { %1228 = vadd.xlane.f32.xlu2 %v1227_v47  ;;  %v1489_v47 = vld [vmem:[%s4051_s6 + $0x10] sm:$0xff] }
 0x69d   : > { %1105 = vmatpush.msrb.mxu0 %v3025_v46 }
 0x69e   : > { %v3098_v59 = vpop.eup %3097 }
 0x69f   : > { %1106 = vmatpush.msrb.mxu0 %v3026_v48  ;;  %v1232_v60 = vmul.f32 %v3098_v59, %v3086_v25  ;;  %v3042_v25 = vld [vmem:[%s4052_s7 + $0x7] ss:$0 sm:$0xff]  ;;  %v1488_v48 = vld [vmem:[%s4051_s6 + $0x8] sm:$0xff] }
 0x6a0   : > { %2924 = vmatmul.msk.f32.vlgmr.msrb.gmra.mxu0 %vm959_vm9, %v1077_v49  ;;  %v1487_v49 = vld [vmem:[%s4051_s6] sm:$0xff] }
 0x6a2   : > { %v3034_v54 = vpop.permute.xlu0 %3033 }
 0x6a3   : > { %v3035_v56 = vunpack.i.l.bf16 %v3034_v54  ;;  %v3036_v57 = vunpack.i.h.bf16 %v3034_v54 }
 0x6a5   : > { %1260 = vmatpush.msra.mxu0 %v3035_v56  ;;  %3028 = vrot.lane.b32.xlu1 %v3470_v42, %s4055_s11  ;;  %s387_s11 = scalar_lea.vmem %s4053_s8, %s3231_s13 }
 0x6a7   : > { %1261 = vmatpush.msra.mxu0 %v3036_v57 }
 0x6a8   : > { %2925 = vmatmul.msk.f32.gmra.mxu0 %vm959_vm9, %v1078_v58 }
 0x6a9   : > { %1419 = vmatpush.msrb.mxu0 %v1397_v1 }
 0x6b0   : > { %2934 = vmatmul.msk.f32.vlgmr.msra.gmra.mxu0 %vm959_vm9, %v1232_v60 }
 0x6ff   : > { %v1354_v42 = vpop.xlane.xlu1 %1353 }
 0x707   : > { %v1357_v0 = vpop.xlane.xlu2 %1356 }
 0x70f   : > { %v1229_v4 = vpop.xlane.xlu2 %1228 }
 0x710   : > { %3099 = vrcp.f32 %v1229_v4 }
 0x711   : > { %3101 = vrcp.f32 %v1354_v42 }
 0x712   : > { %3103 = vrcp.f32 %v1357_v0 }
 0x716   : > { %v3100_v7 = vpop.eup %3099 }
 0x717   : > { %v3029_v53 = vpop.permute.xlu1 %3028  ;;  %v1233_v8 = vmul.f32 %v3100_v7, %v3092_v41  ;;  %v3102_v9 = vpop.eup %3101 }
 0x718   : > { %v3030_v10 = vunpack.i.l.bf16 %v3029_v53  ;;  %v3031_v11 = vunpack.i.h.bf16 %v3029_v53  ;;  %v1360_v13 = vmul.f32 %v3102_v9, %v3088_v32  ;;  %v3104_v14 = vpop.eup %3103  ;;  %v3043_v53 = vld [vmem:[%s4052_s7 + $0x8] ss:$0 sm:$0xff] }
 0x719   : > { %2935 = vmatmul.msk.f32.gmra.mxu0 %vm959_vm9, %v1233_v8  ;;  %v1361_v15 = vmul.f32 %v3104_v14, %v3090_v38 }
 0x71a   : > { %1388 = vmatpush.msra.mxu3 %v3030_v10 }
 0x71c   : > { %1389 = vmatpush.msra.mxu3 %v3031_v11  ;;  %v3044_v11 = vld [vmem:[%s4052_s7 + $0x9] ss:$0 sm:$0xff] }
 0x71d   : > { %v1108_v51 = vpop.f32.mrf.mxu0  ;;  %2942 = vmatmul.msk.f32.vlgmr.msra.gmra.mxu3 %vm959_vm9, %v1360_v13 }
 0x71e   : > { %2926 = vmatmul.msk.f32.vlgmr.msrb.gmra.mxu1 %vm927_vm8, %v1108_v51 }
 0x725   : > { %v1111_v16 = vpop.f32.mrf.mxu0  ;;  %2943 = vmatmul.msk.f32.gmra.mxu3 %vm959_vm9, %v1361_v15 }
 0x726   : > { %2927 = vmatmul.msk.f32.gmra.mxu1 %vm927_vm8, %v1111_v16 }
 0x72d   : > { %v1263_v17 = vpop.f32.mrf.mxu0 }
 0x72e   : > { %2936 = vmatmul.msk.f32.vlgmr.msra.gmra.mxu1 %vm927_vm8, %v1263_v17 }
 0x796   : > { %v1266_v18 = vpop.f32.mrf.mxu0 }
 0x797   : > { %2937 = vmatmul.msk.f32.gmra.mxu1 %vm927_vm8, %v1266_v18 }
 0x79b   : > { %v1138_v20 = vpop.f32.mrf.mxu1 }
 0x79c   : > { %v1168_v62 = vadd.f32 %v3507_v3, %v1138_v20 }
 0x7a0   : > { %v1391_v19 = vpop.f32.mrf.mxu3 }
 0x7a1   : > { %2944 = vmatmul.msk.f32.vlgmr.msrb.gmra.mxu0 %vm927_vm8, %v1391_v19 }
 0x7a3   : > { %v1141_v21 = vpop.f32.mrf.mxu1 }
 0x7a4   : > { %v1171_v29 = vadd.f32 %v3509_v6, %v1141_v21 }
 0x7a8   : > { %v1394_v37 = vpop.f32.mrf.mxu3 }
 0x7a9   : > { %2945 = vmatmul.msk.f32.gmra.mxu0 %vm927_vm8, %v1394_v37  ;;  %v3045_v37 = vld [vmem:[%s4052_s7 + $0xa] ss:$0 sm:$0xff] }
 0x7ab   : > { %v1293_v23 = vpop.f32.mrf.mxu1 }
 0x7ac   : > { %v1299_v24 = vadd.f32 %v1293_v23, %v1168_v62 }
 0x814   : > { %v1296_v28 = vpop.f32.mrf.mxu1 }
 0x815   : > { %v1300_v31 = vadd.f32 %v1296_v28, %v1171_v29  ;;  %v1617_v28 = vld [vmem:[%s4049_s4 + $0x2c0] sm:$0xff] }
 0x816   : > { %1635 = vmatpush.msrb.mxu2 %v1617_v28 }
 0x81e   : > { %v1421_v26 = vpop.f32.mrf.mxu0 }
 0x81f   : > { %v1427_v12 = vadd.f32 %v1421_v26, %v1299_v24 }
 0x821   : > { %v1431_v27 = vadd.f32 %v3042_v25, %v1427_v12 }
 0x823   : > { %v1433_v30 = vadd.f32 %v1431_v27, %v3436_v63 }
 0x825   : > { %v1437_v32 = vsel %vm434_vm1, %v1433_v30, 0.0 }
 0x826   : > { %1438 = vadd.xlane.f32.xlu0 %v1437_v32  ;;  %v1424_v33 = vpop.f32.mrf.mxu0  ;;  %v1616_v32 = vld [vmem:[%s4049_s4 + $0x2b8] sm:$0xff] }
 0x827   : > { %v1428_v34 = vadd.f32 %v1424_v33, %v1300_v31  ;;  %1636 = vmatpush.msrb.mxu2 %v1616_v32 }
 0x829   : > { %v1432_v3 = vadd.f32 %v3042_v25, %v1428_v34 }
 0x82b   : > { %v1434_v35 = vadd.f32 %v1432_v3, %v3440_v5  ;;  %v1490_v5 = vld [vmem:[%s4051_s6 + $0x18] sm:$0xff] }
 0x82c   : > { %1511 = vmatpush.msrb.mxu1 %v1490_v5 }
 0x82d   : > { %v1440_v36 = vsel %vm434_vm1, %v1434_v35, 0.0 }
 0x82e   : > { %1441 = vadd.xlane.f32.xlu2 %v1440_v36  ;;  %1512 = vmatpush.msrb.mxu1 %v1489_v47  ;;  %v1612_v47 = vld [vmem:[%s4049_s4 + $0x298] sm:$0xff] }
 0x830   : > { %1513 = vmatpush.msrb.mxu1 %v1488_v48 }
 0x832   : > { %1514 = vmatpush.msrb.mxu1 %v1487_v49 }
 0x899   : > { %v1439_v38 = vpop.xlane.xlu0 %1438 }
 0x89a   : > { %v1443_v39 = vmul.f32 %v1439_v38, %v3410_v22 }
 0x89c   : > { %v1445_v40 = vsub.f32 %v1433_v30, %v1443_v39 }
 0x89e   : > { %v1447_v41 = vmul.f32 %v1445_v40, %v1445_v40 }
 0x8a0   : > { %v1449_v6 = vsel %vm434_vm1, %v1447_v41, 0.0 }
 0x8a1   : > { %1450 = vadd.xlane.f32.xlu1 %v1449_v6  ;;  %v1442_v63 = vpop.xlane.xlu2 %1441 }
 0x8a2   : > { %v1444_v43 = vmul.f32 %v1442_v63, %v3410_v22 }
 0x8a4   : > { %v1446_v44 = vsub.f32 %v1434_v35, %v1444_v43  ;;  %v1615_v35 = vld [vmem:[%s4049_s4 + $0x2b0] sm:$0xff]  ;;  %v1613_v43 = vld [vmem:[%s4049_s4 + $0x2a0] sm:$0xff] }
 0x8a5   : > { %1637 = vmatpush.msrb.mxu2 %v1615_v35 }
 0x8a6   : > { %v1448_v45 = vmul.f32 %v1446_v44, %v1446_v44 }
 0x8a8   : > { %v1452_v46 = vsel %vm434_vm1, %v1448_v45, 0.0 }
 0x8a9   : > { %1453 = vadd.xlane.f32.xlu2 %v1452_v46 }
 0x914   : > { %v1451_v52 = vpop.xlane.xlu1 %1450 }
 0x915   : > { %v1455_v54 = vmul.f32 %v1451_v52, %v3410_v22 }
 0x917   : > { %v1457_v55 = vadd.f32 1e-05, %v1455_v54  ;;  %v1611_v54 = vld [vmem:[%s4049_s4 + $0x290] sm:$0xff] }
 0x919   : > { %3105 = vrsqrt.f32 %v1457_v55  ;;  %vm1465_vm11 = vweird.f32 %v1457_v55 }
 0x91c   : > { %v1454_v56 = vpop.xlane.xlu2 %1453 }
 0x91d   : > { %v1456_v57 = vmul.f32 %v1454_v56, %v3410_v22 }
 0x91f   : > { %v3106_v58 = vpop.eup %3105  ;;  %v1458_v59 = vadd.f32 1e-05, %v1456_v57 }
 0x920   : > { %v1460_v60 = vmul.f32 %v3106_v58, %v1457_v55  ;;  %vm1466_vm10 = vweird.f32 %v3106_v58 }
 0x921   : > { %3107 = vrsqrt.f32 %v1458_v59  ;;  %vm1467_vm12 = vmor %vm1465_vm11, %vm1466_vm10  ;;  %vm1475_vm14 = vweird.f32 %v1458_v59 }
 0x922   : > { %v1461_v61 = vmul.f32 %v3106_v58, %v1460_v60 }
 0x924   : > { %v1462_v0 = vmul.f32 0.5, %v1461_v61 }
 0x926   : > { %v1463_v2 = vsub.f32 1.5, %v1462_v0 }
 0x927   : > { %v3108_v42 = vpop.eup %3107 }
 0x928   : > { %v1464_v4 = vmul.f32 %v3106_v58, %v1463_v2  ;;  %v1470_v7 = vmul.f32 %v3108_v42, %v1458_v59  ;;  %vm1476_vm13 = vweird.f32 %v3108_v42 }
 0x929   : > { %vm1477_vm15 = vmor %vm1475_vm14, %vm1476_vm13 }
 0x92a   : > { %v1468_v8 = vsel %vm1467_vm12, %v3106_v58, %v1464_v4  ;;  %v1471_v9 = vmul.f32 %v3108_v42, %v1470_v7  ;;  %v1610_v58 = vld [vmem:[%s4049_s4 + $0x288] sm:$0xff] }
 0x92b   : > { %v1479_v10 = vmul.f32 %v1468_v8, %v1445_v40  ;;  %v1614_v40 = vld [vmem:[%s4049_s4 + $0x2a8] sm:$0xff] }
 0x92c   : > { %v1472_v13 = vmul.f32 0.5, %v1471_v9  ;;  %1638 = vmatpush.msrb.mxu2 %v1614_v40 }
 0x92d   : > { %v1482_v51 = vmul.f32 %v3043_v53, %v1479_v10 }
 0x92e   : > { %v1473_v14 = vsub.f32 1.5, %v1472_v13  ;;  %1639 = vmatpush.msrb.mxu2 %v1613_v43 }
 0x92f   : > { %v3587_v15 = vadd.f32 %v3044_v11, %v1482_v51 }
 0x930   : > { %v1474_v16 = vmul.f32 %v3108_v42, %v1473_v14  ;;  %1640 = vmatpush.msrb.mxu2 %v1612_v47 }
 0x931   : > { %2946 = vmatmul.msk.f32.vlgmr.msrb.gmra.mxu1 %vm434_vm1, %v3587_v15 }
 0x932   : > { %v1478_v17 = vsel %vm1477_vm15, %v3108_v42, %v1474_v16  ;;  %1641 = vmatpush.msrb.mxu2 %v1611_v54 }
 0x933   : > { %v1480_v1 = vmul.f32 %v1478_v17, %v1446_v44 }
 0x934   : > { %1642 = vmatpush.msrb.mxu2 %v1610_v58 }
 0x935   : > { %v1483_v18 = vmul.f32 %v3043_v53, %v1480_v1 }
 0x937   : > { %v3591_v19 = vadd.f32 %v3044_v11, %v1483_v18 }
 0x939   : > { %2947 = vmatmul.msk.f32.gmra.mxu1 %vm434_vm1, %v3591_v19 }
 0x9ae   : > { %v1516_v20 = vpop.f32.mrf.mxu1 }
 0x9af   : > { %v3598_v21 = vadd.f32 %v3045_v37, %v1516_v20 }
 0x9b1   : > { %v3602_v23 = vmul.f32 %v3598_v21, %v3384_v50 }
 0x9b3   : > { %v1526_v62 = vmul.f32 %v3602_v23, %v3602_v23 }
 0x9b5   : > { %v1527_v24 = vmin.f32 %v1526_v62, 16.0 }
 0x9b6   : > { %v1519_v25 = vpop.f32.mrf.mxu1 }
 0x9b7   : > { %v1528_v26 = vmul.f32 2.1237322e-06, %v1527_v24  ;;  %v1539_v12 = vmul.f32 3.8918573e-05, %v1527_v24  ;;  %v3606_v27 = vadd.f32 %v3045_v37, %v1519_v25 }
 0x9b9   : > { %v1529_v29 = vadd.f32 0.00028619796, %v1528_v26  ;;  %v1540_v30 = vadd.f32 0.001143296, %v1539_v12  ;;  %v3613_v31 = vmul.f32 %v3606_v27, %v3384_v50  ;;  %v1523_v47 = vmul.f32 0.5, %v3606_v27 }
 0x9bb   : > { %v1530_v33 = vmul.f32 %v1529_v29, %v1527_v24  ;;  %v1541_v34 = vmul.f32 %v1540_v30, %v1527_v24  ;;  %v1566_v3 = vmul.f32 %v3613_v31, %v3613_v31 }
 0x9bd   : > { %v1542_v36 = vadd.f32 0.014752088, %v1541_v34  ;;  %v1567_v38 = vmin.f32 %v1566_v3, 16.0  ;;  %v1531_v39 = vadd.f32 0.0036580483, %v1530_v33 }
 0x9bf   : > { %v1543_v41 = vmul.f32 %v1542_v36, %v1527_v24  ;;  %v1568_v6 = vmul.f32 2.1237322e-06, %v1567_v38  ;;  %v1579_v63 = vmul.f32 3.8918573e-05, %v1567_v38  ;;  %v1532_v46 = vmul.f32 %v1531_v39, %v1527_v24 }
 0x9c1   : > { %v1544_v44 = vadd.f32 0.112945676, %v1543_v41  ;;  %v1569_v45 = vadd.f32 0.00028619796, %v1568_v6  ;;  %v1580_v5 = vadd.f32 0.001143296, %v1579_v63 }
 0x9c2   : > { %v1533_v56 = vadd.f32 0.05243302, %v1532_v46  ;;  %v1522_v41 = vmul.f32 0.5, %v3598_v21 }
 0x9c3   : > { %v1545_v48 = vmul.f32 %v1544_v44, %v1527_v24  ;;  %v1570_v49 = vmul.f32 %v1569_v45, %v1567_v38  ;;  %v1581_v52 = vmul.f32 %v1580_v5, %v1567_v38 }
 0x9c4   : > { %v1534_v2 = vmul.f32 %v1533_v56, %v1527_v24 }
 0x9c5   : > { %v1546_v55 = vadd.f32 0.4994258, %v1545_v48  ;;  %v1582_v57 = vadd.f32 0.014752088, %v1581_v52  ;;  %v1571_v60 = vadd.f32 0.0036580483, %v1570_v49 }
 0x9c6   : > { %v1535_v53 = vadd.f32 0.18741608, %v1534_v2  ;;  %v3046_v49 = vld [vmem:[%s4052_s7 + $0xb] ss:$0 sm:$0xff] }
 0x9c7   : > { %v1547_v59 = vmul.f32 %v1546_v55, %v1527_v24  ;;  %v1583_v61 = vmul.f32 %v1582_v57, %v1567_v38  ;;  %v1572_v4 = vmul.f32 %v1571_v60, %v1567_v38 }
 0x9c8   : > { %v1536_v13 = vmul.f32 %v1535_v53, %v1527_v24  ;;  %v1718_v53 = vld [vmem:[%s4049_s4 + $0x218] sm:$0xff] }
 0x9c9   : > { %v1548_v0 = vadd.f32 1.0, %v1547_v59  ;;  %v1584_v42 = vadd.f32 0.112945676, %v1583_v61  ;;  %v1573_v9 = vadd.f32 0.05243302, %v1572_v4  ;;  %1773 = vmatpush.msra.mxu0 %v1718_v53 }
 0x9ca   : > { %v1537_v18 = vadd.f32 1.1283791, %v1536_v13  ;;  %v1722_v13 = vld [vmem:[%s4049_s4 + $0x238] sm:$0xff] }
 0x9cb   : > { %3109 = vrcp.f32 %v1548_v0  ;;  %v1585_v7 = vmul.f32 %v1584_v42, %v1567_v38  ;;  %v1574_v16 = vmul.f32 %v1573_v9, %v1567_v38  ;;  %v1560_v1 = vand.u32 2147483648, %v1548_v0  ;;  %1746 = vmatpush.msrb.mxu3 %v1722_v13 }
 0x9cc   : > { %v1558_v20 = vand.u32 2147483647, %v1548_v0  ;;  %vm1554_vm11 = vweird.f32 %v1548_v0  ;;  %v1538_v28 = vmul.f32 %v1537_v18, %v3602_v23 }
 0x9cd   : > { %v1586_v8 = vadd.f32 0.4994258, %v1585_v7  ;;  %v1575_v62 = vadd.f32 0.18741608, %v1574_v16  ;;  %v1561_v26 = vor.u32 1.1754944e-38, %v1560_v1  ;;  %v1721_v16 = vld [vmem:[%s4049_s4 + $0x230] sm:$0xff] }
 0x9ce   : > { %vm1559_vm13 = vcmp.eq.f32.partialorder %v1558_v20, 8.507059e+37  ;;  %v1720_v1 = vld [vmem:[%s4049_s4 + $0x228] sm:$0xff]  ;;  %1747 = vmatpush.msrb.mxu3 %v1721_v16 }
 0x9cf   : > { %v1587_v10 = vmul.f32 %v1586_v8, %v1567_v38  ;;  %v1576_v30 = vmul.f32 %v1575_v62, %v1567_v38  ;;  %v1717_v8 = vld [vmem:[%s4049_s4 + $0x210] sm:$0xff]  ;;  %v1785_v20 = vld [vmem:[%s4049_s4 + $0x248] sm:$0xff]  ;;  %v1719_v62 = vld [vmem:[%s4049_s4 + $0x220] sm:$0xff] }
 0x9d0   : > { %1774 = vmatpush.msra.mxu0 %v1717_v8  ;;  %1748 = vmatpush.msrb.mxu3 %v1720_v1 }
 0x9d1   : > { %v3110_v11 = vpop.eup %3109  ;;  %v1588_v14 = vadd.f32 1.0, %v1587_v10  ;;  %v1577_v36 = vadd.f32 1.1283791, %v1576_v30  ;;  %v1716_v10 = vld [vmem:[%s4049_s4 + $0x208] sm:$0xff] }
 0x9d2   : > { %v1550_v51 = vmul.f32 %v3110_v11, %v1548_v0  ;;  %vm1555_vm10 = vweird.f32 %v3110_v11  ;;  %1775 = vmatpush.msra.mxu0 %v1716_v10  ;;  %1749 = vmatpush.msrb.mxu3 %v1719_v62  ;;  %v1822_v10 = vld [vmem:[%s4049_s4 + $0x260] sm:$0xff] }
 0x9d3   : > { %3111 = vrcp.f32 %v1588_v14  ;;  %vm1556_vm12 = vmor %vm1554_vm11, %vm1555_vm10  ;;  %v1600_v35 = vand.u32 2147483648, %v1588_v14  ;;  %v1598_v40 = vand.u32 2147483647, %v1588_v14  ;;  %vm1594_vm15 = vweird.f32 %v1588_v14 }
 0x9d4   : > { %v1551_v17 = vsub.f32 1.0, %v1550_v51  ;;  %vm1620_vm10 = vcmask 523264   ;;  %v1578_v38 = vmul.f32 %v1577_v36, %v3613_v31 }
 0x9d5   : > { %v1601_v43 = vor.u32 1.1754944e-38, %v1600_v35  ;;  %v3047_v35 = vld [vmem:[%s4052_s7 + $0xc] ss:$0 sm:$0xff] }
 0x9d6   : > { %v1552_v37 = vmul.f32 %v3110_v11, %v1551_v17  ;;  %v1786_v17 = vld [vmem:[%s4049_s4 + $0x250] sm:$0xff] }
 0x9d8   : > { %v1553_v25 = vadd.f32 %v3110_v11, %v1552_v37 }
 0x9d9   : > { %v3112_v12 = vpop.eup %3111 }
 0x9da   : > { %v1557_v29 = vsel %vm1556_vm12, %v3110_v11, %v1553_v25  ;;  %v1590_v32 = vmul.f32 %v3112_v12, %v1588_v14  ;;  %vm1595_vm14 = vweird.f32 %v3112_v12  ;;  %vm1599_vm12 = vcmp.eq.f32.partialorder %v1598_v40, 8.507059e+37  ;;  %v1715_v11 = vld [vmem:[%s4049_s4 + $0x200] sm:$0xff]  ;;  %v1787_v14 = vld [vmem:[%s4049_s4 + $0x258] sm:$0xff] }
 0x9db   : > { %v1562_v24 = vsel %vm1559_vm13, %v1561_v26, %v1557_v29  ;;  %vm1596_vm11 = vmor %vm1594_vm15, %vm1595_vm14  ;;  %1809 = vmatpush.msra.mxu1 %v1787_v14  ;;  %1776 = vmatpush.msra.mxu0 %v1715_v11  ;;  %v1784_v25 = vld [vmem:[%s4049_s4 + $0x240] sm:$0xff] }
 0x9dc   : > { %v1563_v33 = vmul.f32 %v1562_v24, %v1538_v28  ;;  %v1591_v34 = vsub.f32 1.0, %v1590_v32 }
 0x9dd   : > { %1810 = vmatpush.msra.mxu1 %v1786_v17 }
 0x9de   : > { %v2948_v3 = vclamps-f32 %v1563_v33, 1.0  ;;  %v1592_v39 = vmul.f32 %v3112_v12, %v1591_v34 }
 0x9df   : > { %1811 = vmatpush.msra.mxu1 %v1785_v20 }
 0x9e0   : > { %v1606_v6 = vadd.f32 1.0, %v2948_v3  ;;  %v1593_v63 = vadd.f32 %v3112_v12, %v1592_v39 }
 0x9e1   : > { %1812 = vmatpush.msra.mxu1 %v1784_v25 }
 0x9e2   : > { %v1608_v23 = vmul.f32 %v1606_v6, %v1522_v41  ;;  %v1597_v44 = vsel %vm1596_vm11, %v3112_v12, %v1593_v63  ;;  %v3048_v41 = vld [vmem:[%s4052_s7 + $0xd] ss:$0 sm:$0xff] }
 0x9e3   : > { %v1602_v45 = vsel %vm1599_vm12, %v1601_v43, %v1597_v44 }
 0x9e4   : > { %2950 = vmatmul.msk.f32.vlgmr.msrb.gmra.mxu2 %vm1620_vm10, %v1608_v23  ;;  %v1603_v46 = vmul.f32 %v1602_v45, %v1578_v38 }
 0x9e6   : > { %v2949_v5 = vclamps-f32 %v1603_v46, 1.0 }
 0x9e8   : > { %v1607_v48 = vadd.f32 1.0, %v2949_v5 }
 0x9ea   : > { %v1609_v21 = vmul.f32 %v1607_v48, %v1523_v47 }
 0x9ec   : > { %2951 = vmatmul.msk.f32.gmra.mxu2 %vm1620_vm10, %v1609_v21 }
 0xa67   : > { %v1644_v52 = vpop.f32.mrf.mxu2 }
 0xa68   : > { %v1645_v54 = vadd.f32 %v3046_v49, %v1644_v52 }
 0xa6a   : > { %v1650_v31 = vadd.f32 %v1645_v54, %v3587_v15 }
 0xa6c   : > { %v1654_v55 = vsel %vm434_vm1, %v1650_v31, 0.0 }
 0xa6d   : > { %1655 = vadd.xlane.f32.xlu2 %v1654_v55 }
 0xa6f   : > { %v1647_v56 = vpop.f32.mrf.mxu2 }
 0xa70   : > { %v1648_v57 = vadd.f32 %v3046_v49, %v1647_v56 }
 0xa72   : > { %v1651_v58 = vadd.f32 %v1648_v57, %v3591_v19 }
 0xa74   : > { %v1657_v27 = vsel %vm434_vm1, %v1651_v58, 0.0 }
 0xa75   : > { %1658 = vadd.xlane.f32.xlu2 %v1657_v27 }
 0xae0   : > { %v1656_v59 = vpop.xlane.xlu2 %1655 }
 0xae1   : > { %v1660_v60 = vmul.f32 %v1656_v59, %v3410_v22 }
 0xae3   : > { %v1662_v61 = vsub.f32 %v1650_v31, %v1660_v60 }
 0xae5   : > { %v1664_v0 = vmul.f32 %v1662_v61, %v1662_v61 }
 0xae7   : > { %v1666_v2 = vsel %vm434_vm1, %v1664_v0, 0.0 }
 0xae8   : > { %1667 = vadd.xlane.f32.xlu2 %v1666_v2  ;;  %v1659_v42 = vpop.xlane.xlu2 %1658 }
 0xae9   : > { %v1661_v15 = vmul.f32 %v1659_v42, %v3410_v22 }
 0xaeb   : > { %v3654_v4 = vsub.f32 %v1651_v58, %v1661_v15 }
 0xaed   : > { %v1665_v7 = vmul.f32 %v3654_v4, %v3654_v4 }
 0xaef   : > { %v1669_v19 = vsel %vm434_vm1, %v1665_v7, 0.0 }
 0xaf0   : > { %1670 = vadd.xlane.f32.xlu0 %v1669_v19 }
 0xb5b   : > { %v1668_v9 = vpop.xlane.xlu2 %1667 }
 0xb5c   : > { %v1672_v51 = vmul.f32 %v1668_v9, %v3410_v22 }
 0xb5e   : > { %v1674_v18 = vadd.f32 1e-05, %v1672_v51 }
 0xb60   : > { %3113 = vrsqrt.f32 %v1674_v18  ;;  %vm1682_vm14 = vweird.f32 %v1674_v18 }
 0xb63   : > { %v1671_v37 = vpop.xlane.xlu0 %1670 }
 0xb64   : > { %v1673_v26 = vmul.f32 %v1671_v37, %v3410_v22 }
 0xb66   : > { %v3114_v12 = vpop.eup %3113  ;;  %v1675_v29 = vadd.f32 1e-05, %v1673_v26 }
 0xb67   : > { %v1677_v28 = vmul.f32 %v3114_v12, %v1674_v18  ;;  %vm1683_vm13 = vweird.f32 %v3114_v12 }
 0xb68   : > { %3115 = vrsqrt.f32 %v1675_v29  ;;  %vm1684_vm15 = vmor %vm1682_vm14, %vm1683_vm13  ;;  %vm1692_vm12 = vweird.f32 %v1675_v29 }
 0xb69   : > { %v1678_v24 = vmul.f32 %v3114_v12, %v1677_v28 }
 0xb6b   : > { %v1679_v30 = vmul.f32 0.5, %v1678_v24  ;;  %v3049_v24 = vld [vmem:[%s4052_s7 + $0x3] ss:$0 sm:$0xff] }
 0xb6d   : > { %v1680_v32 = vsub.f32 1.5, %v1679_v30 }
 0xb6e   : > { %v3116_v33 = vpop.eup %3115 }
 0xb6f   : > { %v1681_v34 = vmul.f32 %v3114_v12, %v1680_v32  ;;  %v1687_v3 = vmul.f32 %v3116_v33, %v1675_v29  ;;  %vm1693_vm11 = vweird.f32 %v3116_v33  ;;  %v3050_v32 = vld [vmem:[%s4052_s7 + $0x4] ss:$0 sm:$0xff] }
 0xb70   : > { %vm1694_vm13 = vmor %vm1692_vm12, %vm1693_vm11 }
 0xb71   : > { %v1685_v36 = vsel %vm1684_vm15, %v3114_v12, %v1681_v34  ;;  %v1688_v40 = vmul.f32 %v3116_v33, %v1687_v3 }
 0xb72   : > { %v1696_v39 = vmul.f32 %v1685_v36, %v1662_v61 }
 0xb73   : > { %v1689_v6 = vmul.f32 0.5, %v1688_v40 }
 0xb74   : > { %v1699_v63 = vmul.f32 %v3047_v35, %v1696_v39 }
 0xb75   : > { %v1690_v23 = vsub.f32 1.5, %v1689_v6 }
 0xb76   : > { %v1702_v43 = vadd.f32 %v3048_v41, %v1699_v63 }
 0xb77   : > { %v1691_v38 = vmul.f32 %v3116_v33, %v1690_v23 }
 0xb78   : > { %1704 = vst.msk [vmem:[%s387_s11] sm:$0xff] %vm434_vm1, %v1702_v43  ;;  %v1708_v44 = vrot.slane %v1702_v43, 7 }
 0xb79   : > { %v1695_v45 = vsel %vm1694_vm13, %v3116_v33, %v1691_v38 }
 0xb7a   : > { %v1713_v46 = vsel %vm687_vm7, 0.0, %v1708_v44  ;;  %v1697_v5 = vmul.f32 %v1695_v45, %v3654_v4 }
 0xb7b   : > { %2954 = vmatmul.msk.f32.vlgmr.msra.gmra.mxu0 %vm434_vm1, %v1713_v46  ;;  %v1725_v52 = vrot.slane %v1713_v46, 1  ;;  %v1788_v54 = vrot.slane %v1713_v46, 2 }
 0xb7c   : > { %v1700_v47 = vmul.f32 %v3047_v35, %v1697_v5 }
 0xb7e   : > { %v1703_v48 = vadd.f32 %v3048_v41, %v1700_v47  ;;  %v1926_v47 = vld [vmem:[%s4049_s4 + $0x118] sm:$0xff] }
 0xb80   : > { %1705 = vst.msk [vmem:[%s387_s11 + $0x8] sm:$0xff] %vm434_vm1, %v1703_v48  ;;  %v1709_v21 = vrot.slane %v1703_v48, 7  ;;  %v1925_v48 = vld [vmem:[%s4049_s4 + $0x110] sm:$0xff] }
 0xb82   : > { %v1710_v49 = vsel %vm687_vm7, %v1708_v44, %v1709_v21  ;;  %v1714_v58 = vsel %vm687_vm7, %v1709_v21, 0.0  ;;  %v1930_v21 = vld [vmem:[%s4049_s4 + $0x138] sm:$0xff] }
 0xb83   : > { %v1726_v31 = vrot.slane %v1710_v49, 1  ;;  %2955 = vmatmul.msk.f32.gmra.mxu0 %vm434_vm1, %v1710_v49  ;;  %v1789_v55 = vrot.slane %v1710_v49, 2  ;;  %v1728_v27 = vrot.slane %v1714_v58, 1  ;;  %v1791_v59 = vrot.slane %v1714_v58, 2  ;;  %1950 = vmatpush.msra.mxu3 %v1930_v21 }
 0xb85   : > { %v1727_v56 = vsel %vm428_vm2, %v1725_v52, %v1726_v31  ;;  %v1790_v57 = vsel %vm493_vm3, %v1788_v54, %v1789_v55  ;;  %v1729_v60 = vsel %vm428_vm2, %v1726_v31, %v1728_v27  ;;  %v1792_v61 = vsel %vm493_vm3, %v1789_v55, %v1791_v59  ;;  %v2013_v52 = vld [vmem:[%s4049_s4 + $0x178] sm:$0xff]  ;;  %v1924_v31 = vld [vmem:[%s4049_s4 + $0x108] sm:$0xff]  ;;  %v1929_v55 = vld [vmem:[%s4049_s4 + $0x130] sm:$0xff] }
 0xb86   : > { %2952 = vmatmul.msk.f32.vlgmr.msrb.gmra.mxu3 %vm434_vm1, %v1727_v56  ;;  %2956 = vmatmul.msk.f32.vlgmr.msra.gmra.mxu1 %vm434_vm1, %v1790_v57  ;;  %v2043_v54 = vld [vmem:[%s4049_s4 + $0x198] sm:$0xff]  ;;  %v2012_v56 = vld [vmem:[%s4049_s4 + $0x170] sm:$0xff]  ;;  %v1928_v27 = vld [vmem:[%s4049_s4 + $0x128] sm:$0xff] }
 0xb87   : > { %2031 = vmatpush.msrb.mxu0 %v2013_v52  ;;  %2061 = vmatpush.msrb.mxu1 %v2043_v54  ;;  %v2042_v57 = vld [vmem:[%s4049_s4 + $0x190] sm:$0xff] }
 0xb88   : > { %1951 = vmatpush.msra.mxu3 %v1929_v55  ;;  %v2101_v55 = vld [vmem:[%s4049_s4 + $0x1c8] sm:$0xff] }
 0xb89   : > { %2032 = vmatpush.msrb.mxu0 %v2012_v56  ;;  %2062 = vmatpush.msrb.mxu1 %v2042_v57 }
 0xb8a   : > { %1952 = vmatpush.msra.mxu3 %v1928_v27 }
 0xb8e   : > { %2953 = vmatmul.msk.f32.gmra.mxu3 %vm434_vm1, %v1729_v60  ;;  %2957 = vmatmul.msk.f32.gmra.mxu1 %vm434_vm1, %v1792_v61  ;;  %v1923_v60 = vld [vmem:[%s4049_s4 + $0x100] sm:$0xff] }
 0xbf8   : > { %v1778_v0 = vpop.f32.mrf.mxu0 }
 0xc00   : > { %v1781_v15 = vpop.f32.mrf.mxu0 }
 0xc03   : > { %v1814_v2 = vpop.f32.mrf.mxu1 }
 0xc09   : > { %v1751_v42 = vpop.f32.mrf.mxu3 }
 0xc0a   : > { %v1779_v7 = vadd.f32 %v1778_v0, %v1751_v42  ;;  %v2011_v0 = vld [vmem:[%s4049_s4 + $0x168] sm:$0xff]  ;;  %v2073_v42 = vld [vmem:[%s4049_s4 + $0x1b8] sm:$0xff] }
 0xc0b   : > { %v1817_v53 = vpop.f32.mrf.mxu1  ;;  %2033 = vmatpush.msrb.mxu0 %v2011_v0 }
 0xc0c   : > { %v1820_v9 = vadd.f32 %v1814_v2, %v1779_v7  ;;  %v2041_v2 = vld [vmem:[%s4049_s4 + $0x188] sm:$0xff]  ;;  %v2040_v7 = vld [vmem:[%s4049_s4 + $0x180] sm:$0xff] }
 0xc0d   : > { %2063 = vmatpush.msrb.mxu1 %v2041_v2 }
 0xc0f   : > { %2064 = vmatpush.msrb.mxu1 %v2040_v7 }
 0xc11   : > { %v1754_v4 = vpop.f32.mrf.mxu3 }
 0xc12   : > { %v1782_v19 = vadd.f32 %v1781_v15, %v1754_v4  ;;  %v1927_v15 = vld [vmem:[%s4049_s4 + $0x120] sm:$0xff] }
 0xc13   : > { %v2010_v4 = vld [vmem:[%s4049_s4 + $0x160] sm:$0xff]  ;;  %1953 = vmatpush.msra.mxu3 %v1927_v15 }
 0xc14   : > { %v1821_v8 = vadd.f32 %v1817_v53, %v1782_v19  ;;  %2034 = vmatpush.msrb.mxu0 %v2010_v4 }
 0xc16   : > { %1840 = vmatpush.msra.mxu2 %v1821_v8  ;;  %v2072_v8 = vld [vmem:[%s4049_s4 + $0x1b0] sm:$0xff] }
 0xc18   : > { %1841 = vmatpush.msra.mxu2 %v1820_v9  ;;  %v1983_v9 = vld [vmem:[%s4049_s4 + $0x158] sm:$0xff] }
 0xc19   : > { %2958 = vmatmul.msk.f32.vlgmr.msra.gmra.mxu2 %vm959_vm9, %v1822_v10  ;;  %v2133_v10 = vld [vmem:[%s4049_s4 + $0x1f8] sm:$0xff]  ;;  %2001 = vmatpush.msrb.mxu3 %v1983_v9 }
 0xc1a   : > { %1972 = vmatpush.msrb.mxu2 %v1926_v47  ;;  %2151 = vmatpush.msra.mxu0 %v2133_v10 }
 0xc1c   : > { %1973 = vmatpush.msrb.mxu2 %v1925_v48 }
 0xc1e   : > { %1974 = vmatpush.msrb.mxu2 %v1924_v31  ;;  %v2102_v31 = vld [vmem:[%s4049_s4 + $0x1d0] sm:$0xff] }
 0xc20   : > { %1975 = vmatpush.msrb.mxu2 %v1923_v60  ;;  %v2100_v60 = vld [vmem:[%s4049_s4 + $0x1c0] sm:$0xff] }
 0xc22   : > { %2091 = vmatpush.msra.mxu2 %v2073_v42 }
 0xc24   : > { %2092 = vmatpush.msra.mxu2 %v2072_v8 }
 0xc9c   : > { %v1843_v11 = vpop.f32.mrf.mxu2 }
 0xc9d   : > { %v1848_v13 = vsel %vm434_vm1, %v1843_v11, 0.0 }
 0xc9e   : > { %1849 = vadd.xlane.f32.xlu2 %v1848_v13  ;;  %v1982_v13 = vld [vmem:[%s4049_s4 + $0x150] sm:$0xff] }
 0xc9f   : > { %2002 = vmatpush.msrb.mxu3 %v1982_v13 }
 0xd11   : > { %v1850_v51 = vpop.xlane.xlu2 %1849 }
 0xd12   : > { %v1851_v14 = vmul.f32 %v1850_v51, %v3410_v22  ;;  %v2132_v51 = vld [vmem:[%s4049_s4 + $0x1f0] sm:$0xff] }
 0xd13   : > { %2152 = vmatpush.msra.mxu0 %v2132_v51 }
 0xd14   : > { %v1852_v16 = vsub.f32 %v1843_v11, %v1851_v14  ;;  %v2071_v11 = vld [vmem:[%s4049_s4 + $0x1a8] sm:$0xff]  ;;  %v2070_v14 = vld [vmem:[%s4049_s4 + $0x1a0] sm:$0xff] }
 0xd15   : > { %2093 = vmatpush.msra.mxu2 %v2071_v11 }
 0xd16   : > { %v1853_v17 = vmul.f32 %v1852_v16, %v1852_v16 }
 0xd17   : > { %2094 = vmatpush.msra.mxu2 %v2070_v14 }
 0xd18   : > { %v1854_v1 = vsel %vm434_vm1, %v1853_v17, 0.0 }
 0xd19   : > { %1855 = vadd.xlane.f32.xlu0 %v1854_v1  ;;  %v2131_v1 = vld [vmem:[%s4049_s4 + $0x1e8] sm:$0xff] }
 0xd1a   : > { %2153 = vmatpush.msra.mxu0 %v2131_v1  ;;  %v3051_v1 = vld [vmem:[%s4052_s7 + $0x5] ss:$0 sm:$0xff] }
 0xd8c   : > { %v1856_v18 = vpop.xlane.xlu0 %1855 }
 0xd8d   : > { %v1857_v37 = vmul.f32 %v1856_v18, %v3410_v22  ;;  %v1980_v18 = vld [vmem:[%s4049_s4 + $0x140] sm:$0xff] }
 0xd8f   : > { %v1858_v20 = vadd.f32 1e-05, %v1857_v37  ;;  %v2130_v37 = vld [vmem:[%s4049_s4 + $0x1e0] sm:$0xff] }
 0xd90   : > { %2154 = vmatpush.msra.mxu0 %v2130_v37 }
 0xd91   : > { %3117 = vrsqrt.f32 %v1858_v20  ;;  %vm1865_vm14 = vweird.f32 %v1858_v20 }
 0xd97   : > { %v3118_v62 = vpop.eup %3117 }
 0xd98   : > { %v1860_v25 = vmul.f32 %v3118_v62, %v1858_v20  ;;  %vm1866_vm9 = vweird.f32 %v3118_v62 }
 0xd99   : > { %vm1867_vm15 = vmor %vm1865_vm14, %vm1866_vm9 }
 0xd9a   : > { %v1861_v26 = vmul.f32 %v3118_v62, %v1860_v25 }
 0xd9c   : > { %v1862_v12 = vmul.f32 0.5, %v1861_v26 }
 0xd9e   : > { %v1863_v28 = vsub.f32 1.5, %v1862_v12 }
 0xda0   : > { %v1864_v29 = vmul.f32 %v3118_v62, %v1863_v28 }
 0xda2   : > { %v1868_v30 = vsel %vm1867_vm15, %v3118_v62, %v1864_v29 }
 0xda3   : > { %v1869_v33 = vmul.f32 %v1868_v30, %v1852_v16  ;;  %v1981_v16 = vld [vmem:[%s4049_s4 + $0x148] sm:$0xff] }
 0xda4   : > { %2003 = vmatpush.msrb.mxu3 %v1981_v16 }
 0xda5   : > { %v1871_v34 = vmul.f32 %v3049_v24, %v1869_v33 }
 0xda6   : > { %2004 = vmatpush.msrb.mxu3 %v1980_v18 }
 0xda7   : > { %v3737_v3 = vadd.f32 %v3050_v32, %v1871_v34 }
 0xda9   : > { %v3741_v35 = vmul.f32 %v3737_v3, %v3384_v50 }
 0xdab   : > { %v1876_v36 = vmul.f32 %v3741_v35, %v3741_v35 }
 0xdad   : > { %v3745_v39 = vmin.f32 %v1876_v36, 16.0 }
 0xdaf   : > { %v1878_v40 = vmul.f32 2.1237322e-06, %v3745_v39  ;;  %v1889_v41 = vmul.f32 3.8918573e-05, %v3745_v39 }
 0xdb1   : > { %v1879_v6 = vadd.f32 0.00028619796, %v1878_v40  ;;  %v1890_v63 = vadd.f32 0.001143296, %v1889_v41  ;;  %v1874_v41 = vmul.f32 0.5, %v3737_v3  ;;  %v2103_v3 = vld [vmem:[%s4049_s4 + $0x1d8] sm:$0xff] }
 0xdb3   : > { %v1880_v23 = vmul.f32 %v1879_v6, %v3745_v39  ;;  %v1891_v43 = vmul.f32 %v1890_v63, %v3745_v39 }
 0xdb5   : > { %v1892_v38 = vadd.f32 0.014752088, %v1891_v43  ;;  %v1881_v44 = vadd.f32 0.0036580483, %v1880_v23 }
 0xdb7   : > { %v1893_v45 = vmul.f32 %v1892_v38, %v3745_v39  ;;  %v1882_v5 = vmul.f32 %v1881_v44, %v3745_v39 }
 0xdb9   : > { %v1894_v46 = vadd.f32 0.112945676, %v1893_v45  ;;  %v1883_v59 = vadd.f32 0.05243302, %v1882_v5 }
 0xdbb   : > { %v1895_v49 = vmul.f32 %v1894_v46, %v3745_v39  ;;  %v1884_v53 = vmul.f32 %v1883_v59, %v3745_v39 }
 0xdbd   : > { %v1896_v58 = vadd.f32 0.4994258, %v1895_v49  ;;  %v1885_v17 = vadd.f32 0.18741608, %v1884_v53 }
 0xdbf   : > { %v1897_v61 = vmul.f32 %v1896_v58, %v3745_v39  ;;  %v1886_v62 = vmul.f32 %v1885_v17, %v3745_v39 }
 0xdc1   : > { %v1898_v19 = vadd.f32 1.0, %v1897_v61  ;;  %v1887_v28 = vadd.f32 1.1283791, %v1886_v62 }
 0xdc3   : > { %3119 = vrcp.f32 %v1898_v19  ;;  %v1910_v12 = vand.u32 2147483648, %v1898_v19  ;;  %v1908_v24 = vand.u32 2147483647, %v1898_v19  ;;  %vm1904_vm12 = vweird.f32 %v1898_v19 }
 0xdc4   : > { %v1888_v33 = vmul.f32 %v1887_v28, %v3741_v35 }
 0xdc5   : > { %v1911_v32 = vor.u32 1.1754944e-38, %v1910_v12  ;;  %vm1909_vm9 = vcmp.eq.f32.partialorder %v1908_v24, 8.507059e+37 }
 0xdc9   : > { %v3120_v20 = vpop.eup %3119 }
 0xdca   : > { %v1900_v25 = vmul.f32 %v3120_v20, %v1898_v19  ;;  %vm1905_vm11 = vweird.f32 %v3120_v20 }
 0xdcb   : > { %vm1906_vm13 = vmor %vm1904_vm12, %vm1905_vm11 }
 0xdcc   : > { %v1901_v26 = vsub.f32 1.0, %v1900_v25 }
 0xdce   : > { %v1902_v29 = vmul.f32 %v3120_v20, %v1901_v26 }
 0xdd0   : > { %v1903_v30 = vadd.f32 %v3120_v20, %v1902_v29 }
 0xdd2   : > { %v1907_v34 = vsel %vm1906_vm13, %v3120_v20, %v1903_v30 }
 0xdd3   : > { %v1912_v36 = vsel %vm1909_vm9, %v1911_v32, %v1907_v34 }
 0xdd4   : > { %v1913_v40 = vmul.f32 %v1912_v36, %v1888_v33 }
 0xdd6   : > { %v2959_v39 = vclamps-f32 %v1913_v40, 1.0 }
 0xdd8   : > { %v1916_v6 = vadd.f32 1.0, %v2959_v39 }
 0xdda   : > { %v3843_v63 = vmul.f32 %v1916_v6, %v1874_v41  ;;  %v2212_v41 = vld [vmem:[%s4050_s5 + $0x38] sm:$0xff] }
 0xddb   : > { %2230 = vmatpush.msra.mxu1 %v2212_v41 }
 0xddc   : > { %v1919_v23 = vrot.slane %v3843_v63, 4 }
 0xdde   : > { %v1921_v43 = vsel %vm410_vm0, 0.0, %v1919_v23  ;;  %v1922_v38 = vsel %vm410_vm0, %v1919_v23, 0.0  ;;  %v2211_v23 = vld [vmem:[%s4050_s5 + $0x30] sm:$0xff] }
 0xddf   : > { %2961 = vmatmul.msk.f32.vlgmr.msrb.gmra.mxu2 %vm434_vm1, %v1921_v43  ;;  %v1933_v44 = vrot.slane %v1921_v43, 1  ;;  %v1934_v35 = vrot.slane %v1922_v38, 1  ;;  %v2014_v45 = vrot.slane %v1921_v43, 3  ;;  %v2015_v46 = vrot.slane %v1922_v38, 3  ;;  %2231 = vmatpush.msra.mxu1 %v2211_v23 }
 0xde0   : > { %v2044_v5 = vrot.slane %v1921_v43, 4  ;;  %v2045_v47 = vrot.slane %v1922_v38, 4  ;;  %v2074_v52 = vrot.slane %v1921_v43, 5  ;;  %v2075_v54 = vrot.slane %v1922_v38, 5 }
 0xde1   : > { %v1935_v48 = vsel %vm428_vm2, %v1933_v44, %v1934_v35  ;;  %v2016_v21 = vsel %vm532_vm4, %v2014_v45, %v2015_v46  ;;  %v1984_v56 = vrot.slane %v1921_v43, 2  ;;  %v1985_v57 = vrot.slane %v1922_v38, 2  ;;  %v2209_v35 = vld [vmem:[%s4050_s5 + $0x20] sm:$0xff] }
 0xde2   : > { %2960 = vmatmul.msk.f32.vlgmr.msra.gmra.mxu3 %vm434_vm1, %v1935_v48  ;;  %2963 = vmatmul.msk.f32.vlgmr.msrb.gmra.mxu0 %vm434_vm1, %v2016_v21  ;;  %v2046_v49 = vsel %vm410_vm0, %v2044_v5, %v2045_v47  ;;  %v2134_v58 = vrot.slane %v1921_v43, 7  ;;  %v2135_v27 = vrot.slane %v1922_v38, 7  ;;  %v2076_v59 = vsel %vm609_vm5, %v2074_v52, %v2075_v54 }
 0xde3   : > { %2964 = vmatmul.msk.f32.vlgmr.msrb.gmra.mxu1 %vm434_vm1, %v2046_v49  ;;  %2121 = vmatpush.msra.mxu3 %v2103_v3  ;;  %v1986_v61 = vsel %vm493_vm3, %v1984_v56, %v1985_v57  ;;  %v2104_v2 = vrot.slane %v1921_v43, 6  ;;  %v2105_v42 = vrot.slane %v1922_v38, 6  ;;  %v2210_v43 = vld [vmem:[%s4050_s5 + $0x28] sm:$0xff] }
 0xde4   : > { %v2136_v0 = vsel %vm687_vm7, %v2134_v58, %v2135_v27  ;;  %2232 = vmatpush.msra.mxu1 %v2210_v43 }
 0xde5   : > { %2122 = vmatpush.msra.mxu3 %v2102_v31  ;;  %v2106_v15 = vsel %vm648_vm6, %v2104_v2, %v2105_v42 }
 0xde6   : > { %2233 = vmatpush.msra.mxu1 %v2209_v35 }
 0xde7   : > { %2965 = vmatmul.msk.f32.vlgmr.msra.gmra.mxu2 %vm434_vm1, %v2076_v59  ;;  %2123 = vmatpush.msra.mxu3 %v2101_v55 }
 0xde9   : > { %2124 = vmatpush.msra.mxu3 %v2100_v60 }
 0xdea   : > { %2962 = vmatmul.msk.f32.vlgmr.msrb.gmra.mxu3 %vm434_vm1, %v1986_v61  ;;  %2967 = vmatmul.msk.f32.vlgmr.msra.gmra.mxu0 %vm434_vm1, %v2136_v0 }
 0xdf2   : > { %2966 = vmatmul.msk.f32.vlgmr.msra.gmra.mxu3 %vm434_vm1, %v2106_v15 }
 0xe5f   : > { %v2036_v53 = vpop.f32.mrf.mxu0 }
 0xe60   : > { %v2066_v11 = vpop.f32.mrf.mxu1 }
 0xe62   : > { %v1977_v7 = vpop.f32.mrf.mxu2 }
 0xe65   : > { %v1955_v4 = vpop.f32.mrf.mxu3 }
 0xe66   : > { %v1978_v19 = vadd.f32 %v1977_v7, %v1955_v4  ;;  %v3052_v4 = vld [vmem:[%s4052_s7 + $0xe] ss:$0 sm:$0xff] }
 0xe67   : > { %v2156_v18 = vpop.f32.mrf.mxu0 }
 0xe6a   : > { %v2096_v51 = vpop.f32.mrf.mxu2 }
 0xe6d   : > { %v2006_v8 = vpop.f32.mrf.mxu3 }
 0xe6e   : > { %v2009_v9 = vadd.f32 %v2006_v8, %v1978_v19 }
 0xe70   : > { %v2039_v10 = vadd.f32 %v2036_v53, %v2009_v9  ;;  %v3053_v53 = vld [vmem:[%s382_s28] ss:$0 sm:$0xff] }
 0xe72   : > { %v2069_v13 = vadd.f32 %v2066_v11, %v2039_v10 }
 0xe74   : > { %v2099_v14 = vadd.f32 %v2096_v51, %v2069_v13 }
 0xe75   : > { %v2126_v16 = vpop.f32.mrf.mxu3 }
 0xe76   : > { %v2129_v17 = vadd.f32 %v2126_v16, %v2099_v14 }
 0xe78   : > { %v2159_v37 = vadd.f32 %v2156_v18, %v2129_v17 }
 0xe7a   : > { %v2162_v20 = vadd.f32 %v3051_v1, %v2159_v37  ;;  %v2305_v1 = vld [vmem:[%s4049_s4 + $0x2c8] sm:$0xff] }
 0xe7c   : > { %v2164_v62 = vmul.f32 %v2162_v20, %v3384_v50  ;;  %v2163_v0 = vmul.f32 0.5, %v2162_v20 }
 0xe7e   : > { %v2165_v25 = vmul.f32 %v2164_v62, %v2164_v62 }
 0xe80   : > { %v2166_v26 = vmin.f32 %v2165_v25, 16.0 }
 0xe82   : > { %v2167_v12 = vmul.f32 2.1237322e-06, %v2166_v26  ;;  %v2178_v28 = vmul.f32 3.8918573e-05, %v2166_v26 }
 0xe84   : > { %v2168_v29 = vadd.f32 0.00028619796, %v2167_v12  ;;  %v2179_v24 = vadd.f32 0.001143296, %v2178_v28 }
 0xe86   : > { %v2169_v30 = vmul.f32 %v2168_v29, %v2166_v26  ;;  %v2180_v32 = vmul.f32 %v2179_v24, %v2166_v26 }
 0xe88   : > { %v2181_v33 = vadd.f32 0.014752088, %v2180_v32  ;;  %v2170_v34 = vadd.f32 0.0036580483, %v2169_v30 }
 0xe8a   : > { %v2182_v36 = vmul.f32 %v2181_v33, %v2166_v26  ;;  %v2171_v39 = vmul.f32 %v2170_v34, %v2166_v26 }
 0xe8c   : > { %v2183_v40 = vadd.f32 0.112945676, %v2182_v36  ;;  %v2172_v44 = vadd.f32 0.05243302, %v2171_v39 }
 0xe8e   : > { %v2184_v6 = vmul.f32 %v2183_v40, %v2166_v26  ;;  %v2173_v5 = vmul.f32 %v2172_v44, %v2166_v26 }
 0xe90   : > { %v2185_v38 = vadd.f32 0.4994258, %v2184_v6  ;;  %v2174_v47 = vadd.f32 0.18741608, %v2173_v5 }
 0xe92   : > { %v2186_v45 = vmul.f32 %v2185_v38, %v2166_v26  ;;  %v2175_v48 = vmul.f32 %v2174_v47, %v2166_v26 }
 0xe94   : > { %v2187_v46 = vadd.f32 1.0, %v2186_v45  ;;  %v2176_v54 = vadd.f32 1.1283791, %v2175_v48 }
 0xe96   : > { %3121 = vrcp.f32 %v2187_v46  ;;  %v2199_v52 = vand.u32 2147483648, %v2187_v46  ;;  %v2197_v55 = vand.u32 2147483647, %v2187_v46  ;;  %vm2193_vm2 = vweird.f32 %v2187_v46 }
 0xe97   : > { %v2177_v58 = vmul.f32 %v2176_v54, %v2164_v62 }
 0xe98   : > { %v2200_v57 = vor.u32 1.1754944e-38, %v2199_v52  ;;  %vm2198_vm4 = vcmp.eq.f32.partialorder %v2197_v55, 8.507059e+37 }
 0xe9c   : > { %v3122_v3 = vpop.eup %3121 }
 0xe9d   : > { %v2189_v21 = vmul.f32 %v3122_v3, %v2187_v46  ;;  %vm2194_vm0 = vweird.f32 %v3122_v3 }
 0xe9e   : > { %vm2195_vm3 = vmor %vm2193_vm2, %vm2194_vm0 }
 0xe9f   : > { %v2190_v49 = vsub.f32 1.0, %v2189_v21 }
 0xea1   : > { %v2191_v31 = vmul.f32 %v3122_v3, %v2190_v49 }
 0xea3   : > { %v2192_v56 = vadd.f32 %v3122_v3, %v2191_v31 }
 0xea5   : > { %v2196_v27 = vsel %vm2195_vm3, %v3122_v3, %v2192_v56 }
 0xea6   : > { %v2201_v59 = vsel %vm2198_vm4, %v2200_v57, %v2196_v27 }
 0xea7   : > { %v2202_v60 = vmul.f32 %v2201_v59, %v2177_v58 }
 0xea9   : > { %v2968_v61 = vclamps-f32 %v2202_v60, 1.0 }
 0xeab   : > { %v2205_v2 = vadd.f32 1.0, %v2968_v61 }
 0xead   : > { %v2206_v42 = vmul.f32 %v2205_v2, %v2163_v0  ;;  %v2371_v0 = vld [vmem:[%s4049_s4 + $0x2d0] sm:$0xff]  ;;  %v2483_v2 = vld [vmem:[%s4049_s4 + $0x2d8] sm:$0xff] }
 0xeaf   : > { %v3892_v15 = vadd.f32 %v2206_v42, %v3843_v63 }
 0xeb1   : > { %2969 = vmatmul.msk.f32.vlgmr.msra.gmra.mxu1 %vm434_vm1, %v3892_v15 }
 0xf2e   : > { %v2235_v7 = vpop.f32.mrf.mxu1 }
 0xf2f   : > { %v3899_v19 = vadd.f32 %v3052_v4, %v2235_v7 }
 0xf31   : > { %2242 = vrot.lane.b32.xlu1 %v3899_v19, %s3156_s17 }
 0xf39   : > { %2306 = vrot.lane.b32.xlu1 %v3899_v19, %s3157_s19 }
 0xf41   : > { %2418 = vrot.lane.b32.xlu1 %v3899_v19, %s3163_s24 }
 0xfa3   : > { %v2243_v63 = vpop.permute.xlu1 %2242 }
 0xfa4   : > { %2970 = vmatpush.xpose.msk.msrb.mxu2 %vm927_vm8, %v2243_v63 }
 0xfa7   : > { %2971 = vmatmul.msk.f32.vlgmr.msrb.gmra.mxu2 %vm927_vm8, %v3899_v19 }
 0xfa8   : > { %2390 = vmatpush.msra.mxu2 %v2371_v0  ;;  %v2706_v0 = vld [vmem:[%s4049_s4 + $0x300] sm:$0xff] }
 0xfaa   : > { %2502 = vmatpush.msrb.mxu2 %v2483_v2 }
 0xfab   : > { %v2307_v25 = vpop.permute.xlu1 %2306 }
 0xfb3   : > { %v2419_v28 = vpop.permute.xlu1 %2418 }
0x102a   : > { %v2265_v8 = vpop.f32.mrf.mxu2 }
0x102b   : > { %v2266_v9 = vadd.f32 %v3053_v53, %v2265_v8  ;;  %v2573_v8 = vld [vmem:[%s4049_s4 + $0x2e0] sm:$0xff] }
0x102d   : > { %v2268_v10 = vsel %vm927_vm8, %v2266_v9, -inf }
0x102e   : > { %2269 = vmax.xlane.f32.xlu2 %v2268_v10 }
0x1046   : > { %2279 = vrot.lane.b32.xlu2 %v3899_v19, %s3161_s22 }
0x104e   : > { %2420 = vrot.lane.b32.xlu2 %v3899_v19, %s3159_s16  ;;  %s4059_s16 = smov 48  }
0x1056   : > { %2508 = vrot.lane.b32.xlu2 %v3899_v19, %s3160_s21  ;;  %s4060_s21 = smov 40  }
0x10a1   : > { %v2270_v11 = vpop.xlane.xlu2 %2269 }
0x10a2   : > { %v2271_v13 = vsub.f32 %v2266_v9, %v2270_v11 }
0x10a4   : > { %v2272_v51 = vmul.f32 1.442695, %v2271_v13 }
0x10a6   : > { %3123 = vpow2.f32 %v2272_v51 }
0x10a9   : > { %v2280_v14 = vpop.permute.xlu2 %2279 }
0x10aa   : > { %2300 = vmatpush.msrb.mxu3 %v2280_v14  ;;  %v3054_v14 = vld [vmem:[%s4052_s7 + $0xf] ss:$0 sm:$0xff] }
0x10ac   : > { %v3124_v16 = vpop.eup %3123  ;;  %2413 = vmatpush.msra.mxu3 %v2305_v1 }
0x10ad   : > { %v2274_v17 = vsel %vm927_vm8, %v3124_v16, 0.0 }
0x10ae   : > { %2275 = vadd.xlane.f32.xlu0 %v2274_v17 }
0x10b1   : > { %v2421_v26 = vpop.permute.xlu2 %2420 }
0x10b9   : > { %v2509_v30 = vpop.permute.xlu2 %2508 }
0x10c2   : > { %2308 = vrot.lane.b32.xlu0 %v3899_v19, %s3162_s23 }
0x10ca   : > { %2510 = vrot.lane.b32.xlu0 %v3899_v19, %s3158_s20  ;;  %s4058_s20 = smov 56  }
0x1121   : > { %v2276_v18 = vpop.xlane.xlu0 %2275 }
0x1122   : > { %3125 = vrcp.f32 %v2276_v18 }
0x1128   : > { %v3126_v37 = vpop.eup %3125 }
0x1129   : > { %v2278_v20 = vmul.f32 %v3126_v37, %v3124_v16 }
0x112b   : > { %2972 = vmatmul.msk.f32.vlgmr.msrb.gmra.mxu3 %vm927_vm8, %v2278_v20 }
0x1134   : > { %v2309_v62 = vpop.permute.xlu0 %2308 }
0x1135   : > { %2973 = vmatpush.xpose.msk.msrb.mxu0 %vm927_vm8, %v2309_v62 }
0x1138   : > { %2974 = vmatmul.msk.f32.vlgmr.msrb.gmra.mxu0 %vm927_vm8, %v2307_v25 }
0x1139   : > { %2978 = vmatpush.xpose.msk.msra.mxu0 %vm927_vm8, %v2421_v26 }
0x113c   : > { %v2511_v12 = vpop.permute.xlu0 %2510 }
0x113d   : > { %2982 = vmatpush.xpose.msk.msrb.mxu3 %vm927_vm8, %v2511_v12 }
0x1140   : > { %2979 = vmatmul.msk.f32.vlgmr.msra.gmra.mxu0 %vm927_vm8, %v2419_v28  ;;  %v2633_v28 = vld [vmem:[%s4051_s6 + $0x38] sm:$0xff] }
0x11ae   : > { %v2302_v29 = vpop.f32.mrf.mxu3 }
0x11af   : > { %2977 = vmatmul.msk.f32.vlgmr.msra.gmra.mxu3 %vm927_vm8, %v2302_v29  ;;  %v2632_v29 = vld [vmem:[%s4051_s6 + $0x30] sm:$0xff] }
0x11b5   : > { %v2331_v24 = vpop.f32.mrf.mxu0 }
0x11b6   : > { %v2332_v32 = vadd.f32 %v3053_v53, %v2331_v24  ;;  %v2630_v24 = vld [vmem:[%s4051_s6 + $0x20] sm:$0xff] }
0x11b7   : > { %2983 = vmatmul.msk.f32.vlgmr.msrb.gmra.mxu3 %vm927_vm8, %v2509_v30 }
0x11b8   : > { %v2334_v33 = vsel %vm927_vm8, %v2332_v32, -inf }
0x11b9   : > { %2335 = vmax.xlane.f32.xlu0 %v2334_v33 }
0x11bd   : > { %v2443_v34 = vpop.f32.mrf.mxu0 }
0x11be   : > { %v2444_v36 = vadd.f32 %v3053_v53, %v2443_v34 }
0x11c0   : > { %v2446_v40 = vsel %vm927_vm8, %v2444_v36, -inf }
0x11c1   : > { %2447 = vmax.xlane.f32.xlu1 %v2446_v40 }
0x122c   : > { %v2336_v39 = vpop.xlane.xlu0 %2335 }
0x122d   : > { %v2337_v41 = vsub.f32 %v2332_v32, %v2336_v39 }
0x122f   : > { %v2338_v6 = vmul.f32 1.442695, %v2337_v41 }
0x1231   : > { %3127 = vpow2.f32 %v2338_v6 }
0x1232   : > { %v2415_v23 = vpop.f32.mrf.mxu3 }
0x1234   : > { %v2448_v43 = vpop.xlane.xlu1 %2447 }
0x1235   : > { %v2449_v38 = vsub.f32 %v2444_v36, %v2448_v43 }
0x1237   : > { %v3128_v44 = vpop.eup %3127  ;;  %v2450_v35 = vmul.f32 1.442695, %v2449_v38 }
0x1238   : > { %v2340_v45 = vsel %vm927_vm8, %v3128_v44, 0.0 }
0x1239   : > { %3129 = vpow2.f32 %v2450_v35  ;;  %2341 = vadd.xlane.f32.xlu0 %v2340_v45 }
0x123a   : > { %v2533_v46 = vpop.f32.mrf.mxu3 }
0x123b   : > { %v2534_v5 = vadd.f32 %v3053_v53, %v2533_v46  ;;  %v3057_v46 = vld [vmem:[%s4052_s7 + $0x12] ss:$0 sm:$0xff] }
0x123d   : > { %v2536_v47 = vsel %vm927_vm8, %v2534_v5, -inf }
0x123e   : > { %2537 = vmax.xlane.f32.xlu2 %v2536_v47 }
0x123f   : > { %v3130_v3 = vpop.eup %3129 }
0x1240   : > { %v2452_v48 = vsel %vm927_vm8, %v3130_v3, 0.0 }
0x1241   : > { %2453 = vadd.xlane.f32.xlu1 %v2452_v48 }
0x1256   : > { %2345 = vrot.lane.b32.xlu2 %v3899_v19, %s4058_s20 }
0x125a   : > { %2457 = vrot.lane.b32.xlu1 %v3899_v19, %s4059_s16 }
0x12ac   : > { %v2342_v21 = vpop.xlane.xlu0 %2341 }
0x12ad   : > { %3131 = vrcp.f32 %v2342_v21 }
0x12b1   : > { %v2538_v49 = vpop.xlane.xlu2 %2537 }
0x12b2   : > { %v2539_v52 = vsub.f32 %v2534_v5, %v2538_v49 }
0x12b3   : > { %v3132_v31 = vpop.eup %3131 }
0x12b4   : > { %v2540_v54 = vmul.f32 1.442695, %v2539_v52  ;;  %v2344_v55 = vmul.f32 %v3132_v31, %v3128_v44  ;;  %v2454_v27 = vpop.xlane.xlu1 %2453  ;;  %v3056_v44 = vld [vmem:[%s4052_s7 + $0x11] ss:$0 sm:$0xff] }
0x12b6   : > { %3133 = vpow2.f32 %v2540_v54  ;;  %v2710_v54 = vld [vmem:[%s4049_s4 + $0x320] sm:$0xff] }
0x12b7   : > { %3135 = vrcp.f32 %v2454_v27  ;;  %2724 = vmatpush.msra.mxu3 %v2710_v54 }
0x12b9   : > { %v2346_v56 = vpop.permute.xlu2 %2345 }
0x12ba   : > { %2366 = vmatpush.msrb.mxu1 %v2346_v56  ;;  %v2709_v56 = vld [vmem:[%s4049_s4 + $0x318] sm:$0xff] }
0x12bb   : > { %2975 = vmatmul.msk.f32.vlgmr.msrb.gmra.mxu1 %vm927_vm8, %v2344_v55  ;;  %2725 = vmatpush.msra.mxu3 %v2709_v56 }
0x12bc   : > { %v3134_v57 = vpop.eup %3133 }
0x12bd   : > { %v2542_v58 = vsel %vm927_vm8, %v3134_v57, 0.0  ;;  %v3136_v59 = vpop.eup %3135 }
0x12be   : > { %2543 = vadd.xlane.f32.xlu0 %v2542_v58  ;;  %v2456_v60 = vmul.f32 %v3136_v59, %v3130_v3 }
0x12cc   : > { %v2458_v61 = vpop.permute.xlu1 %2457 }
0x12cd   : > { %2478 = vmatpush.msra.mxu1 %v2458_v61 }
0x12ce   : > { %2980 = vmatmul.msk.f32.vlgmr.msra.gmra.mxu1 %vm927_vm8, %v2456_v60  ;;  %v2707_v60 = vld [vmem:[%s4049_s4 + $0x308] sm:$0xff] }
0x12cf   : > { %2592 = vmatpush.msrb.mxu1 %v2573_v8 }
0x12d2   : > { %2547 = vrot.lane.b32.xlu0 %v3899_v19, %s4060_s21 }
0x1331   : > { %v2544_v42 = vpop.xlane.xlu0 %2543 }
0x1332   : > { %3137 = vrcp.f32 %v2544_v42 }
0x1338   : > { %v2368_v4 = vpop.f32.mrf.mxu1  ;;  %v3138_v7 = vpop.eup %3137 }
0x1339   : > { %2976 = vmatmul.msk.f32.vlgmr.msra.gmra.mxu2 %vm927_vm8, %v2368_v4  ;;  %v2546_v63 = vmul.f32 %v3138_v7, %v3134_v57  ;;  %v2705_v4 = vld [vmem:[%s4049_s4 + $0x2f8] sm:$0xff]  ;;  %v2704_v7 = vld [vmem:[%s4049_s4 + $0x2f0] sm:$0xff] }
0x133a   : > { %2651 = vmatpush.msra.mxu2 %v2633_v28 }
0x133c   : > { %2652 = vmatpush.msra.mxu2 %v2632_v29 }
0x1344   : > { %v2548_v53 = vpop.permute.xlu0 %2547 }
0x1345   : > { %2568 = vmatpush.msrb.mxu0 %v2548_v53  ;;  %v2703_v53 = vld [vmem:[%s4049_s4 + $0x2e8] sm:$0xff] }
0x1346   : > { %2984 = vmatmul.msk.f32.vlgmr.msrb.gmra.mxu0 %vm927_vm8, %v2546_v63 }
0x134b   : > { %v2480_v19 = vpop.f32.mrf.mxu1 }
0x134c   : > { %2981 = vmatmul.msk.f32.vlgmr.msrb.gmra.mxu2 %vm927_vm8, %v2480_v19 }
0x13bc   : > { %v2392_v10 = vpop.f32.mrf.mxu2 }
0x13bd   : > { %v2416_v13 = vadd.f32 %v2415_v23, %v2392_v10  ;;  %v3055_v23 = vld [vmem:[%s4052_s7 + $0x10] ss:$0 sm:$0xff] }
0x13c3   : > { %v2570_v9 = vpop.f32.mrf.mxu0 }
0x13c4   : > { %2985 = vmatmul.msk.f32.vlgmr.msrb.gmra.mxu1 %vm927_vm8, %v2570_v9 }
0x13cf   : > { %v2504_v11 = vpop.f32.mrf.mxu2 }
0x13d0   : > { %v2507_v51 = vadd.f32 %v2504_v11, %v2416_v13 }
0x1441   : > { %v2594_v16 = vpop.f32.mrf.mxu1 }
0x1442   : > { %v2597_v17 = vadd.f32 %v2594_v16, %v2507_v51 }
0x1444   : > { %v2600_v1 = vadd.f32 %v3054_v14, %v2597_v17 }
0x1446   : > { %v2601_v18 = vadd.f32 %v2600_v1, %v3892_v15  ;;  %v2631_v15 = vld [vmem:[%s4051_s6 + $0x28] sm:$0xff] }
0x1447   : > { %2653 = vmatpush.msra.mxu2 %v2631_v15 }
0x1448   : > { %v2604_v37 = vsel %vm434_vm1, %v2601_v18, 0.0 }
0x1449   : > { %2605 = vadd.xlane.f32.xlu2 %v2604_v37  ;;  %2654 = vmatpush.msra.mxu2 %v2630_v24 }
0x14bc   : > { %v2606_v20 = vpop.xlane.xlu2 %2605 }
0x14bd   : > { %v2607_v62 = vmul.f32 %v2606_v20, %v3410_v22 }
0x14bf   : > { %v2608_v25 = vsub.f32 %v2601_v18, %v2607_v62 }
0x14c1   : > { %v2609_v26 = vmul.f32 %v2608_v25, %v2608_v25 }
0x14c3   : > { %v2610_v12 = vsel %vm434_vm1, %v2609_v26, 0.0 }
0x14c4   : > { %2611 = vadd.xlane.f32.xlu1 %v2610_v12 }
0x1537   : > { %v2612_v30 = vpop.xlane.xlu1 %2611 }
0x1538   : > { %v2613_v32 = vmul.f32 %v2612_v30, %v3410_v22 }
0x153a   : > { %v2614_v33 = vadd.f32 1e-05, %v2613_v32 }
0x153c   : > { %3139 = vrsqrt.f32 %v2614_v33  ;;  %vm2621_vm6 = vweird.f32 %v2614_v33 }
0x1542   : > { %v3140_v34 = vpop.eup %3139 }
0x1543   : > { %v2616_v36 = vmul.f32 %v3140_v34, %v2614_v33  ;;  %vm2622_vm5 = vweird.f32 %v3140_v34  ;;  %v3058_v33 = vld [vmem:[%s4052_s7 + $0x13] ss:$0 sm:$0xff] }
0x1544   : > { %vm2623_vm7 = vmor %vm2621_vm6, %vm2622_vm5 }
0x1545   : > { %v2617_v40 = vmul.f32 %v3140_v34, %v2616_v36 }
0x1547   : > { %v2618_v39 = vmul.f32 0.5, %v2617_v40 }
0x1549   : > { %v2619_v41 = vsub.f32 1.5, %v2618_v39 }
0x154b   : > { %v2620_v6 = vmul.f32 %v3140_v34, %v2619_v41 }
0x154d   : > { %v2624_v43 = vsel %vm2623_vm7, %v3140_v34, %v2620_v6 }
0x154e   : > { %v2625_v38 = vmul.f32 %v2624_v43, %v2608_v25 }
0x1550   : > { %v2627_v35 = vmul.f32 %v3055_v23, %v2625_v38 }
0x1552   : > { %v3990_v45 = vadd.f32 %v3056_v44, %v2627_v35 }
0x1554   : > { %2986 = vmatmul.msk.f32.vlgmr.msra.gmra.mxu2 %vm434_vm1, %v3990_v45 }
0x15d7   : > { %v2656_v5 = vpop.f32.mrf.mxu2 }
0x15d8   : > { %v2657_v47 = vadd.f32 %v3057_v46, %v2656_v5 }
0x15da   : > { %v2660_v3 = vmul.f32 %v2657_v47, %v3384_v50  ;;  %v2708_v50 = vld [vmem:[%s4049_s4 + $0x310] sm:$0xff]  ;;  %v2659_v24 = vmul.f32 0.5, %v2657_v47 }
0x15db   : > { %2726 = vmatpush.msra.mxu3 %v2708_v50 }
0x15dc   : > { %v2661_v48 = vmul.f32 %v2660_v3, %v2660_v3 }
0x15dd   : > { %2727 = vmatpush.msra.mxu3 %v2707_v60 }
0x15de   : > { %v2662_v21 = vmin.f32 %v2661_v48, 16.0 }
0x15df   : > { %2728 = vmatpush.msra.mxu3 %v2706_v0 }
0x15e0   : > { %v2663_v49 = vmul.f32 2.1237322e-06, %v2662_v21  ;;  %v2674_v52 = vmul.f32 3.8918573e-05, %v2662_v21 }
0x15e1   : > { %2729 = vmatpush.msra.mxu3 %v2705_v4 }
0x15e2   : > { %v2664_v31 = vadd.f32 0.00028619796, %v2663_v49  ;;  %v2675_v55 = vadd.f32 0.001143296, %v2674_v52  ;;  %v3059_v49 = vld [vmem:[%s4052_s7 + $0x14] ss:$0 sm:$0xff] }
0x15e3   : > { %2730 = vmatpush.msra.mxu3 %v2704_v7 }
0x15e4   : > { %v2665_v57 = vmul.f32 %v2664_v31, %v2662_v21  ;;  %v2676_v58 = vmul.f32 %v2675_v55, %v2662_v21 }
0x15e5   : > { %2731 = vmatpush.msra.mxu3 %v2703_v53 }
0x15e6   : > { %v2677_v27 = vadd.f32 0.014752088, %v2676_v58  ;;  %v2666_v59 = vadd.f32 0.0036580483, %v2665_v57 }
0x15e8   : > { %v2678_v61 = vmul.f32 %v2677_v27, %v2662_v21  ;;  %v2667_v42 = vmul.f32 %v2666_v59, %v2662_v21 }
0x15ea   : > { %v2679_v2 = vadd.f32 0.112945676, %v2678_v61  ;;  %v2668_v8 = vadd.f32 0.05243302, %v2667_v42 }
0x15ec   : > { %v2680_v63 = vmul.f32 %v2679_v2, %v2662_v21  ;;  %v2669_v11 = vmul.f32 %v2668_v8, %v2662_v21 }
0x15ee   : > { %v2681_v19 = vadd.f32 0.4994258, %v2680_v63  ;;  %v2670_v13 = vadd.f32 0.18741608, %v2669_v11 }
0x15f0   : > { %v2682_v9 = vmul.f32 %v2681_v19, %v2662_v21  ;;  %v2671_v14 = vmul.f32 %v2670_v13, %v2662_v21 }
0x15f2   : > { %v2683_v10 = vadd.f32 1.0, %v2682_v9  ;;  %v2672_v18 = vadd.f32 1.1283791, %v2671_v14 }
0x15f4   : > { %3141 = vrcp.f32 %v2683_v10  ;;  %v2695_v1 = vand.u32 2147483648, %v2683_v10  ;;  %v2693_v20 = vand.u32 2147483647, %v2683_v10  ;;  %vm2689_vm14 = vweird.f32 %v2683_v10 }
0x15f5   : > { %v2673_v26 = vmul.f32 %v2672_v18, %v2660_v3 }
0x15f6   : > { %v2696_v25 = vor.u32 1.1754944e-38, %v2695_v1  ;;  %vm2694_vm11 = vcmp.eq.f32.partialorder %v2693_v20, 8.507059e+37 }
0x15fa   : > { %v3142_v51 = vpop.eup %3141 }
0x15fb   : > { %v2685_v16 = vmul.f32 %v3142_v51, %v2683_v10  ;;  %vm2690_vm8 = vweird.f32 %v3142_v51 }
0x15fc   : > { %vm2691_vm15 = vmor %vm2689_vm14, %vm2690_vm8 }
0x15fd   : > { %v2686_v17 = vsub.f32 1.0, %v2685_v16 }
0x15ff   : > { %v2687_v37 = vmul.f32 %v3142_v51, %v2686_v17 }
0x1601   : > { %v2688_v62 = vadd.f32 %v3142_v51, %v2687_v37 }
0x1603   : > { %v2692_v12 = vsel %vm2691_vm15, %v3142_v51, %v2688_v62 }
0x1604   : > { %v2697_v28 = vsel %vm2694_vm11, %v2696_v25, %v2692_v12 }
0x1605   : > { %v2698_v29 = vmul.f32 %v2697_v28, %v2673_v26 }
0x1607   : > { %v2987_v15 = vclamps-f32 %v2698_v29, 1.0 }
0x1609   : > { %v2701_v30 = vadd.f32 1.0, %v2987_v15 }
0x160b   : > { %v2702_v32 = vmul.f32 %v2701_v30, %v2659_v24 }
0x160d   : > { %2988 = vmatmul.msk.f32.vlgmr.msra.gmra.mxu3 %vm1620_vm10, %v2702_v32 }
0x1690   : > { %v2733_v34 = vpop.f32.mrf.mxu3 }
0x1691   : > { %v2734_v36 = vadd.f32 %v3058_v33, %v2733_v34 }
0x1693   : > { %v2736_v40 = vadd.f32 %v2734_v36, %v3990_v45 }
0x1695   : > { %v2739_v39 = vsel %vm434_vm1, %v2736_v40, 0.0 }
0x1696   : > { %2740 = vadd.xlane.f32.xlu0 %v2739_v39 }
0x1709   : > { %v2741_v41 = vpop.xlane.xlu0 %2740 }
0x170a   : > { %v2742_v6 = vmul.f32 %v2741_v41, %v3410_v22 }
0x170c   : > { %v2743_v23 = vsub.f32 %v2736_v40, %v2742_v6 }
0x170e   : > { %v2744_v43 = vmul.f32 %v2743_v23, %v2743_v23 }
0x1710   : > { %v2745_v38 = vsel %vm434_vm1, %v2744_v43, 0.0 }
0x1711   : > { %2746 = vadd.xlane.f32.xlu2 %v2745_v38 }
0x1784   : > { %v2747_v44 = vpop.xlane.xlu2 %2746 }
0x1785   : > { %v2748_v35 = vmul.f32 %v2747_v44, %v3410_v22  ;;  %v3060_v22 = vld [vmem:[%s4052_s7 + $0x15] ss:$0 sm:$0xff] }
0x1787   : > { %v2749_v46 = vadd.f32 1e-05, %v2748_v35 }
0x1789   : > { %3143 = vrsqrt.f32 %v2749_v46  ;;  %vm2756_vm12 = vweird.f32 %v2749_v46 }
0x178f   : > { %v3144_v5 = vpop.eup %3143 }
0x1790   : > { %v2751_v47 = vmul.f32 %v3144_v5, %v2749_v46  ;;  %vm2757_vm10 = vweird.f32 %v3144_v5 }
0x1791   : > { %vm2758_vm13 = vmor %vm2756_vm12, %vm2757_vm10 }
0x1792   : > { %v2752_v45 = vmul.f32 %v3144_v5, %v2751_v47 }
0x1794   : > { %v2753_v3 = vmul.f32 0.5, %v2752_v45 }
0x1796   : > { %v2754_v48 = vsub.f32 1.5, %v2753_v3 }
0x1798   : > { %v2755_v21 = vmul.f32 %v3144_v5, %v2754_v48 }
0x179a   : > { %v2759_v52 = vsel %vm2758_vm13, %v3144_v5, %v2755_v21 }
0x179b   : > { %v2760_v54 = vmul.f32 %v2759_v52, %v2743_v23 }
0x179d   : > { %v2762_v31 = vmul.f32 %v3059_v49, %v2760_v54 }
0x179f   : > { %v2764_v55 = vadd.f32 %v3060_v22, %v2762_v31 }
0x17a1   : > { %2765 = vst.msk [vmem:[%s391_s26] sm:$0xff] %vm434_vm1, %v2764_v55 }
0x17a2 PF: > { %s20_s30 = sadd.s32 1, %s3151_s30  }
0x17a3   : > { %p17_p4 = scmp.ge.s32.totalorder %s20_s30, 4  }
0x17a5   :  { %19 = sbr.rel (!%p17_p4) target bundleno = 1 (0x1), region = 103 }

</bundles_post_ra>
